<compile_context>
chip_gen: v6e
topology: v6e:2x2x1
jax: 0.10.0
libtpu: 0.0.40
codegen_flags: <defaults>
</compile_context>

<pallas_src>
import functools

import jax
import jax.numpy as jnp
from jax.experimental import pallas as pl
from jax.experimental.pallas import tpu as pltpu


# ------------------------------ fused kernel --------------------------------

def _identity_block3_kernel(x_ref, w1_ref, s1_ref, b1_ref,
                            w2_ref, s2_ref, b2_ref,
                            w3_ref, s3_ref, b3_ref,
                            o_ref, h1p_ref, *, K, W, TH):
    # x_ref  : ((H+2p)*W, Cin) bf16  whole image (zero-padded along H), constant
    #                                over the h grid axis -> stays VMEM-resident
    # w1     : (Cin, C1) bf16        s1/b1 : (1, C1) f32  (folded FrozenBN)
    # w2     : (K*K, C1, C2) bf16    s2/b2 : (1, C2) f32
    # w3     : (C2, C3) bf16         s3/b3 : (1, C3) f32  (Cin == C3)
    # o_ref  : (TH*W, C3) f32        TH output rows of this image
    # h1p_ref: VMEM scratch (TH+2p, W_ext, C1) bf16, W_ext = roundup(W+2p, 8)
    pad = (K - 1) // 2
    C1 = w1_ref.shape[1]
    C2 = w2_ref.shape[2]
    HALO = TH + 2 * pad

    h = pl.program_id(1)
    start = h * (TH * W)                      # top of halo window (padded rows * W)
    if (TH * W) % 8 == 0:
        start = pl.multiple_of(start, 8)

    # ---- conv1 (1x1) + bn1 + relu on the TH+2*pad halo rows (halo recomputed,
    #      not re-fetched: 1x1 conv is cheap and x is already resident) ----
    x_halo = x_ref[pl.ds(start, HALO * W), :]                        # bf16
    y1 = jnp.dot(x_halo, w1_ref[...], preferred_element_type=jnp.float32)
    y1 = jnp.maximum(y1 * s1_ref[...] + b1_ref[...], 0.0)           # (HALO*W, C1) f32

    # ---- stage into the VMEM scratch (bf16 for the MXU).  Interior is fully
    #      rewritten each step; only the halo border needs zeroing. ----
    h1p_ref[:, pad:pad + W, :] = y1.astype(h1p_ref.dtype).reshape(HALO, W, C1)
    if pad > 0:
        zcol = jnp.zeros((HALO, pad, C1), h1p_ref.dtype)
        h1p_ref[:, 0:pad, :] = zcol                                  # left border
        h1p_ref[:, pad + W:2 * pad + W, :] = zcol                    # right border
        zrow = jnp.zeros((pad, h1p_ref.shape[1], C1), h1p_ref.dtype)

        @pl.when(h == 0)                        # rows above the image are zero
        def _():
            h1p_ref[0:pad, :, :] = zrow

        @pl.when(h == pl.num_programs(1) - 1)   # rows below the image are zero
        def _():
            h1p_ref[pad + TH:HALO, :, :] = zrow

    # ---- conv2 (KxK, 'same') as K*K shifted matmuls, f32 accumulation.
    #      No im2col patches tensor; ky shifts are along dim 0 (free offset). ----
    acc = jnp.zeros((TH * W, C2), jnp.float32)
    for ky in range(K):
        for kx in range(K):
            tap = h1p_ref[ky:ky + TH, kx:kx + W, :].reshape(TH * W, C1)
            acc = acc + jnp.dot(tap, w2_ref[ky * K + kx],
                                preferred_element_type=jnp.float32)
    y2 = jnp.maximum(acc * s2_ref[...] + b2_ref[...], 0.0)          # (TH*W, C2) f32

    # ---- conv3 (1x1) + bn3 + residual + relu.  Re-read x from VMEM here
    #      instead of pinning it in vregs across all three matmuls. ----
    y3 = jnp.dot(y2.astype(w3_ref.dtype), w3_ref[...],
                 preferred_element_type=jnp.float32)
    x_res = x_ref[pl.ds(start + pad * W, TH * W), :]
    y3 = y3 * s3_ref[...] + b3_ref[...] + x_res.astype(jnp.float32)
    o_ref[...] = jnp.maximum(y3, 0.0).astype(o_ref.dtype)


# ------------------------------- wrapper -------------------------------------

def _fold_bn(weight, bias, mean, var, eps=1e-5):
    """Fold FrozenBatchNorm2d into a per-channel affine (scale, shift), f32."""
    scale = weight / jnp.sqrt(var + eps)
    shift = bias - mean * scale
    return (scale.reshape(1, -1).astype(jnp.float32),
            shift.reshape(1, -1).astype(jnp.float32))


def _pick_vmem_limit():
    """Per-generation scoped-VMEM limit: raise on v5e/v6e, keep headroom on v7x."""
    try:
        cap = pltpu.get_tpu_info().vmem_capacity_bytes
    except Exception:
        cap = 64 * 1024 * 1024
    if cap >= 96 * 1024 * 1024:        # v5e / v6e: 128 MiB physical VMEM
        return 80 * 1024 * 1024
    return 44 * 1024 * 1024            # v7x: 64 MiB physical VMEM


def _default_row_tile(H, W):
    """Largest divisor of H with <= ~4K output pixels per step and 8-aligned rows."""
    best = H
    for th in range(1, H + 1):
        if H % th == 0 and (th * W) % 8 == 0 and th * W <= 4096:
            best = th
    return best


def identity_block3_forward(x_nchw, params, kernel_size, row_tile=None):
    """Pallas implementation of identity_block3.forward (NCHW in / NCHW out)."""
    N, C, H, W = x_nchw.shape
    K = kernel_size
    assert K % 2 == 1, "stride-1 'same' padding assumes an odd kernel_size"
    pad = (K - 1) // 2

    TH = row_tile if row_tile is not None else _default_row_tile(H, W)
    assert H % TH == 0, "row_tile must divide H"
    nH = H // TH
    HALO = TH + 2 * pad
    Hp = H + 2 * pad
    # (8,128) BlockSpec rule on the flattened row dims (relax by padding W if hit).
    assert (TH * W) % 8 == 0 and (Hp * W) % 8 == 0, \
        "flattened row-tile sizes must be multiples of 8 sublanes"

    # ---- weight prep: bf16 MXU operands, folded FrozenBN affines (f32) ----
    w1 = params["w1"][:, :, 0, 0].T.astype(jnp.bfloat16)                  # (Cin, C1)
    C1 = w1.shape[1]
    w2 = jnp.transpose(params["w2"], (2, 3, 1, 0)).astype(jnp.bfloat16)   # (K,K,C1,C2)
    C2 = w2.shape[-1]
    w2 = w2.reshape(K * K, C1, C2)                                        # tap-major
    w3 = params["w3"][:, :, 0, 0].T.astype(jnp.bfloat16)                  # (C2, C3)
    C3 = w3.shape[1]
    assert C3 == C, "residual add requires inplanes == planes[2]"

    s1, b1 = _fold_bn(*params["bn1"])
    s2, b2 = _fold_bn(*params["bn2"])
    s3, b3 = _fold_bn(*params["bn3"])

    # ---- NCHW -> NHWC (lane = channel), bf16; zero-pad along H only (tiny).
    #      The W-direction 'same' halo is built inside the kernel in VMEM. ----
    x_nhwc = jnp.transpose(x_nchw, (0, 2, 3, 1)).astype(jnp.bfloat16)
    if pad > 0:
        x_nhwc = jnp.pad(x_nhwc, ((0, 0), (pad, pad), (0, 0), (0, 0)))
    x2d = x_nhwc.reshape(N * Hp * W, C)

    W_ext = ((W + 2 * pad + 7) // 8) * 8          # 8-aligned scratch sublane dim
    kernel = functools.partial(_identity_block3_kernel, K=K, W=W, TH=TH)

    def _invariant_spec(shape, single_buffer):
        # Grid-invariant operand: constant index map; optionally single-buffered.
        index_map = lambda n, h: (0,) * len(shape)
        if single_buffer:
            return pl.BlockSpec(shape, index_map, pipeline_mode=pl.Buffered(1))
        return pl.BlockSpec(shape, index_map)

    def _run(single_buffer_invariants):
        in_specs = [
            # whole padded image; constant over h => stays resident, no re-DMA
            pl.BlockSpec((Hp * W, C), lambda n, h: (n, 0)),
            _invariant_spec((C, C1), single_buffer_invariants),           # w1
            _invariant_spec((1, C1), single_buffer_invariants),           # scale1
            _invariant_spec((1, C1), single_buffer_invariants),           # bias1
            _invariant_spec((K * K, C1, C2), single_buffer_invariants),   # w2 taps
            _invariant_spec((1, C2), single_buffer_invariants),           # scale2
            _invariant_spec((1, C2), single_buffer_invariants),           # bias2
            _invariant_spec((C2, C3), single_buffer_invariants),          # w3
            _invariant_spec((1, C3), single_buffer_invariants),           # scale3
            _invariant_spec((1, C3), single_buffer_invariants),           # bias3
        ]
        return pl.pallas_call(
            kernel,
            out_shape=jax.ShapeDtypeStruct((N * H * W, C3), jnp.float32),
            grid=(N, nH),
            in_specs=in_specs,
            out_specs=pl.BlockSpec((TH * W, C3), lambda n, h: (n * nH + h, 0)),
            scratch_shapes=[pltpu.VMEM((HALO, W_ext, C1), jnp.bfloat16)],
            compiler_params=pltpu.CompilerParams(
                dimension_semantics=("parallel", "parallel"),
                vmem_limit_bytes=_pick_vmem_limit()),
        )(x2d, w1, s1, b1, w2, s2, b2, w3, s3, b3)

    try:
        out2d = _run(single_buffer_invariants=True)
    except Exception:
        # pipeline_mode=pl.Buffered(1) unsupported by this jax build; defaults
        # (double-buffered invariants) are correct, just use a bit more VMEM.
        out2d = _run(single_buffer_invariants=False)

    out = out2d.reshape(N, H, W, C3)
    return jnp.transpose(out, (0, 3, 1, 2))       # -> NCHW


# ------------------------------ reference ------------------------------------

def _reference_forward(x_nchw, params, kernel_size, eps=1e-5):
    """Pure-JAX reference.  Inputs / staged intermediates are rounded to bf16 the
    same way the kernel feeds the MXU, so the comparison isolates real bugs."""
    f32 = jnp.float32
    rb = lambda a: a.astype(jnp.bfloat16).astype(f32)

    x = rb(jnp.transpose(x_nchw, (0, 2, 3, 1)))

    def conv(h, w_oihw, p):
        w = rb(jnp.transpose(w_oihw, (2, 3, 1, 0)))        # OIHW -> HWIO
        return jax.lax.conv_general_dilated(
            h, w, (1, 1), [(p, p), (p, p)],
            dimension_numbers=("NHWC", "HWIO", "NHWC"),
            precision=jax.lax.Precision.HIGHEST)

    def bn(h, p):
        wt, b, m, v = p
        scale = wt / jnp.sqrt(v + eps)
        return h * scale + (b - m * scale)

    pad = (kernel_size - 1) // 2
    y1 = rb(jax.nn.relu(bn(conv(x, params["w1"], 0), params["bn1"])))
    y2 = rb(jax.nn.relu(bn(conv(y1, params["w2"], pad), params["bn2"])))
    out = jax.nn.relu(bn(conv(y2, params["w3"], 0), params["bn3"]) + x)
    return jnp.transpose(out, (0, 3, 1, 2))


# --------------------------------- main ---------------------------------------

if __name__ == "__main__":
    # Small but lane-friendly shapes (review: keep channel dims near 64/128 so
    # the output stores are lane-dense and the MXU is not mostly idle).
    N, H, W = 2, 16, 16
    inplanes = 128
    planes = (64, 64, 128)       # inplanes must equal planes[2] for the residual
    kernel_size = 3
    p1, p2, p3 = planes

    key = jax.random.PRNGKey(0)
    keys = jax.random.split(key, 8)

    def bn_params(k, c):
        ka, kb, kc, kd = jax.random.split(k, 4)
        weight = 1.0 + 0.1 * jax.random.normal(ka, (c,), jnp.float32)
        bias = 0.1 * jax.random.normal(kb, (c,), jnp.float32)
        mean = 0.1 * jax.random.normal(kc, (c,), jnp.float32)
        var = jnp.abs(jax.random.normal(kd, (c,), jnp.float32)) + 0.5
        return (weight, bias, mean, var)

    params = {
        "w1": 0.1 * jax.random.normal(keys[0], (p1, inplanes, 1, 1), jnp.float32),
        "bn1": bn_params(keys[1], p1),
        "w2": 0.1 * jax.random.normal(keys[2], (p2, p1, kernel_size, kernel_size),
                                      jnp.float32),
        "bn2": bn_params(keys[3], p2),
        "w3": 0.1 * jax.random.normal(keys[4], (p3, p2, 1, 1), jnp.float32),
        "bn3": bn_params(keys[5], p3),
    }

    x = jax.random.normal(keys[6], (N, inplanes, H, W), jnp.float32)   # NCHW

    ref = jax.block_until_ready(_reference_forward(x, params, kernel_size))

    # Exercise interior / first / last row tiles as well as the single-tile path.
    for rt in (4, 8, 16):
        out = jax.block_until_ready(
            identity_block3_forward(x, params, kernel_size, row_tile=rt))
        assert out.shape == (N, p3, H, W)
        err = float(jnp.max(jnp.abs(out - ref)))
        assert jnp.allclose(out, ref, atol=1e-2, rtol=1e-2), \
            f"row_tile={rt}: max abs err = {err}"

    print("KERNEL_OK")
</pallas_src>

<mosaic_0001>
module attributes {stable_mosaic.version = 11 : i64} {
  func.func @_identity_block3_kernel(%arg0: i32, %arg1: i32, %arg2: memref<288x128xbf16, #tpu.memory_space<vmem>>, %arg3: memref<128x64xbf16, #tpu.memory_space<vmem>>, %arg4: memref<1x64xf32, #tpu.memory_space<vmem>>, %arg5: memref<1x64xf32, #tpu.memory_space<vmem>>, %arg6: memref<9x64x64xbf16, #tpu.memory_space<vmem>>, %arg7: memref<1x64xf32, #tpu.memory_space<vmem>>, %arg8: memref<1x64xf32, #tpu.memory_space<vmem>>, %arg9: memref<64x128xbf16, #tpu.memory_space<vmem>>, %arg10: memref<1x128xf32, #tpu.memory_space<vmem>>, %arg11: memref<1x128xf32, #tpu.memory_space<vmem>>, %arg12: memref<64x128xf32, #tpu.memory_space<vmem>>, %arg13: memref<6x24x64xbf16, #tpu.memory_space<vmem>>) attributes {dimension_semantics = [#tpu.dimension_semantics<parallel>, #tpu.dimension_semantics<parallel>], iteration_bounds = array<i64: 2, 4>, scalar_prefetch = 0 : i64, scratch_operands = 1 : i64, tpu.core_type = #tpu.core_type<tc>, window_params = [{transform_indices = @transform_0, window_bounds = array<i64: 288, 128>}, {pipeline_mode = #tpu.pipeline_mode<synchronous>, transform_indices = @transform_1, window_bounds = array<i64: 128, 64>}, {pipeline_mode = #tpu.pipeline_mode<synchronous>, transform_indices = @transform_2, window_bounds = array<i64: 1, 64>}, {pipeline_mode = #tpu.pipeline_mode<synchronous>, transform_indices = @transform_3, window_bounds = array<i64: 1, 64>}, {pipeline_mode = #tpu.pipeline_mode<synchronous>, transform_indices = @transform_4, window_bounds = array<i64: 9, 64, 64>}, {pipeline_mode = #tpu.pipeline_mode<synchronous>, transform_indices = @transform_5, window_bounds = array<i64: 1, 64>}, {pipeline_mode = #tpu.pipeline_mode<synchronous>, transform_indices = @transform_6, window_bounds = array<i64: 1, 64>}, {pipeline_mode = #tpu.pipeline_mode<synchronous>, transform_indices = @transform_7, window_bounds = array<i64: 64, 128>}, {pipeline_mode = #tpu.pipeline_mode<synchronous>, transform_indices = @transform_8, window_bounds = array<i64: 1, 128>}, {pipeline_mode = #tpu.pipeline_mode<synchronous>, transform_indices = @transform_9, window_bounds = array<i64: 1, 128>}, {transform_indices = @transform_10, window_bounds = array<i64: 64, 128>}]} {
    %c64_i32 = arith.constant 64 : i32
    %0 = arith.muli %arg1, %c64_i32 : i32
    %1 = tpu.assume_multiple %0, 8 : i32
    %2 = arith.index_cast %1 : i32 to index
    %c0 = arith.constant 0 : index
    %3 = vector.load %arg2[%2, %c0] : memref<288x128xbf16, #tpu.memory_space<vmem>>, vector<96x128xbf16>
    %c0_0 = arith.constant 0 : index
    %c0_1 = arith.constant 0 : index
    %4 = vector.load %arg3[%c0_0, %c0_1] : memref<128x64xbf16, #tpu.memory_space<vmem>>, vector<128x64xbf16>
    %cst = arith.constant dense<0.000000e+00> : vector<96x64xf32>
    %5 = tpu.matmul %3, %4, %cst {dimension_numbers = #tpu.dot_dimension_numbers<[1], [0], [0], [1], [0, 0, 1, 1], [], []>} : vector<96x128xbf16>, vector<128x64xbf16>, vector<96x64xf32> -> vector<96x64xf32>
    %c0_2 = arith.constant 0 : index
    %c0_3 = arith.constant 0 : index
    %6 = vector.load %arg4[%c0_2, %c0_3] : memref<1x64xf32, #tpu.memory_space<vmem>>, vector<1x64xf32>
    %7 = vector.broadcast %6 : vector<1x64xf32> to vector<96x64xf32>
    %8 = arith.mulf %5, %7 : vector<96x64xf32>
    %c0_4 = arith.constant 0 : index
    %c0_5 = arith.constant 0 : index
    %9 = vector.load %arg5[%c0_4, %c0_5] : memref<1x64xf32, #tpu.memory_space<vmem>>, vector<1x64xf32>
    %10 = vector.broadcast %9 : vector<1x64xf32> to vector<96x64xf32>
    %11 = arith.addf %8, %10 : vector<96x64xf32>
    %cst_6 = arith.constant 0.000000e+00 : f32
    %12 = vector.broadcast %cst_6 : f32 to vector<96x64xf32>
    %13 = arith.maximumf %11, %12 : vector<96x64xf32>
    %14 = arith.truncf %13 : vector<96x64xf32> to vector<96x64xbf16>
    %15 = vector.shape_cast %14 : vector<96x64xbf16> to vector<6x16x64xbf16>
    %c0_7 = arith.constant 0 : index
    %c1 = arith.constant 1 : index
    %c0_8 = arith.constant 0 : index
    %16 = vector.load %arg13[%c0_7, %c1, %c0_8] : memref<6x24x64xbf16, #tpu.memory_space<vmem>>, vector<6x16x64xbf16>
    tpu.vector_store %arg13[%c0_7, %c1, %c0_8], %15 {strides = array<i32>} : memref<6x24x64xbf16, #tpu.memory_space<vmem>>, vector<6x16x64xbf16>,
    %cst_9 = arith.constant 0.000000e+00 : bf16
    %17 = vector.broadcast %cst_9 : bf16 to vector<6x1x64xbf16>
    %c0_10 = arith.constant 0 : index
    %c0_11 = arith.constant 0 : index
    %c0_12 = arith.constant 0 : index
    %18 = vector.load %arg13[%c0_10, %c0_11, %c0_12] : memref<6x24x64xbf16, #tpu.memory_space<vmem>>, vector<6x1x64xbf16>
    tpu.vector_store %arg13[%c0_10, %c0_11, %c0_12], %17 {strides = array<i32>} : memref<6x24x64xbf16, #tpu.memory_space<vmem>>, vector<6x1x64xbf16>,
    %c0_13 = arith.constant 0 : index
    %c17 = arith.constant 17 : index
    %c0_14 = arith.constant 0 : index
    %19 = vector.load %arg13[%c0_13, %c17, %c0_14] : memref<6x24x64xbf16, #tpu.memory_space<vmem>>, vector<6x1x64xbf16>
    tpu.vector_store %arg13[%c0_13, %c17, %c0_14], %17 {strides = array<i32>} : memref<6x24x64xbf16, #tpu.memory_space<vmem>>, vector<6x1x64xbf16>,
    %cst_15 = arith.constant 0.000000e+00 : bf16
    %20 = vector.broadcast %cst_15 : bf16 to vector<1x24x64xbf16>
    %c0_i32 = arith.constant 0 : i32
    %21 = arith.cmpi eq, %arg1, %c0_i32 : i32
    %22 = arith.extui %21 : i1 to i32
    %c0_i32_16 = arith.constant 0 : i32
    %23 = arith.cmpi ne, %22, %c0_i32_16 : i32
    scf.if %23 {
      %c0_91 = arith.constant 0 : index
      %c0_92 = arith.constant 0 : index
      %c0_93 = arith.constant 0 : index
      %107 = vector.load %arg13[%c0_91, %c0_92, %c0_93] : memref<6x24x64xbf16, #tpu.memory_space<vmem>>, vector<1x24x64xbf16>
      tpu.vector_store %arg13[%c0_91, %c0_92, %c0_93], %20 {strides = array<i32>} : memref<6x24x64xbf16, #tpu.memory_space<vmem>>, vector<1x24x64xbf16>,
    } else {
    }
    %c3_i32 = arith.constant 3 : i32
    %24 = arith.cmpi eq, %arg1, %c3_i32 : i32
    %25 = arith.extui %24 : i1 to i32
    %c0_i32_17 = arith.constant 0 : i32
    %26 = arith.cmpi ne, %25, %c0_i32_17 : i32
    scf.if %26 {
      %c5_91 = arith.constant 5 : index
      %c0_92 = arith.constant 0 : index
      %c0_93 = arith.constant 0 : index
      %107 = vector.load %arg13[%c5_91, %c0_92, %c0_93] : memref<6x24x64xbf16, #tpu.memory_space<vmem>>, vector<1x24x64xbf16>
      tpu.vector_store %arg13[%c5_91, %c0_92, %c0_93], %20 {strides = array<i32>} : memref<6x24x64xbf16, #tpu.memory_space<vmem>>, vector<1x24x64xbf16>,
    } else {
    }
    %cst_18 = arith.constant 0.000000e+00 : f32
    %27 = vector.broadcast %cst_18 : f32 to vector<64x64xf32>
    %c0_19 = arith.constant 0 : index
    %c0_20 = arith.constant 0 : index
    %c0_21 = arith.constant 0 : index
    %28 = vector.load %arg13[%c0_19, %c0_20, %c0_21] : memref<6x24x64xbf16, #tpu.memory_space<vmem>>, vector<4x16x64xbf16>
    %29 = vector.shape_cast %28 : vector<4x16x64xbf16> to vector<64x64xbf16>
    %c0_22 = arith.constant 0 : index
    %c0_23 = arith.constant 0 : index
    %c0_24 = arith.constant 0 : index
    %30 = vector.load %arg6[%c0_22, %c0_23, %c0_24] : memref<9x64x64xbf16, #tpu.memory_space<vmem>>, vector<1x64x64xbf16>
    %31 = vector.shape_cast %30 : vector<1x64x64xbf16> to vector<64x64xbf16>
    %cst_25 = arith.constant dense<0.000000e+00> : vector<64x64xf32>
    %32 = tpu.matmul %29, %31, %cst_25 {dimension_numbers = #tpu.dot_dimension_numbers<[1], [0], [0], [1], [0, 0, 1, 1], [], []>} : vector<64x64xbf16>, vector<64x64xbf16>, vector<64x64xf32> -> vector<64x64xf32>
    %33 = arith.addf %27, %32 : vector<64x64xf32>
    %c0_26 = arith.constant 0 : index
    %c1_27 = arith.constant 1 : index
    %c0_28 = arith.constant 0 : index
    %34 = vector.load %arg13[%c0_26, %c1_27, %c0_28] : memref<6x24x64xbf16, #tpu.memory_space<vmem>>, vector<4x16x64xbf16>
    %35 = vector.shape_cast %34 : vector<4x16x64xbf16> to vector<64x64xbf16>
    %c1_29 = arith.constant 1 : index
    %c0_30 = arith.constant 0 : index
    %c0_31 = arith.constant 0 : index
    %36 = vector.load %arg6[%c1_29, %c0_30, %c0_31] : memref<9x64x64xbf16, #tpu.memory_space<vmem>>, vector<1x64x64xbf16>
    %37 = vector.shape_cast %36 : vector<1x64x64xbf16> to vector<64x64xbf16>
    %cst_32 = arith.constant dense<0.000000e+00> : vector<64x64xf32>
    %38 = tpu.matmul %35, %37, %cst_32 {dimension_numbers = #tpu.dot_dimension_numbers<[1], [0], [0], [1], [0, 0, 1, 1], [], []>} : vector<64x64xbf16>, vector<64x64xbf16>, vector<64x64xf32> -> vector<64x64xf32>
    %39 = arith.addf %33, %38 : vector<64x64xf32>
    %c0_33 = arith.constant 0 : index
    %c2 = arith.constant 2 : index
    %c0_34 = arith.constant 0 : index
    %40 = vector.load %arg13[%c0_33, %c2, %c0_34] : memref<6x24x64xbf16, #tpu.memory_space<vmem>>, vector<4x16x64xbf16>
    %41 = vector.shape_cast %40 : vector<4x16x64xbf16> to vector<64x64xbf16>
    %c2_35 = arith.constant 2 : index
    %c0_36 = arith.constant 0 : index
    %c0_37 = arith.constant 0 : index
    %42 = vector.load %arg6[%c2_35, %c0_36, %c0_37] : memref<9x64x64xbf16, #tpu.memory_space<vmem>>, vector<1x64x64xbf16>
    %43 = vector.shape_cast %42 : vector<1x64x64xbf16> to vector<64x64xbf16>
    %cst_38 = arith.constant dense<0.000000e+00> : vector<64x64xf32>
    %44 = tpu.matmul %41, %43, %cst_38 {dimension_numbers = #tpu.dot_dimension_numbers<[1], [0], [0], [1], [0, 0, 1, 1], [], []>} : vector<64x64xbf16>, vector<64x64xbf16>, vector<64x64xf32> -> vector<64x64xf32>
    %45 = arith.addf %39, %44 : vector<64x64xf32>
    %c1_39 = arith.constant 1 : index
    %c0_40 = arith.constant 0 : index
    %c0_41 = arith.constant 0 : index
    %46 = vector.load %arg13[%c1_39, %c0_40, %c0_41] : memref<6x24x64xbf16, #tpu.memory_space<vmem>>, vector<4x16x64xbf16>
    %47 = vector.shape_cast %46 : vector<4x16x64xbf16> to vector<64x64xbf16>
    %c3 = arith.constant 3 : index
    %c0_42 = arith.constant 0 : index
    %c0_43 = arith.constant 0 : index
    %48 = vector.load %arg6[%c3, %c0_42, %c0_43] : memref<9x64x64xbf16, #tpu.memory_space<vmem>>, vector<1x64x64xbf16>
    %49 = vector.shape_cast %48 : vector<1x64x64xbf16> to vector<64x64xbf16>
    %cst_44 = arith.constant dense<0.000000e+00> : vector<64x64xf32>
    %50 = tpu.matmul %47, %49, %cst_44 {dimension_numbers = #tpu.dot_dimension_numbers<[1], [0], [0], [1], [0, 0, 1, 1], [], []>} : vector<64x64xbf16>, vector<64x64xbf16>, vector<64x64xf32> -> vector<64x64xf32>
    %51 = arith.addf %45, %50 : vector<64x64xf32>
    %c1_45 = arith.constant 1 : index
    %c1_46 = arith.constant 1 : index
    %c0_47 = arith.constant 0 : index
    %52 = vector.load %arg13[%c1_45, %c1_46, %c0_47] : memref<6x24x64xbf16, #tpu.memory_space<vmem>>, vector<4x16x64xbf16>
    %53 = vector.shape_cast %52 : vector<4x16x64xbf16> to vector<64x64xbf16>
    %c4 = arith.constant 4 : index
    %c0_48 = arith.constant 0 : index
    %c0_49 = arith.constant 0 : index
    %54 = vector.load %arg6[%c4, %c0_48, %c0_49] : memref<9x64x64xbf16, #tpu.memory_space<vmem>>, vector<1x64x64xbf16>
    %55 = vector.shape_cast %54 : vector<1x64x64xbf16> to vector<64x64xbf16>
    %cst_50 = arith.constant dense<0.000000e+00> : vector<64x64xf32>
    %56 = tpu.matmul %53, %55, %cst_50 {dimension_numbers = #tpu.dot_dimension_numbers<[1], [0], [0], [1], [0, 0, 1, 1], [], []>} : vector<64x64xbf16>, vector<64x64xbf16>, vector<64x64xf32> -> vector<64x64xf32>
    %57 = arith.addf %51, %56 : vector<64x64xf32>
    %c1_51 = arith.constant 1 : index
    %c2_52 = arith.constant 2 : index
    %c0_53 = arith.constant 0 : index
    %58 = vector.load %arg13[%c1_51, %c2_52, %c0_53] : memref<6x24x64xbf16, #tpu.memory_space<vmem>>, vector<4x16x64xbf16>
    %59 = vector.shape_cast %58 : vector<4x16x64xbf16> to vector<64x64xbf16>
    %c5 = arith.constant 5 : index
    %c0_54 = arith.constant 0 : index
    %c0_55 = arith.constant 0 : index
    %60 = vector.load %arg6[%c5, %c0_54, %c0_55] : memref<9x64x64xbf16, #tpu.memory_space<vmem>>, vector<1x64x64xbf16>
    %61 = vector.shape_cast %60 : vector<1x64x64xbf16> to vector<64x64xbf16>
    %cst_56 = arith.constant dense<0.000000e+00> : vector<64x64xf32>
    %62 = tpu.matmul %59, %61, %cst_56 {dimension_numbers = #tpu.dot_dimension_numbers<[1], [0], [0], [1], [0, 0, 1, 1], [], []>} : vector<64x64xbf16>, vector<64x64xbf16>, vector<64x64xf32> -> vector<64x64xf32>
    %63 = arith.addf %57, %62 : vector<64x64xf32>
    %c2_57 = arith.constant 2 : index
    %c0_58 = arith.constant 0 : index
    %c0_59 = arith.constant 0 : index
    %64 = vector.load %arg13[%c2_57, %c0_58, %c0_59] : memref<6x24x64xbf16, #tpu.memory_space<vmem>>, vector<4x16x64xbf16>
    %65 = vector.shape_cast %64 : vector<4x16x64xbf16> to vector<64x64xbf16>
    %c6 = arith.constant 6 : index
    %c0_60 = arith.constant 0 : index
    %c0_61 = arith.constant 0 : index
    %66 = vector.load %arg6[%c6, %c0_60, %c0_61] : memref<9x64x64xbf16, #tpu.memory_space<vmem>>, vector<1x64x64xbf16>
    %67 = vector.shape_cast %66 : vector<1x64x64xbf16> to vector<64x64xbf16>
    %cst_62 = arith.constant dense<0.000000e+00> : vector<64x64xf32>
    %68 = tpu.matmul %65, %67, %cst_62 {dimension_numbers = #tpu.dot_dimension_numbers<[1], [0], [0], [1], [0, 0, 1, 1], [], []>} : vector<64x64xbf16>, vector<64x64xbf16>, vector<64x64xf32> -> vector<64x64xf32>
    %69 = arith.addf %63, %68 : vector<64x64xf32>
    %c2_63 = arith.constant 2 : index
    %c1_64 = arith.constant 1 : index
    %c0_65 = arith.constant 0 : index
    %70 = vector.load %arg13[%c2_63, %c1_64, %c0_65] : memref<6x24x64xbf16, #tpu.memory_space<vmem>>, vector<4x16x64xbf16>
    %71 = vector.shape_cast %70 : vector<4x16x64xbf16> to vector<64x64xbf16>
    %c7 = arith.constant 7 : index
    %c0_66 = arith.constant 0 : index
    %c0_67 = arith.constant 0 : index
    %72 = vector.load %arg6[%c7, %c0_66, %c0_67] : memref<9x64x64xbf16, #tpu.memory_space<vmem>>, vector<1x64x64xbf16>
    %73 = vector.shape_cast %72 : vector<1x64x64xbf16> to vector<64x64xbf16>
    %cst_68 = arith.constant dense<0.000000e+00> : vector<64x64xf32>
    %74 = tpu.matmul %71, %73, %cst_68 {dimension_numbers = #tpu.dot_dimension_numbers<[1], [0], [0], [1], [0, 0, 1, 1], [], []>} : vector<64x64xbf16>, vector<64x64xbf16>, vector<64x64xf32> -> vector<64x64xf32>
    %75 = arith.addf %69, %74 : vector<64x64xf32>
    %c2_69 = arith.constant 2 : index
    %c2_70 = arith.constant 2 : index
    %c0_71 = arith.constant 0 : index
    %76 = vector.load %arg13[%c2_69, %c2_70, %c0_71] : memref<6x24x64xbf16, #tpu.memory_space<vmem>>, vector<4x16x64xbf16>
    %77 = vector.shape_cast %76 : vector<4x16x64xbf16> to vector<64x64xbf16>
    %c8 = arith.constant 8 : index
    %c0_72 = arith.constant 0 : index
    %c0_73 = arith.constant 0 : index
    %78 = vector.load %arg6[%c8, %c0_72, %c0_73] : memref<9x64x64xbf16, #tpu.memory_space<vmem>>, vector<1x64x64xbf16>
    %79 = vector.shape_cast %78 : vector<1x64x64xbf16> to vector<64x64xbf16>
    %cst_74 = arith.constant dense<0.000000e+00> : vector<64x64xf32>
    %80 = tpu.matmul %77, %79, %cst_74 {dimension_numbers = #tpu.dot_dimension_numbers<[1], [0], [0], [1], [0, 0, 1, 1], [], []>} : vector<64x64xbf16>, vector<64x64xbf16>, vector<64x64xf32> -> vector<64x64xf32>
    %81 = arith.addf %75, %80 : vector<64x64xf32>
    %c0_75 = arith.constant 0 : index
    %c0_76 = arith.constant 0 : index
    %82 = vector.load %arg7[%c0_75, %c0_76] : memref<1x64xf32, #tpu.memory_space<vmem>>, vector<1x64xf32>
    %83 = vector.broadcast %82 : vector<1x64xf32> to vector<64x64xf32>
    %84 = arith.mulf %81, %83 : vector<64x64xf32>
    %c0_77 = arith.constant 0 : index
    %c0_78 = arith.constant 0 : index
    %85 = vector.load %arg8[%c0_77, %c0_78] : memref<1x64xf32, #tpu.memory_space<vmem>>, vector<1x64xf32>
    %86 = vector.broadcast %85 : vector<1x64xf32> to vector<64x64xf32>
    %87 = arith.addf %84, %86 : vector<64x64xf32>
    %cst_79 = arith.constant 0.000000e+00 : f32
    %88 = vector.broadcast %cst_79 : f32 to vector<64x64xf32>
    %89 = arith.maximumf %87, %88 : vector<64x64xf32>
    %90 = arith.truncf %89 : vector<64x64xf32> to vector<64x64xbf16>
    %c0_80 = arith.constant 0 : index
    %c0_81 = arith.constant 0 : index
    %91 = vector.load %arg9[%c0_80, %c0_81] : memref<64x128xbf16, #tpu.memory_space<vmem>>, vector<64x128xbf16>
    %cst_82 = arith.constant dense<0.000000e+00> : vector<64x128xf32>
    %92 = tpu.matmul %90, %91, %cst_82 {dimension_numbers = #tpu.dot_dimension_numbers<[1], [0], [0], [1], [0, 0, 1, 1], [], []>} : vector<64x64xbf16>, vector<64x128xbf16>, vector<64x128xf32> -> vector<64x128xf32>
    %c16_i32 = arith.constant 16 : i32
    %93 = arith.addi %1, %c16_i32 : i32
    %94 = arith.index_cast %93 : i32 to index
    %c0_83 = arith.constant 0 : index
    %95 = vector.load %arg2[%94, %c0_83] : memref<288x128xbf16, #tpu.memory_space<vmem>>, vector<64x128xbf16>
    %c0_84 = arith.constant 0 : index
    %c0_85 = arith.constant 0 : index
    %96 = vector.load %arg10[%c0_84, %c0_85] : memref<1x128xf32, #tpu.memory_space<vmem>>, vector<1x128xf32>
    %97 = vector.broadcast %96 : vector<1x128xf32> to vector<64x128xf32>
    %98 = arith.mulf %92, %97 : vector<64x128xf32>
    %c0_86 = arith.constant 0 : index
    %c0_87 = arith.constant 0 : index
    %99 = vector.load %arg11[%c0_86, %c0_87] : memref<1x128xf32, #tpu.memory_space<vmem>>, vector<1x128xf32>
    %100 = vector.broadcast %99 : vector<1x128xf32> to vector<64x128xf32>
    %101 = arith.addf %98, %100 : vector<64x128xf32>
    %102 = arith.extf %95 : vector<64x128xbf16> to vector<64x128xf32>
    %103 = arith.addf %101, %102 : vector<64x128xf32>
    %cst_88 = arith.constant 0.000000e+00 : f32
    %104 = vector.broadcast %cst_88 : f32 to vector<64x128xf32>
    %105 = arith.maximumf %103, %104 : vector<64x128xf32>
    %c0_89 = arith.constant 0 : index
    %c0_90 = arith.constant 0 : index
    %106 = vector.load %arg12[%c0_89, %c0_90] : memref<64x128xf32, #tpu.memory_space<vmem>>, vector<64x128xf32>
    tpu.vector_store %arg12[%c0_89, %c0_90], %105 {strides = array<i32>} : memref<64x128xf32, #tpu.memory_space<vmem>>, vector<64x128xf32>,
    return
  }
  func.func @transform_0(%arg0: i32, %arg1: i32) -> (i32, i32) {
    %c0_i32 = arith.constant 0 : i32
    %c0_i32_0 = arith.constant 0 : i32
    return %arg0, %c0_i32 : i32, i32
  }
  func.func @transform_1(%arg0: i32, %arg1: i32) -> (i32, i32) {
    %c0_i32 = arith.constant 0 : i32
    %c0_i32_0 = arith.constant 0 : i32
    %c0_i32_1 = arith.constant 0 : i32
    return %c0_i32, %c0_i32_0 : i32, i32
  }
  func.func @transform_2(%arg0: i32, %arg1: i32) -> (i32, i32) {
    %c0_i32 = arith.constant 0 : i32
    %c0_i32_0 = arith.constant 0 : i32
    %c0_i32_1 = arith.constant 0 : i32
    return %c0_i32, %c0_i32_0 : i32, i32
  }
  func.func @transform_3(%arg0: i32, %arg1: i32) -> (i32, i32) {
    %c0_i32 = arith.constant 0 : i32
    %c0_i32_0 = arith.constant 0 : i32
    %c0_i32_1 = arith.constant 0 : i32
    return %c0_i32, %c0_i32_0 : i32, i32
  }
  func.func @transform_4(%arg0: i32, %arg1: i32) -> (i32, i32, i32) {
    %c0_i32 = arith.constant 0 : i32
    %c0_i32_0 = arith.constant 0 : i32
    %c0_i32_1 = arith.constant 0 : i32
    %c0_i32_2 = arith.constant 0 : i32
    return %c0_i32, %c0_i32_0, %c0_i32_1 : i32, i32, i32
  }
  func.func @transform_5(%arg0: i32, %arg1: i32) -> (i32, i32) {
    %c0_i32 = arith.constant 0 : i32
    %c0_i32_0 = arith.constant 0 : i32
    %c0_i32_1 = arith.constant 0 : i32
    return %c0_i32, %c0_i32_0 : i32, i32
  }
  func.func @transform_6(%arg0: i32, %arg1: i32) -> (i32, i32) {
    %c0_i32 = arith.constant 0 : i32
    %c0_i32_0 = arith.constant 0 : i32
    %c0_i32_1 = arith.constant 0 : i32
    return %c0_i32, %c0_i32_0 : i32, i32
  }
  func.func @transform_7(%arg0: i32, %arg1: i32) -> (i32, i32) {
    %c0_i32 = arith.constant 0 : i32
    %c0_i32_0 = arith.constant 0 : i32
    %c0_i32_1 = arith.constant 0 : i32
    return %c0_i32, %c0_i32_0 : i32, i32
  }
  func.func @transform_8(%arg0: i32, %arg1: i32) -> (i32, i32) {
    %c0_i32 = arith.constant 0 : i32
    %c0_i32_0 = arith.constant 0 : i32
    %c0_i32_1 = arith.constant 0 : i32
    return %c0_i32, %c0_i32_0 : i32, i32
  }
  func.func @transform_9(%arg0: i32, %arg1: i32) -> (i32, i32) {
    %c0_i32 = arith.constant 0 : i32
    %c0_i32_0 = arith.constant 0 : i32
    %c0_i32_1 = arith.constant 0 : i32
    return %c0_i32, %c0_i32_0 : i32, i32
  }
  func.func @transform_10(%arg0: i32, %arg1: i32) -> (i32, i32) {
    %c4_i32 = arith.constant 4 : i32
    %0 = arith.muli %arg0, %c4_i32 : i32
    %1 = arith.addi %0, %arg1 : i32
    %c0_i32 = arith.constant 0 : i32
    %c0_i32_0 = arith.constant 0 : i32
    return %1, %c0_i32 : i32, i32
  }
}

module attributes {stable_mosaic.version = 11 : i64} {
  func.func @_identity_block3_kernel(%arg0: i32, %arg1: i32, %arg2: memref<288x128xbf16, #tpu.memory_space<vmem>>, %arg3: memref<128x64xbf16, #tpu.memory_space<vmem>>, %arg4: memref<1x64xf32, #tpu.memory_space<vmem>>, %arg5: memref<1x64xf32, #tpu.memory_space<vmem>>, %arg6: memref<9x64x64xbf16, #tpu.memory_space<vmem>>, %arg7: memref<1x64xf32, #tpu.memory_space<vmem>>, %arg8: memref<1x64xf32, #tpu.memory_space<vmem>>, %arg9: memref<64x128xbf16, #tpu.memory_space<vmem>>, %arg10: memref<1x128xf32, #tpu.memory_space<vmem>>, %arg11: memref<1x128xf32, #tpu.memory_space<vmem>>, %arg12: memref<64x128xf32, #tpu.memory_space<vmem>>, %arg13: memref<6x24x64xbf16, #tpu.memory_space<vmem>>) attributes {dimension_semantics = [#tpu.dimension_semantics<parallel>, #tpu.dimension_semantics<parallel>], iteration_bounds = array<i64: 2, 4>, scalar_prefetch = 0 : i64, scratch_operands = 1 : i64, tpu.core_type = #tpu.core_type<tc>, window_params = [{transform_indices = @transform_0, window_bounds = array<i64: 288, 128>}, {pipeline_mode = #tpu.pipeline_mode<synchronous>, transform_indices = @transform_1, window_bounds = array<i64: 128, 64>}, {pipeline_mode = #tpu.pipeline_mode<synchronous>, transform_indices = @transform_2, window_bounds = array<i64: 1, 64>}, {pipeline_mode = #tpu.pipeline_mode<synchronous>, transform_indices = @transform_3, window_bounds = array<i64: 1, 64>}, {pipeline_mode = #tpu.pipeline_mode<synchronous>, transform_indices = @transform_4, window_bounds = array<i64: 9, 64, 64>}, {pipeline_mode = #tpu.pipeline_mode<synchronous>, transform_indices = @transform_5, window_bounds = array<i64: 1, 64>}, {pipeline_mode = #tpu.pipeline_mode<synchronous>, transform_indices = @transform_6, window_bounds = array<i64: 1, 64>}, {pipeline_mode = #tpu.pipeline_mode<synchronous>, transform_indices = @transform_7, window_bounds = array<i64: 64, 128>}, {pipeline_mode = #tpu.pipeline_mode<synchronous>, transform_indices = @transform_8, window_bounds = array<i64: 1, 128>}, {pipeline_mode = #tpu.pipeline_mode<synchronous>, transform_indices = @transform_9, window_bounds = array<i64: 1, 128>}, {transform_indices = @transform_10, window_bounds = array<i64: 64, 128>}]} {
    %c64_i32 = arith.constant 64 : i32
    %0 = arith.muli %arg1, %c64_i32 : i32
    %1 = tpu.assume_multiple %0, 8 : i32
    %2 = arith.index_cast %1 : i32 to index
    %c0 = arith.constant 0 : index
    %3 = vector.load %arg2[%2, %c0] : memref<288x128xbf16, #tpu.memory_space<vmem>>, vector<96x128xbf16>
    %c0_0 = arith.constant 0 : index
    %c0_1 = arith.constant 0 : index
    %4 = vector.load %arg3[%c0_0, %c0_1] : memref<128x64xbf16, #tpu.memory_space<vmem>>, vector<128x64xbf16>
    %cst = arith.constant dense<0.000000e+00> : vector<96x64xf32>
    %5 = tpu.matmul %3, %4, %cst {dimension_numbers = #tpu.dot_dimension_numbers<[1], [0], [0], [1], [0, 0, 1, 1], [], []>} : vector<96x128xbf16>, vector<128x64xbf16>, vector<96x64xf32> -> vector<96x64xf32>
    %c0_2 = arith.constant 0 : index
    %c0_3 = arith.constant 0 : index
    %6 = vector.load %arg4[%c0_2, %c0_3] : memref<1x64xf32, #tpu.memory_space<vmem>>, vector<1x64xf32>
    %7 = vector.broadcast %6 : vector<1x64xf32> to vector<96x64xf32>
    %8 = arith.mulf %5, %7 : vector<96x64xf32>
    %c0_4 = arith.constant 0 : index
    %c0_5 = arith.constant 0 : index
    %9 = vector.load %arg5[%c0_4, %c0_5] : memref<1x64xf32, #tpu.memory_space<vmem>>, vector<1x64xf32>
    %10 = vector.broadcast %9 : vector<1x64xf32> to vector<96x64xf32>
    %11 = arith.addf %8, %10 : vector<96x64xf32>
    %cst_6 = arith.constant 0.000000e+00 : f32
    %12 = vector.broadcast %cst_6 : f32 to vector<96x64xf32>
    %13 = arith.maximumf %11, %12 : vector<96x64xf32>
    %14 = arith.truncf %13 : vector<96x64xf32> to vector<96x64xbf16>
    %15 = vector.shape_cast %14 : vector<96x64xbf16> to vector<6x16x64xbf16>
    %c0_7 = arith.constant 0 : index
    %c1 = arith.constant 1 : index
    %c0_8 = arith.constant 0 : index
    %16 = vector.load %arg13[%c0_7, %c1, %c0_8] : memref<6x24x64xbf16, #tpu.memory_space<vmem>>, vector<6x16x64xbf16>
    tpu.vector_store %arg13[%c0_7, %c1, %c0_8], %15 {strides = array<i32>} : memref<6x24x64xbf16, #tpu.memory_space<vmem>>, vector<6x16x64xbf16>,
    %cst_9 = arith.constant 0.000000e+00 : bf16
    %17 = vector.broadcast %cst_9 : bf16 to vector<6x1x64xbf16>
    %c0_10 = arith.constant 0 : index
    %c0_11 = arith.constant 0 : index
    %c0_12 = arith.constant 0 : index
    %18 = vector.load %arg13[%c0_10, %c0_11, %c0_12] : memref<6x24x64xbf16, #tpu.memory_space<vmem>>, vector<6x1x64xbf16>
    tpu.vector_store %arg13[%c0_10, %c0_11, %c0_12], %17 {strides = array<i32>} : memref<6x24x64xbf16, #tpu.memory_space<vmem>>, vector<6x1x64xbf16>,
    %c0_13 = arith.constant 0 : index
    %c17 = arith.constant 17 : index
    %c0_14 = arith.constant 0 : index
    %19 = vector.load %arg13[%c0_13, %c17, %c0_14] : memref<6x24x64xbf16, #tpu.memory_space<vmem>>, vector<6x1x64xbf16>
    tpu.vector_store %arg13[%c0_13, %c17, %c0_14], %17 {strides = array<i32>} : memref<6x24x64xbf16, #tpu.memory_space<vmem>>, vector<6x1x64xbf16>,
    %cst_15 = arith.constant 0.000000e+00 : bf16
    %20 = vector.broadcast %cst_15 : bf16 to vector<1x24x64xbf16>
    %c0_i32 = arith.constant 0 : i32
    %21 = arith.cmpi eq, %arg1, %c0_i32 : i32
    %22 = arith.extui %21 : i1 to i32
    %c0_i32_16 = arith.constant 0 : i32
    %23 = arith.cmpi ne, %22, %c0_i32_16 : i32
    scf.if %23 {
      %c0_91 = arith.constant 0 : index
      %c0_92 = arith.constant 0 : index
      %c0_93 = arith.constant 0 : index
      %107 = vector.load %arg13[%c0_91, %c0_92, %c0_93] : memref<6x24x64xbf16, #tpu.memory_space<vmem>>, vector<1x24x64xbf16>
      tpu.vector_store %arg13[%c0_91, %c0_92, %c0_93], %20 {strides = array<i32>} : memref<6x24x64xbf16, #tpu.memory_space<vmem>>, vector<1x24x64xbf16>,
    } else {
    }
    %c3_i32 = arith.constant 3 : i32
    %24 = arith.cmpi eq, %arg1, %c3_i32 : i32
    %25 = arith.extui %24 : i1 to i32
    %c0_i32_17 = arith.constant 0 : i32
    %26 = arith.cmpi ne, %25, %c0_i32_17 : i32
    scf.if %26 {
      %c5_91 = arith.constant 5 : index
      %c0_92 = arith.constant 0 : index
      %c0_93 = arith.constant 0 : index
      %107 = vector.load %arg13[%c5_91, %c0_92, %c0_93] : memref<6x24x64xbf16, #tpu.memory_space<vmem>>, vector<1x24x64xbf16>
      tpu.vector_store %arg13[%c5_91, %c0_92, %c0_93], %20 {strides = array<i32>} : memref<6x24x64xbf16, #tpu.memory_space<vmem>>, vector<1x24x64xbf16>,
    } else {
    }
    %cst_18 = arith.constant 0.000000e+00 : f32
    %27 = vector.broadcast %cst_18 : f32 to vector<64x64xf32>
    %c0_19 = arith.constant 0 : index
    %c0_20 = arith.constant 0 : index
    %c0_21 = arith.constant 0 : index
    %28 = vector.load %arg13[%c0_19, %c0_20, %c0_21] : memref<6x24x64xbf16, #tpu.memory_space<vmem>>, vector<4x16x64xbf16>
    %29 = vector.shape_cast %28 : vector<4x16x64xbf16> to vector<64x64xbf16>
    %c0_22 = arith.constant 0 : index
    %c0_23 = arith.constant 0 : index
    %c0_24 = arith.constant 0 : index
    %30 = vector.load %arg6[%c0_22, %c0_23, %c0_24] : memref<9x64x64xbf16, #tpu.memory_space<vmem>>, vector<1x64x64xbf16>
    %31 = vector.shape_cast %30 : vector<1x64x64xbf16> to vector<64x64xbf16>
    %cst_25 = arith.constant dense<0.000000e+00> : vector<64x64xf32>
    %32 = tpu.matmul %29, %31, %cst_25 {dimension_numbers = #tpu.dot_dimension_numbers<[1], [0], [0], [1], [0, 0, 1, 1], [], []>} : vector<64x64xbf16>, vector<64x64xbf16>, vector<64x64xf32> -> vector<64x64xf32>
    %33 = arith.addf %27, %32 : vector<64x64xf32>
    %c0_26 = arith.constant 0 : index
    %c1_27 = arith.constant 1 : index
    %c0_28 = arith.constant 0 : index
    %34 = vector.load %arg13[%c0_26, %c1_27, %c0_28] : memref<6x24x64xbf16, #tpu.memory_space<vmem>>, vector<4x16x64xbf16>
    %35 = vector.shape_cast %34 : vector<4x16x64xbf16> to vector<64x64xbf16>
    %c1_29 = arith.constant 1 : index
    %c0_30 = arith.constant 0 : index
    %c0_31 = arith.constant 0 : index
    %36 = vector.load %arg6[%c1_29, %c0_30, %c0_31] : memref<9x64x64xbf16, #tpu.memory_space<vmem>>, vector<1x64x64xbf16>
    %37 = vector.shape_cast %36 : vector<1x64x64xbf16> to vector<64x64xbf16>
    %cst_32 = arith.constant dense<0.000000e+00> : vector<64x64xf32>
    %38 = tpu.matmul %35, %37, %cst_32 {dimension_numbers = #tpu.dot_dimension_numbers<[1], [0], [0], [1], [0, 0, 1, 1], [], []>} : vector<64x64xbf16>, vector<64x64xbf16>, vector<64x64xf32> -> vector<64x64xf32>
    %39 = arith.addf %33, %38 : vector<64x64xf32>
    %c0_33 = arith.constant 0 : index
    %c2 = arith.constant 2 : index
    %c0_34 = arith.constant 0 : index
    %40 = vector.load %arg13[%c0_33, %c2, %c0_34] : memref<6x24x64xbf16, #tpu.memory_space<vmem>>, vector<4x16x64xbf16>
    %41 = vector.shape_cast %40 : vector<4x16x64xbf16> to vector<64x64xbf16>
    %c2_35 = arith.constant 2 : index
    %c0_36 = arith.constant 0 : index
    %c0_37 = arith.constant 0 : index
    %42 = vector.load %arg6[%c2_35, %c0_36, %c0_37] : memref<9x64x64xbf16, #tpu.memory_space<vmem>>, vector<1x64x64xbf16>
    %43 = vector.shape_cast %42 : vector<1x64x64xbf16> to vector<64x64xbf16>
    %cst_38 = arith.constant dense<0.000000e+00> : vector<64x64xf32>
    %44 = tpu.matmul %41, %43, %cst_38 {dimension_numbers = #tpu.dot_dimension_numbers<[1], [0], [0], [1], [0, 0, 1, 1], [], []>} : vector<64x64xbf16>, vector<64x64xbf16>, vector<64x64xf32> -> vector<64x64xf32>
    %45 = arith.addf %39, %44 : vector<64x64xf32>
    %c1_39 = arith.constant 1 : index
    %c0_40 = arith.constant 0 : index
    %c0_41 = arith.constant 0 : index
    %46 = vector.load %arg13[%c1_39, %c0_40, %c0_41] : memref<6x24x64xbf16, #tpu.memory_space<vmem>>, vector<4x16x64xbf16>
    %47 = vector.shape_cast %46 : vector<4x16x64xbf16> to vector<64x64xbf16>
    %c3 = arith.constant 3 : index
    %c0_42 = arith.constant 0 : index
    %c0_43 = arith.constant 0 : index
    %48 = vector.load %arg6[%c3, %c0_42, %c0_43] : memref<9x64x64xbf16, #tpu.memory_space<vmem>>, vector<1x64x64xbf16>
    %49 = vector.shape_cast %48 : vector<1x64x64xbf16> to vector<64x64xbf16>
    %cst_44 = arith.constant dense<0.000000e+00> : vector<64x64xf32>
    %50 = tpu.matmul %47, %49, %cst_44 {dimension_numbers = #tpu.dot_dimension_numbers<[1], [0], [0], [1], [0, 0, 1, 1], [], []>} : vector<64x64xbf16>, vector<64x64xbf16>, vector<64x64xf32> -> vector<64x64xf32>
    %51 = arith.addf %45, %50 : vector<64x64xf32>
    %c1_45 = arith.constant 1 : index
    %c1_46 = arith.constant 1 : index
    %c0_47 = arith.constant 0 : index
    %52 = vector.load %arg13[%c1_45, %c1_46, %c0_47] : memref<6x24x64xbf16, #tpu.memory_space<vmem>>, vector<4x16x64xbf16>
    %53 = vector.shape_cast %52 : vector<4x16x64xbf16> to vector<64x64xbf16>
    %c4 = arith.constant 4 : index
    %c0_48 = arith.constant 0 : index
    %c0_49 = arith.constant 0 : index
    %54 = vector.load %arg6[%c4, %c0_48, %c0_49] : memref<9x64x64xbf16, #tpu.memory_space<vmem>>, vector<1x64x64xbf16>
    %55 = vector.shape_cast %54 : vector<1x64x64xbf16> to vector<64x64xbf16>
    %cst_50 = arith.constant dense<0.000000e+00> : vector<64x64xf32>
    %56 = tpu.matmul %53, %55, %cst_50 {dimension_numbers = #tpu.dot_dimension_numbers<[1], [0], [0], [1], [0, 0, 1, 1], [], []>} : vector<64x64xbf16>, vector<64x64xbf16>, vector<64x64xf32> -> vector<64x64xf32>
    %57 = arith.addf %51, %56 : vector<64x64xf32>
    %c1_51 = arith.constant 1 : index
    %c2_52 = arith.constant 2 : index
    %c0_53 = arith.constant 0 : index
    %58 = vector.load %arg13[%c1_51, %c2_52, %c0_53] : memref<6x24x64xbf16, #tpu.memory_space<vmem>>, vector<4x16x64xbf16>
    %59 = vector.shape_cast %58 : vector<4x16x64xbf16> to vector<64x64xbf16>
    %c5 = arith.constant 5 : index
    %c0_54 = arith.constant 0 : index
    %c0_55 = arith.constant 0 : index
    %60 = vector.load %arg6[%c5, %c0_54, %c0_55] : memref<9x64x64xbf16, #tpu.memory_space<vmem>>, vector<1x64x64xbf16>
    %61 = vector.shape_cast %60 : vector<1x64x64xbf16> to vector<64x64xbf16>
    %cst_56 = arith.constant dense<0.000000e+00> : vector<64x64xf32>
    %62 = tpu.matmul %59, %61, %cst_56 {dimension_numbers = #tpu.dot_dimension_numbers<[1], [0], [0], [1], [0, 0, 1, 1], [], []>} : vector<64x64xbf16>, vector<64x64xbf16>, vector<64x64xf32> -> vector<64x64xf32>
    %63 = arith.addf %57, %62 : vector<64x64xf32>
    %c2_57 = arith.constant 2 : index
    %c0_58 = arith.constant 0 : index
    %c0_59 = arith.constant 0 : index
    %64 = vector.load %arg13[%c2_57, %c0_58, %c0_59] : memref<6x24x64xbf16, #tpu.memory_space<vmem>>, vector<4x16x64xbf16>
    %65 = vector.shape_cast %64 : vector<4x16x64xbf16> to vector<64x64xbf16>
    %c6 = arith.constant 6 : index
    %c0_60 = arith.constant 0 : index
    %c0_61 = arith.constant 0 : index
    %66 = vector.load %arg6[%c6, %c0_60, %c0_61] : memref<9x64x64xbf16, #tpu.memory_space<vmem>>, vector<1x64x64xbf16>
    %67 = vector.shape_cast %66 : vector<1x64x64xbf16> to vector<64x64xbf16>
    %cst_62 = arith.constant dense<0.000000e+00> : vector<64x64xf32>
    %68 = tpu.matmul %65, %67, %cst_62 {dimension_numbers = #tpu.dot_dimension_numbers<[1], [0], [0], [1], [0, 0, 1, 1], [], []>} : vector<64x64xbf16>, vector<64x64xbf16>, vector<64x64xf32> -> vector<64x64xf32>
    %69 = arith.addf %63, %68 : vector<64x64xf32>
    %c2_63 = arith.constant 2 : index
    %c1_64 = arith.constant 1 : index
    %c0_65 = arith.constant 0 : index
    %70 = vector.load %arg13[%c2_63, %c1_64, %c0_65] : memref<6x24x64xbf16, #tpu.memory_space<vmem>>, vector<4x16x64xbf16>
    %71 = vector.shape_cast %70 : vector<4x16x64xbf16> to vector<64x64xbf16>
    %c7 = arith.constant 7 : index
    %c0_66 = arith.constant 0 : index
    %c0_67 = arith.constant 0 : index
    %72 = vector.load %arg6[%c7, %c0_66, %c0_67] : memref<9x64x64xbf16, #tpu.memory_space<vmem>>, vector<1x64x64xbf16>
    %73 = vector.shape_cast %72 : vector<1x64x64xbf16> to vector<64x64xbf16>
    %cst_68 = arith.constant dense<0.000000e+00> : vector<64x64xf32>
    %74 = tpu.matmul %71, %73, %cst_68 {dimension_numbers = #tpu.dot_dimension_numbers<[1], [0], [0], [1], [0, 0, 1, 1], [], []>} : vector<64x64xbf16>, vector<64x64xbf16>, vector<64x64xf32> -> vector<64x64xf32>
    %75 = arith.addf %69, %74 : vector<64x64xf32>
    %c2_69 = arith.constant 2 : index
    %c2_70 = arith.constant 2 : index
    %c0_71 = arith.constant 0 : index
    %76 = vector.load %arg13[%c2_69, %c2_70, %c0_71] : memref<6x24x64xbf16, #tpu.memory_space<vmem>>, vector<4x16x64xbf16>
    %77 = vector.shape_cast %76 : vector<4x16x64xbf16> to vector<64x64xbf16>
    %c8 = arith.constant 8 : index
    %c0_72 = arith.constant 0 : index
    %c0_73 = arith.constant 0 : index
    %78 = vector.load %arg6[%c8, %c0_72, %c0_73] : memref<9x64x64xbf16, #tpu.memory_space<vmem>>, vector<1x64x64xbf16>
    %79 = vector.shape_cast %78 : vector<1x64x64xbf16> to vector<64x64xbf16>
    %cst_74 = arith.constant dense<0.000000e+00> : vector<64x64xf32>
    %80 = tpu.matmul %77, %79, %cst_74 {dimension_numbers = #tpu.dot_dimension_numbers<[1], [0], [0], [1], [0, 0, 1, 1], [], []>} : vector<64x64xbf16>, vector<64x64xbf16>, vector<64x64xf32> -> vector<64x64xf32>
    %81 = arith.addf %75, %80 : vector<64x64xf32>
    %c0_75 = arith.constant 0 : index
    %c0_76 = arith.constant 0 : index
    %82 = vector.load %arg7[%c0_75, %c0_76] : memref<1x64xf32, #tpu.memory_space<vmem>>, vector<1x64xf32>
    %83 = vector.broadcast %82 : vector<1x64xf32> to vector<64x64xf32>
    %84 = arith.mulf %81, %83 : vector<64x64xf32>
    %c0_77 = arith.constant 0 : index
    %c0_78 = arith.constant 0 : index
    %85 = vector.load %arg8[%c0_77, %c0_78] : memref<1x64xf32, #tpu.memory_space<vmem>>, vector<1x64xf32>
    %86 = vector.broadcast %85 : vector<1x64xf32> to vector<64x64xf32>
    %87 = arith.addf %84, %86 : vector<64x64xf32>
    %cst_79 = arith.constant 0.000000e+00 : f32
    %88 = vector.broadcast %cst_79 : f32 to vector<64x64xf32>
    %89 = arith.maximumf %87, %88 : vector<64x64xf32>
    %90 = arith.truncf %89 : vector<64x64xf32> to vector<64x64xbf16>
    %c0_80 = arith.constant 0 : index
    %c0_81 = arith.constant 0 : index
    %91 = vector.load %arg9[%c0_80, %c0_81] : memref<64x128xbf16, #tpu.memory_space<vmem>>, vector<64x128xbf16>
    %cst_82 = arith.constant dense<0.000000e+00> : vector<64x128xf32>
    %92 = tpu.matmul %90, %91, %cst_82 {dimension_numbers = #tpu.dot_dimension_numbers<[1], [0], [0], [1], [0, 0, 1, 1], [], []>} : vector<64x64xbf16>, vector<64x128xbf16>, vector<64x128xf32> -> vector<64x128xf32>
    %c16_i32 = arith.constant 16 : i32
    %93 = arith.addi %1, %c16_i32 : i32
    %94 = arith.index_cast %93 : i32 to index
    %c0_83 = arith.constant 0 : index
    %95 = vector.load %arg2[%94, %c0_83] : memref<288x128xbf16, #tpu.memory_space<vmem>>, vector<64x128xbf16>
    %c0_84 = arith.constant 0 : index
    %c0_85 = arith.constant 0 : index
    %96 = vector.load %arg10[%c0_84, %c0_85] : memref<1x128xf32, #tpu.memory_space<vmem>>, vector<1x128xf32>
    %97 = vector.broadcast %96 : vector<1x128xf32> to vector<64x128xf32>
    %98 = arith.mulf %92, %97 : vector<64x128xf32>
    %c0_86 = arith.constant 0 : index
    %c0_87 = arith.constant 0 : index
    %99 = vector.load %arg11[%c0_86, %c0_87] : memref<1x128xf32, #tpu.memory_space<vmem>>, vector<1x128xf32>
    %100 = vector.broadcast %99 : vector<1x128xf32> to vector<64x128xf32>
    %101 = arith.addf %98, %100 : vector<64x128xf32>
    %102 = arith.extf %95 : vector<64x128xbf16> to vector<64x128xf32>
    %103 = arith.addf %101, %102 : vector<64x128xf32>
    %cst_88 = arith.constant 0.000000e+00 : f32
    %104 = vector.broadcast %cst_88 : f32 to vector<64x128xf32>
    %105 = arith.maximumf %103, %104 : vector<64x128xf32>
    %c0_89 = arith.constant 0 : index
    %c0_90 = arith.constant 0 : index
    %106 = vector.load %arg12[%c0_89, %c0_90] : memref<64x128xf32, #tpu.memory_space<vmem>>, vector<64x128xf32>
    tpu.vector_store %arg12[%c0_89, %c0_90], %105 {strides = array<i32>} : memref<64x128xf32, #tpu.memory_space<vmem>>, vector<64x128xf32>,
    return
  }
  func.func @transform_0(%arg0: i32, %arg1: i32) -> (i32, i32) {
    %c0_i32 = arith.constant 0 : i32
    %c0_i32_0 = arith.constant 0 : i32
    return %arg0, %c0_i32 : i32, i32
  }
  func.func @transform_1(%arg0: i32, %arg1: i32) -> (i32, i32) {
    %c0_i32 = arith.constant 0 : i32
    %c0_i32_0 = arith.constant 0 : i32
    %c0_i32_1 = arith.constant 0 : i32
    return %c0_i32, %c0_i32_0 : i32, i32
  }
  func.func @transform_2(%arg0: i32, %arg1: i32) -> (i32, i32) {
    %c0_i32 = arith.constant 0 : i32
    %c0_i32_0 = arith.constant 0 : i32
    %c0_i32_1 = arith.constant 0 : i32
    return %c0_i32, %c0_i32_0 : i32, i32
  }
  func.func @transform_3(%arg0: i32, %arg1: i32) -> (i32, i32) {
    %c0_i32 = arith.constant 0 : i32
    %c0_i32_0 = arith.constant 0 : i32
    %c0_i32_1 = arith.constant 0 : i32
    return %c0_i32, %c0_i32_0 : i32, i32
  }
  func.func @transform_4(%arg0: i32, %arg1: i32) -> (i32, i32, i32) {
    %c0_i32 = arith.constant 0 : i32
    %c0_i32_0 = arith.constant 0 : i32
    %c0_i32_1 = arith.constant 0 : i32
    %c0_i32_2 = arith.constant 0 : i32
    return %c0_i32, %c0_i32_0, %c0_i32_1 : i32, i32, i32
  }
  func.func @transform_5(%arg0: i32, %arg1: i32) -> (i32, i32) {
    %c0_i32 = arith.constant 0 : i32
    %c0_i32_0 = arith.constant 0 : i32
    %c0_i32_1 = arith.constant 0 : i32
    return %c0_i32, %c0_i32_0 : i32, i32
  }
  func.func @transform_6(%arg0: i32, %arg1: i32) -> (i32, i32) {
    %c0_i32 = arith.constant 0 : i32
    %c0_i32_0 = arith.constant 0 : i32
    %c0_i32_1 = arith.constant 0 : i32
    return %c0_i32, %c0_i32_0 : i32, i32
  }
  func.func @transform_7(%arg0: i32, %arg1: i32) -> (i32, i32) {
    %c0_i32 = arith.constant 0 : i32
    %c0_i32_0 = arith.constant 0 : i32
    %c0_i32_1 = arith.constant 0 : i32
    return %c0_i32, %c0_i32_0 : i32, i32
  }
  func.func @transform_8(%arg0: i32, %arg1: i32) -> (i32, i32) {
    %c0_i32 = arith.constant 0 : i32
    %c0_i32_0 = arith.constant 0 : i32
    %c0_i32_1 = arith.constant 0 : i32
    return %c0_i32, %c0_i32_0 : i32, i32
  }
  func.func @transform_9(%arg0: i32, %arg1: i32) -> (i32, i32) {
    %c0_i32 = arith.constant 0 : i32
    %c0_i32_0 = arith.constant 0 : i32
    %c0_i32_1 = arith.constant 0 : i32
    return %c0_i32, %c0_i32_0 : i32, i32
  }
  func.func @transform_10(%arg0: i32, %arg1: i32) -> (i32, i32) {
    %c4_i32 = arith.constant 4 : i32
    %0 = arith.muli %arg0, %c4_i32 : i32
    %1 = arith.addi %0, %arg1 : i32
    %c0_i32 = arith.constant 0 : i32
    %c0_i32_0 = arith.constant 0 : i32
    return %1, %c0_i32 : i32, i32
  }
}

</mosaic_0001>

<bundles_post_ra>
// kernel: tpu_custom_call.1
= control target key start
LH: loop header
LB: loop body
LE: loop exit
PB: predicated region body
PF: predicated region fallthrough
CT: control target
= control target key end

     0   :  { %s4618_s0 = inlined_call_operand.hbm [shape: bf16[576,128], index: 0, kind: input, shape index: {}]   ;;  %s4619_s1 = inlined_call_operand.vmem [shape: bf16[128,64], index: 1, kind: input, shape index: {}]   ;;  %s4620_s2 = inlined_call_operand.vmem [shape: f32[1,64], index: 2, kind: input, shape index: {}]   ;;  %s4621_s3 = inlined_call_operand.vmem [shape: f32[1,64], index: 3, kind: input, shape index: {}]   ;;  %s4622_s4 = inlined_call_operand.hbm [shape: bf16[9,64,64], index: 4, kind: input, shape index: {}]   ;;  %s4623_s5 = inlined_call_operand.vmem [shape: f32[1,64], index: 5, kind: input, shape index: {}]   ;;  %s4624_s6 = inlined_call_operand.vmem [shape: f32[1,64], index: 6, kind: input, shape index: {}]   ;;  %s4625_s7 = inlined_call_operand.vmem [shape: bf16[64,128], index: 7, kind: input, shape index: {}]   ;;  %s4626_s8 = inlined_call_operand.vmem [shape: f32[1,128], index: 8, kind: input, shape index: {}]   ;;  %s4627_s9 = inlined_call_operand.vmem [shape: f32[1,128], index: 9, kind: input, shape index: {}]   ;;  %s4628_s10 = inlined_call_operand.hbm [shape: f32[512,128], index: 10, kind: output, shape index: {}]  }
   0x1   :  { %4640 = sst [smem:[#allocation22_spill]] %s4621_s3 }
   0x2   :  { %4641 = sst [smem:[#allocation23_spill]] %s4622_s4 }
   0x3   :  { %4642 = sst [smem:[#allocation24_spill]] %s4623_s5 }
   0x4   :  { %4643 = sst [smem:[#allocation25_spill]] %s4624_s6 }
   0x5   :  { %4644 = sst [smem:[#allocation26_spill]] %s4625_s7 }
   0x6   :  { %4645 = sst [smem:[#allocation27_spill]] %s4626_s8 }
   0x7   :  { %4646 = sst [smem:[#allocation28_spill]] %s4627_s9 }
   0x8   :  { %4647 = sst [smem:[#allocation29_spill]] %s4628_s10 }
   0x9   :  { %15 = vsyncpa [#allocation4], 0 }
   0xa   :  { %17 = vsyncpa [#allocation4 + $0x1], 0 }
   0xb   :  { %18 = vsyncpa [#allocation7], 0 }
   0xc   :  { %19 = vsyncpa [#allocation5], 0 }
   0xd   :  { %21 = vsyncpa [#allocation5 + $0x1], 0  ;;  %s3845_s13 = smov 0   ;;  %s3847_s14 = smov 0  }
   0xe   :  { %s3849_s15 = smov 0   ;;  %s3851_s16 = smov 0  }
   0xf   :  { %s3853_s17 = smov 0   ;;  %s3855_s18 = smov 0  }
  0x10   :  { %s3857_s19 = smov 0   ;;  %s3859_s20 = smov 0  }
  0x11   :  { %s3861_s21 = smov 0   ;;  %s3863_s22 = smov 0  }
  0x12   :  { %s3865_s23 = smov 0  }
  0x13 LB: > { %4648 = sst [smem:[#allocation12_spill]] %s3739_s13  ;;  %s2917_s24 = sadd.s32 4294967295, %s3779_s23   ;;  %s3779_s23 = sphi %s3865_s23, %s27_s23   ;;  %s3775_s22 = sphi %s3863_s22, %s4709_s22   ;;  %s3771_s21 = sphi %s3861_s21, %s4708_s21   ;;  %s3767_s20 = sphi %s3859_s20, %s4707_s20   ;;  %s3763_s19 = sphi %s3857_s19, %s4699_s19   ;;  %s3759_s18 = sphi %s3855_s18, %s4706_s18   ;;  %s3755_s17 = sphi %s3853_s17, %s4705_s17   ;;  %s3751_s16 = sphi %s3851_s16, %s4704_s16   ;;  %s3747_s15 = sphi %s3849_s15, %s4703_s15   ;;  %s3743_s14 = sphi %s3847_s14, %s4702_s14   ;;  %s3739_s13 = sphi %s3845_s13, %s4701_s13  }
  0x14   : > { %4649 = sst [smem:[#allocation13_spill]] %s3767_s20  ;;  %s2918_s25 = sadd.s32 4294967294, %s3779_s23  }
  0x15   : > { %4650 = sst [smem:[#allocation14_spill]] %s3771_s21  ;;  %p59_p0 = scmp.ne.s32.totalorder %s3755_s17, %s3751_s16 }
  0x16   : > { %p3901_p1 = scmp.eq.s32.totalorder %s2917_s24, 0  ;;  %p275_p2 = scmp.ne.s32.totalorder %s3747_s15, %s3743_s14 }
  0x17   : > { %p276_p4 = scmp.eq.s32.totalorder %s2917_s24, 7  ;;  %p281_p5 = scmp.ne.s32.totalorder %s3743_s14, %s3739_s13 }
  0x18   : > { %p3910_p3 = por %p3901_p1, %p59_p0  ;;  %p282_p6 = scmp.eq.s32.totalorder %s2918_s25, 7 }
  0x19   : > { %p3916_p7 = por %p276_p4, %p275_p2  ;;  %p2921_p8 = scmp.ge.s32.totalorder %s3779_s23, 1 }
  0x1a   : > { %p3921_p9 = por %p282_p6, %p281_p5  ;;  %p289_p10 = scmp.lt.s32.totalorder %s3779_s23, 9 }
  0x1b   : > { %s4653_s29 = scalar_select %p3916_p7, 1, 0 }
  0x1c   : > { %s4655_s30 = scalar_select %p3921_p9, 1, 0 }
  0x1d   : > { %4654 = sst [smem:[#allocation15_spill]] %s4653_s29  ;;  %p3926_p11 = pnand %p2921_p8, %p289_p10 }
  0x1e   : > { %4656 = sst [smem:[#allocation16_spill]] %s4655_s30  ;;  %s3781_s12 = smov [#allocation6]  }
  0x1f   : > { %s310_s16 = sshll.u32 %s3781_s12, 4  ;;  %p3424_p12 = pneg %p3926_p11  ;;  %s311_s16 = int_to_ptr.vmem [resolvable:$true] %s310_s16 }
  0x20   : > { %s3612_s24 = scalar_lea.vmem %s311_s16, 4608  ;;  %p3620_p6 = scmp.lt.s32.totalorder %s311_s16, %s311_s16 }
  0x21   : > { %p3425_p13 = pnand %p3424_p12, %p3901_p1  ;;  %p3613_p2 = scmp.ne.s32.totalorder %s311_s16, %s3612_s24 }
  0x22   : > { %p3621_p9 = scmp.lt.s32.totalorder %s3612_s24, %s3612_s24 }
  0x23   : > { %p3603_p0 = pneg %p3425_p13 }
  0x24   : > { %p3622_p7 = por %p3621_p9, %p3620_p6 }
  0x25   : > { %p3615_p4 = pnand %p3613_p2, %p3603_p0 }
  0x27   : > { %p3616_p5 = pneg %p3615_p4 }
  0x29   : > { %p3623_p8 = pnand %p3622_p7, %p3616_p5 }
  0x2b   : > { %3626 = shalt.err (!%p3623_p8)
}
  0x2c   : > { %s4635_s25 = smov 64   ;;  %s4636_s12 = smov 4  }
  0x2d   : > { %s4658_s4 = sld [smem:[#allocation23_spill]]  ;;  %s36_s30 = sadd.s32 1, %s3771_s21 }
  0x2e   : > { %p37_p7 = scmp.ge.s32.totalorder %s36_s30, 4  ;;  %s39_s13 = sadd.s32 1, %s3775_s22 }
  0x2f   : > { %s46_s10 = sadd.s32 1, %s3759_s18  ;;  %p53_p9 = scmp.ne.s32.totalorder %s3759_s18, %s3755_s17 }
  0x30   : > { %s4711_s30 = smov (%p37_p7, %s36_s30), 0  ;;  %s4713_s13 = smov (!%p37_p7, %s39_s13), %s3775_s22 }
  0x31   : > { %p54_p10 = scmp.eq.s32.totalorder %s3779_s23, 0  ;;  %s2919_s29 = sshll.u32 %s3775_s22, 2 }
  0x32   : > { %p41_p12 = scmp.ge.s32.totalorder %s4713_s13, 2  ;;  %s259_s20 = sadd.s32 %s3771_s21, %s2919_s29 }
  0x33   : > { %3427 = dma.hbm_to_vmem [thread:$0]  (!%p3425_p13), %s4658_s4, 4608, %s311_s16, [#allocation7], %s4635_s25, %s4635_s25, %s4636_s12  }
  0x34   : > { %p3951_p13 = por %p54_p10, %p53_p9  ;;  %p3437_p0 = scmp.lt.s32.totalorder %s3779_s23, 8 }
  0x35   : > { %s4715_s13 = smov (%p41_p12, %s4713_s13), 0  ;;  %s339_s16 = sand.u32 1, %s3759_s18  }
  0x36   : > { %4660 = sst [smem:[#allocation17_spill]] %s4715_s13  ;;  %s3099_s24 = smul.u32 2304, %s3775_s22 }
  0x37   : > { %s43_s25 = ssub.s32 %s3775_s22, %s4715_s13  ;;  %s2920_s12 = sshll.u32 %s4715_s13, 2 }
  0x38   : > { %p44_p2 = scmp.eq.s32.totalorder %s43_s25, 0  ;;  %s261_s4 = sadd.s32 %s2920_s12, %s4711_s30 }
  0x39   : > { %s262_s9 = ssub.s32 %s259_s20, %s261_s4  ;;  %s3414_s21 = smul.u32 144, %s339_s16 }
  0x3a   : > { %s3965_s29 = scalar_select %p44_p2, %s3759_s18, %s46_s10  }
  0x3b   : > { %p263_p4 = scmp.eq.s32.totalorder %s262_s9, 0  ;;  %s349_s5 = scalar_lea.hbm %s4618_s0, %s3099_s24 }
  0x3c   : > { %p3974_p5 = pnand %p3437_p0, %p3951_p13  ;;  %s4662_s3 = sadd.s32 1, %s3747_s15 }
  0x3d   : > { %s3981_s13 = scalar_select %p263_p4, %s3747_s15, %s4662_s3  }
  0x3e   : > { %s343_s25 = scalar_lea.vmem [#allocation3], %s3414_s21  ;;  %s340_s10 = scalar_lea.sflag [#allocation4], %s339_s16 }
  0x3f   : > { %s350_s4 = sshll.u32 %s343_s25, 4  ;;  %p3629_p6 = pneg %p3974_p5  ;;  %s351_s4 = int_to_ptr.vmem [resolvable:$true] %s350_s4 }
  0x40   : > { %s3640_s9 = scalar_lea.vmem %s351_s4, 2304  ;;  %s3784_s6 = smov [#allocation3]  }
  0x41   : > { %p3641_p8 = scmp.ne.s32.totalorder %s351_s4, %s3640_s9  ;;  %s3645_s8 = sshll.u32 %s3784_s6, 4  ;;  %s3646_s8 = int_to_ptr.vmem [resolvable:$false] %s3645_s8 }
  0x42   : > { %s3647_s20 = scalar_lea.vmem %s3646_s8, 4608  ;;  %p3648_p10 = scmp.lt.s32.totalorder %s351_s4, %s3646_s8 }
  0x43   : > { %p3643_p7 = pnand %p3641_p8, %p3629_p6  ;;  %p3649_p12 = scmp.lt.s32.totalorder %s3647_s20, %s3640_s9 }
  0x45   : > { %p3644_p9 = pneg %p3643_p7  ;;  %p3650_p13 = por %p3649_p12, %p3648_p10 }
  0x47   : > { %p3651_p0 = pnand %p3650_p13, %p3644_p9 }
  0x49   : > { %3654 = shalt.err (!%p3651_p0)
}
  0x4a   : > { %s4663_s3 = smov 4   ;;  %s4664_s21 = smov 64  }
  0x4b   : > { %3431 = dma.hbm_to_vmem [thread:$0]  (!%p3974_p5), %s349_s5, 2304, %s351_s4, %s340_s10, %s4664_s21, %s4664_s21, %s4663_s3  }
  0x4c   : > { %362 = sbr.rel (%p3926_p11) target bundleno = 920 (0x398), region = 60 }
  0x51   : > { %s364_s12 = sand.u32 1, %s3755_s17  }
  0x52   : > { %s3993_s27 = smul.u32 144, %s364_s12  ;;  %s365_s16 = scalar_lea.sflag [#allocation4], %s364_s12 }
  0x54   : > { %s368_s24 = scalar_lea.vmem [#allocation3], %s3993_s27 }
  0x55   : > { %3726 = dma.done.wait (%p3910_p3), %s365_s16, 2304  }
  0x56   : > { %3728 = vsyncadd (%p3910_p3), %s365_s16, 4294964992 }
  0x57   : > { %3730 = dma.done.wait (%p3901_p1), [#allocation7], 4608  }
  0x58   : > { %3732 = vsyncadd (%p3901_p1), [#allocation7], 4294962688  ;;  %s406_s5 = sand.u32 1, %s3743_s14   ;;  %s2928_s11 = sshll.u32 %s3763_s19, 6  ;;  %v3535_v0 = vld [vmem:[%s4619_s1 + $0x38] sm:$0xff]   ;;  %v3536_v1 = vld [vmem:[%s4619_s1 + $0x30] sm:$0xff]  }
  0x59   : > { %s4007_s7 = sshll.u32 %s406_s5, 6  ;;  %s415_s25 = sshra.s32 %s2928_s11, 3  ;;  %3226 = vmatprep.subr.bf16.mxu0 %v3535_v0  ;;  %v3537_v2 = vld [vmem:[%s4619_s1 + $0x28] sm:$0xff]   ;;  %v3538_v3 = vld [vmem:[%s4619_s1 + $0x20] sm:$0xff]   ;;  %v3539_v5 = vld [vmem:[%s4619_s1 + $0x18] sm:$0xff]   ;;  %vm821_vm1 = vcmask 519168  }
  0x5a   : > { %s2929_s26 = sshll.u32 %s415_s25, 2  ;;  %3227 = vmatpush3.bf16.msra.mxu0 %v3535_v0  ;;  %v3540_v6 = vld [vmem:[%s4619_s1 + $0x10] sm:$0xff]   ;;  %v3541_v7 = vld [vmem:[%s4619_s1 + $0x8] sm:$0xff]   ;;  %v3542_v8 = vld [vmem:[%s4619_s1] sm:$0xff]   ;;  %s4665_s12 = sld [smem:[#allocation22_spill]]  ;;  %vm829_vm3 = vcmask 516096  }
  0x5b   : > { %3228 = vmatprep.subr.bf16.mxu0 %v3536_v1  ;;  %s418_s20 = scalar_lea.vmem %s368_s24, %s2929_s26 [#allocation3]  ;;  %v4041_v14 = vld [vmem:[%s4620_s2] ss:$0 sm:$0xff]  ;;  %vm698_vm0 = vsmask.f32 256  ;;  %vm822_vm2 = vsmask.f32 7938 }
  0x5c   : > { %v3543_v4 = vld [vmem:[%s418_s20] sm:$0xff]   ;;  %v3544_v9 = vld [vmem:[%s418_s20 + $0x8] sm:$0xff]   ;;  %v3545_v10 = vld [vmem:[%s418_s20 + $0x10] sm:$0xff]   ;;  %vm699_vm4 = vsmask.f32 4368  ;;  %p2958_p1 = scmp.ne.s32.totalorder %s3763_s19, 0 }
  0x5d   : > { %3242 = vmatprep.mubr.bf16.mxu0 %v3543_v4  ;;  %v3546_v11 = vld [vmem:[%s418_s20 + $0x18] sm:$0xff]   ;;  %v3547_v12 = vld [vmem:[%s418_s20 + $0x20] sm:$0xff]   ;;  %v3548_v13 = vld [vmem:[%s418_s20 + $0x28] sm:$0xff]   ;;  %s4167_s20 = scalar_lea.vmem [#allocation8], %s4007_s7 }
  0x5e   : > { %3229 = vmatpush3.bf16.msra.mxu0 %v3536_v1  ;;  %vm4059_vm5 = vmand %vm821_vm1, %vm822_vm2  ;;  %v834_v42 = vld [vmem:[#allocation2 + $0xc] sm:$0xf]  ;;  %v824_v52 = vld [vmem:[#allocation2] sm:$0xf] }
  0x5f   : > { %3230 = vmatprep.subr.bf16.mxu0 %v3537_v2  ;;  %vm4068_vm6 = vmand %vm829_vm3, %vm698_vm0  ;;  %v838_v0 = vld [vmem:[#allocation2 + $0x14] sm:$0x1] }
  0x60   : > { %v4046_v16 = vld [vmem:[%s4665_s12] ss:$0 sm:$0xff]  ;;  %vm4076_vm7 = vmor %vm698_vm0, %vm699_vm4 }
  0x61   : > { %vm4108_vm8 = vmand %vm829_vm3, %vm822_vm2 }
  0x62   : > { %3231 = vmatpush3.bf16.msra.mxu0 %v3537_v2 }
  0x63   : > { %3232 = vmatprep.subr.bf16.mxu0 %v3538_v3 }
  0x66   : > { %3233 = vmatpush3.bf16.msra.mxu0 %v3538_v3 }
  0x67   : > { %3234 = vmatprep.subr.bf16.mxu0 %v3539_v5 }
  0x6a   : > { %3235 = vmatpush3.bf16.msra.mxu0 %v3539_v5 }
  0x6b   : > { %3236 = vmatprep.subr.bf16.mxu0 %v3540_v6 }
  0x6e   : > { %3237 = vmatpush3.bf16.msra.mxu0 %v3540_v6 }
  0x6f   : > { %3238 = vmatprep.subr.bf16.mxu0 %v3541_v7 }
  0x72   : > { %3239 = vmatpush3.bf16.msra.mxu0 %v3541_v7 }
  0x73   : > { %3240 = vmatprep.subr.bf16.mxu0 %v3542_v8 }
  0x76   : > { %3241 = vmatpush3.bf16.msra.mxu0 %v3542_v8 }
  0x79   : > { %3243 = vmatmul.mubr.bf16.vlgmr.msra.gmra.mxu0 %v3544_v9 }
  0x7a   : > { %3246 = vmatprep.mubr.bf16.mxu0 %v3545_v10 }
  0x81   : > { %3247 = vmatmul.mubr.bf16.gmra.mxu0 %v3546_v11 }
  0x82   : > { %3250 = vmatprep.mubr.bf16.mxu0 %v3547_v12 }
  0x89   : > { %3251 = vmatmul.mubr.bf16.gmra.mxu0 %v3548_v13 }
 0x139   : > { %v3244_v15 = vpop.f32.mrf.mxu0 }
 0x13a   : > { %v621_v17 = vmul.f32 %v3244_v15, %v4041_v14 }
 0x13b   : > { %v565_v18 = vpop.f32.mrf.mxu0 }
 0x13c   : > { %v640_v19 = vadd.f32 %v4046_v16, %v621_v17  ;;  %v619_v20 = vmul.f32 %v4041_v14, %v565_v18 }
 0x13d   : > { %v3245_v21 = vpop.f32.mrf.mxu0 }
 0x13e   : > { %v652_v22 = vmax.f32 %v640_v19, 0.0  ;;  %v638_v23 = vadd.f32 %v4046_v16, %v619_v20  ;;  %v622_v24 = vmul.f32 %v3245_v21, %v4041_v14  ;;  %v831_v19 = vld [vmem:[#allocation2 + $0x8] sm:$0x1] }
 0x13f   : > { %v568_v25 = vpop.f32.mrf.mxu0 }
 0x140   : > { %v3102_v26 = vpack.c.bf16 %v652_v22, %v652_v22  ;;  %v650_v27 = vmax.f32 %v638_v23, 0.0  ;;  %v641_v28 = vadd.f32 %v4046_v16, %v622_v24  ;;  %v620_v29 = vmul.f32 %v4041_v14, %v568_v25 }
 0x141   : > { %v3248_v30 = vpop.f32.mrf.mxu0 }
 0x142   : > { %v719_v31 = vshrl.u32 %v3102_v26, 16  ;;  %v3100_v32 = vpack.c.bf16 %v650_v27, %v650_v27  ;;  %v653_v33 = vmax.f32 %v641_v28, 0.0  ;;  %v639_v34 = vadd.f32 %v4046_v16, %v620_v29  ;;  %v848_v27 = vld [vmem:[#allocation2 + $0x24] sm:$0xf] }
 0x143   : > { %v625_v35 = vmul.f32 %v3248_v30, %v4041_v14  ;;  %v581_v36 = vpop.f32.mrf.mxu0  ;;  %v722_v38 = vshll.u32 %v3102_v26, 16 }
 0x144   : > { %v721_v37 = vrot.slane %v719_v31, 7  ;;  %v702_v39 = vshrl.u32 %v3100_v32, 16  ;;  %v3103_v40 = vpack.c.bf16 %v653_v33, %v653_v33  ;;  %v705_v43 = vshll.u32 %v3100_v32, 16 }
 0x145   : > { %v651_v44 = vmax.f32 %v639_v34, 0.0  ;;  %v644_v45 = vadd.f32 %v4046_v16, %v625_v35  ;;  %v623_v46 = vmul.f32 %v4041_v14, %v581_v36  ;;  %v3249_v47 = vpop.f32.mrf.mxu0 }
 0x146   : > { %v724_v48 = vor.u32 %v722_v38, %v721_v37  ;;  %v725_v49 = vrot.slane %v721_v37, 4  ;;  %v704_v50 = vrot.slane %v702_v39, 7  ;;  %v727_v51 = vshrl.u32 %v3103_v40, 16 }
 0x147   : > { %v730_v53 = vshll.u32 %v3103_v40, 16  ;;  %v3101_v54 = vpack.c.bf16 %v651_v44, %v651_v44  ;;  %v656_v55 = vmax.f32 %v644_v45, 0.0  ;;  %v642_v56 = vadd.f32 %v4046_v16, %v623_v46  ;;  %v584_v57 = vpop.f32.mrf.mxu0  ;;  %v841_v44 = vld [vmem:[#allocation2 + $0x18] sm:$0xf] }
 0x148   : > { %v835_v59 = vsel %vm4059_vm5, %v724_v48, %v834_v42  ;;  %v707_v60 = vor.u32 %v705_v43, %v704_v50  ;;  %v708_v61 = vrot.slane %v704_v50, 4  ;;  %v729_v62 = vrot.slane %v727_v51, 7 }
 0x149   : > { %836 = vst [vmem:[#allocation2 + $0xc] sm:$0xf] %v835_v59  ;;  %v710_v1 = vshrl.u32 %v3101_v54, 16  ;;  %v713_v2 = vshll.u32 %v3101_v54, 16  ;;  %v3106_v3 = vpack.c.bf16 %v656_v55, %v656_v55  ;;  %v654_v4 = vmax.f32 %v642_v56, 0.0  ;;  %v3252_v5 = vpop.f32.mrf.mxu0 }
 0x14a   : > { %v825_v6 = vsel %vm4059_vm5, %v707_v60, %v824_v52  ;;  %v732_v7 = vor.u32 %v730_v53, %v729_v62  ;;  %v734_v8 = vrot.slane %v729_v62, 4  ;;  %v626_v9 = vmul.f32 %v3249_v47, %v4041_v14 }
 0x14b   : > { %826 = vst [vmem:[#allocation2] sm:$0xf] %v825_v6  ;;  %v712_v10 = vrot.slane %v710_v1, 7  ;;  %v753_v11 = vshrl.u32 %v3106_v3, 16  ;;  %v756_v12 = vshll.u32 %v3106_v3, 16  ;;  %v3104_v13 = vpack.c.bf16 %v654_v4, %v654_v4  ;;  %v597_v15 = vpop.f32.mrf.mxu0 }
 0x14c   : > { %v733_v17 = vsel %vm4076_vm7, %v725_v49, %v732_v7  ;;  %v839_v18 = vsel %vm4068_vm6, %v734_v8, %v838_v0  ;;  %v645_v20 = vadd.f32 %v4046_v16, %v626_v9  ;;  %v624_v21 = vmul.f32 %v4041_v14, %v584_v57 }
 0x14d   : > { %837 = vst.msk [vmem:[#allocation2 + $0x10] sm:$0xf] %vm821_vm1, %v733_v17  ;;  %840 = vst [vmem:[#allocation2 + $0x14] sm:$0x1] %v839_v18  ;;  %v715_v22 = vor.u32 %v713_v2, %v712_v10  ;;  %v717_v23 = vrot.slane %v712_v10, 4  ;;  %v755_v24 = vrot.slane %v753_v11, 7  ;;  %v3253_v26 = vpop.f32.mrf.mxu0  ;;  %v629_v31 = vmul.f32 %v3252_v5, %v4041_v14 }
 0x14e   : > { %v736_v25 = vshrl.u32 %v3104_v13, 16  ;;  %v739_v28 = vshll.u32 %v3104_v13, 16  ;;  %v657_v29 = vmax.f32 %v645_v20, 0.0  ;;  %v643_v30 = vadd.f32 %v4046_v16, %v624_v21  ;;  %v852_v2 = vld [vmem:[#allocation2 + $0x2c] sm:$0x1] }
 0x14f   : > { %v716_v32 = vsel %vm4076_vm7, %v708_v61, %v715_v22  ;;  %v832_v33 = vsel %vm4068_vm6, %v717_v23, %v831_v19  ;;  %v758_v34 = vor.u32 %v756_v12, %v755_v24  ;;  %v759_v35 = vrot.slane %v755_v24, 4  ;;  %v600_v47 = vpop.f32.mrf.mxu0  ;;  %v845_v19 = vld [vmem:[#allocation2 + $0x20] sm:$0x1] }
 0x150   : > { %v872_v36 = vld [vmem:[#allocation2 + $0xc] sm:$0x1]  ;;  %828 = vst.msk [vmem:[#allocation2 + $0x4] sm:$0xf] %vm821_vm1, %v716_v32  ;;  %833 = vst [vmem:[#allocation2 + $0x8] sm:$0x1] %v832_v33  ;;  %v3107_v38 = vpack.c.bf16 %v657_v29, %v657_v29  ;;  %v648_v40 = vadd.f32 %v4046_v16, %v629_v31  ;;  %v627_v45 = vmul.f32 %v4041_v14, %v597_v15 }
 0x151   : > { %v4097_v37 = vrot.slane %v736_v25, 7  ;;  %v655_v39 = vmax.f32 %v643_v30, 0.0  ;;  %v873_v42 = vsel %vm4068_vm6, 0, %v872_v36  ;;  %v849_v43 = vsel %vm4059_vm5, %v758_v34, %v848_v27 }
 0x152   : > { %v630_v46 = vmul.f32 %v3253_v26, %v4041_v14  ;;  %874 = vst [vmem:[#allocation2 + $0xc] sm:$0x1] %v873_v42  ;;  %v869_v49 = vld [vmem:[#allocation2] sm:$0x1]  ;;  %850 = vst [vmem:[#allocation2 + $0x24] sm:$0xf] %v849_v43  ;;  %v646_v57 = vadd.f32 %v4046_v16, %v627_v45  ;;  %v628_v0 = vmul.f32 %v4041_v14, %v600_v47 }
 0x153   : > { %v741_v50 = vor.u32 %v739_v28, %v4097_v37  ;;  %v742_v51 = vrot.slane %v4097_v37, 4  ;;  %v761_v52 = vshrl.u32 %v3107_v38, 16  ;;  %v764_v53 = vshll.u32 %v3107_v38, 16  ;;  %v862_v26 = vld [vmem:[#allocation2 + $0x3c] sm:$0xf] }
 0x154   : > { %v870_v54 = vsel %vm4068_vm6, 0, %v869_v49  ;;  %v3105_v55 = vpack.c.bf16 %v655_v39, %v655_v39  ;;  %v660_v56 = vmax.f32 %v648_v40, 0.0  ;;  %v891_v59 = vld [vmem:[#allocation2 + $0x14] sm:$0x1]  ;;  %v649_v62 = vadd.f32 %v4046_v16, %v630_v46  ;;  %v855_v39 = vld [vmem:[#allocation2 + $0x30] sm:$0xf] }
 0x155   : > { %871 = vst [vmem:[#allocation2] sm:$0x1] %v870_v54  ;;  %v842_v60 = vsel %vm4059_vm5, %v741_v50, %v841_v44  ;;  %v763_v61 = vrot.slane %v761_v52, 7  ;;  %v892_v1 = vsel %vm4108_vm8, 0, %v891_v59  ;;  %v658_v8 = vmax.f32 %v646_v57, 0.0 }
 0x156   : > { %843 = vst [vmem:[#allocation2 + $0x18] sm:$0xf] %v842_v60  ;;  %v744_v3 = vshrl.u32 %v3105_v55, 16  ;;  %v747_v4 = vshll.u32 %v3105_v55, 16  ;;  %v3110_v5 = vpack.c.bf16 %v660_v56, %v660_v56  ;;  %893 = vst [vmem:[#allocation2 + $0x14] sm:$0x1] %v892_v1  ;;  %v647_v15 = vadd.f32 %v4046_v16, %v628_v0 }
 0x157   : > { %v766_v6 = vor.u32 %v764_v53, %v763_v61  ;;  %v768_v7 = vrot.slane %v763_v61, 4  ;;  %v661_v9 = vmax.f32 %v649_v62, 0.0  ;;  %v888_v10 = vld [vmem:[#allocation2 + $0x8] sm:$0x1]  ;;  %v3108_v20 = vpack.c.bf16 %v658_v8, %v658_v8  ;;  %v866_v46 = vld [vmem:[#allocation2 + $0x44] sm:$0x1] }
 0x158   : > { %v746_v11 = vrot.slane %v744_v3, 7  ;;  %v787_v12 = vshrl.u32 %v3110_v5, 16  ;;  %v790_v13 = vshll.u32 %v3110_v5, 16  ;;  %v889_v14 = vsel %vm4108_vm8, 0, %v888_v10  ;;  %v859_v56 = vld [vmem:[#allocation2 + $0x38] sm:$0x1] }
 0x159   : > { %v767_v17 = vsel %vm4076_vm7, %v759_v35, %v766_v6  ;;  %v853_v18 = vsel %vm4068_vm6, %v768_v7, %v852_v2  ;;  %890 = vst [vmem:[#allocation2 + $0x8] sm:$0x1] %v889_v14  ;;  %v878_v21 = vld [vmem:[#allocation2 + $0x24] sm:$0x1]  ;;  %v3111_v16 = vpack.c.bf16 %v661_v9, %v661_v9  ;;  %v770_v27 = vshrl.u32 %v3108_v20, 16 }
 0x15a   : > { %851 = vst.msk [vmem:[#allocation2 + $0x28] sm:$0xf] %vm821_vm1, %v767_v17  ;;  %854 = vst [vmem:[#allocation2 + $0x2c] sm:$0x1] %v853_v18  ;;  %v749_v22 = vor.u32 %v747_v4, %v746_v11  ;;  %v751_v23 = vrot.slane %v746_v11, 4  ;;  %v789_v24 = vrot.slane %v787_v12, 7 }
 0x15b   : > { %v879_v25 = vsel %vm4068_vm6, 0, %v878_v21  ;;  %v659_v28 = vmax.f32 %v647_v15, 0.0  ;;  %v772_v33 = vrot.slane %v770_v27, 7  ;;  %v773_v34 = vshll.u32 %v3108_v20, 16 }
 0x15c   : > { %880 = vst [vmem:[#allocation2 + $0x24] sm:$0x1] %v879_v25  ;;  %v750_v29 = vsel %vm4076_vm7, %v742_v51, %v749_v22  ;;  %v846_v30 = vsel %vm4068_vm6, %v751_v23, %v845_v19  ;;  %v792_v31 = vor.u32 %v790_v13, %v789_v24  ;;  %v795_v35 = vshrl.u32 %v3111_v16, 16 }
 0x15d   : > { %v875_v32 = vld [vmem:[#allocation2 + $0x18] sm:$0x1]  ;;  %844 = vst.msk [vmem:[#allocation2 + $0x1c] sm:$0xf] %vm821_vm1, %v750_v29  ;;  %847 = vst [vmem:[#allocation2 + $0x20] sm:$0x1] %v846_v30  ;;  %v3109_v36 = vpack.c.bf16 %v659_v28, %v659_v28  ;;  %v775_v40 = vor.u32 %v773_v34, %v772_v33 }
 0x15e   : > { %v876_v37 = vsel %vm4068_vm6, 0, %v875_v32  ;;  %v863_v38 = vsel %vm4059_vm5, %v792_v31, %v862_v26  ;;  %v797_v42 = vrot.slane %v795_v35, 7  ;;  %v798_v43 = vshll.u32 %v3111_v16, 16 }
 0x15f   : > { %877 = vst [vmem:[#allocation2 + $0x18] sm:$0x1] %v876_v37  ;;  %864 = vst [vmem:[#allocation2 + $0x3c] sm:$0xf] %v863_v38  ;;  %v778_v44 = vshrl.u32 %v3109_v36, 16  ;;  %v793_v45 = vrot.slane %v789_v24, 4  ;;  %v856_v50 = vsel %vm4059_vm5, %v775_v40, %v855_v39 }
 0x160   : > { %v781_v47 = vshll.u32 %v3109_v36, 16  ;;  %v800_v51 = vor.u32 %v798_v43, %v797_v42  ;;  %v802_v52 = vrot.slane %v797_v42, 4  ;;  %v776_v55 = vrot.slane %v772_v33, 4  ;;  %857 = vst [vmem:[#allocation2 + $0x30] sm:$0xf] %v856_v50 }
 0x161   : > { %v897_v49 = vld [vmem:[#allocation2 + $0x2c] sm:$0x1]  ;;  %v780_v53 = vrot.slane %v778_v44, 7 }
 0x162   : > { %v898_v54 = vsel %vm4108_vm8, 0, %v897_v49  ;;  %v801_v57 = vsel %vm4076_vm7, %v793_v45, %v800_v51  ;;  %v867_v59 = vsel %vm4068_vm6, %v802_v52, %v866_v46 }
 0x163   : > { %899 = vst [vmem:[#allocation2 + $0x2c] sm:$0x1] %v898_v54  ;;  %v783_v60 = vor.u32 %v781_v47, %v780_v53  ;;  %v785_v61 = vrot.slane %v780_v53, 4  ;;  %865 = vst.msk [vmem:[#allocation2 + $0x40] sm:$0xf] %vm821_vm1, %v801_v57 }
 0x164   : > { %v894_v41 = vld [vmem:[#allocation2 + $0x20] sm:$0x1]  ;;  %868 = vst [vmem:[#allocation2 + $0x44] sm:$0x1] %v867_v59 }
 0x165   : > { %v895_v62 = vsel %vm4108_vm8, 0, %v894_v41  ;;  %v784_v0 = vsel %vm4076_vm7, %v776_v55, %v783_v60  ;;  %v860_v1 = vsel %vm4068_vm6, %v785_v61, %v859_v56 }
 0x166   : > { %896 = vst [vmem:[#allocation2 + $0x20] sm:$0x1] %v895_v62  ;;  %v884_v2 = vld [vmem:[#allocation2 + $0x3c] sm:$0x1]  ;;  %858 = vst.msk [vmem:[#allocation2 + $0x34] sm:$0xf] %vm821_vm1, %v784_v0 }
 0x167   : > { %861 = vst [vmem:[#allocation2 + $0x38] sm:$0x1] %v860_v1  ;;  %v885_v3 = vsel %vm4068_vm6, 0, %v884_v2  ;;  %v881_v4 = vld [vmem:[#allocation2 + $0x30] sm:$0x1] }
 0x168   : > { %886 = vst [vmem:[#allocation2 + $0x3c] sm:$0x1] %v885_v3  ;;  %v882_v5 = vsel %vm4068_vm6, 0, %v881_v4 }
 0x169   : > { %883 = vst [vmem:[#allocation2 + $0x30] sm:$0x1] %v882_v5 }
 0x16b   : > { %v903_v63 = vld [vmem:[#allocation2 + $0x44] sm:$0x1] }
 0x16c   : > { %v904_v6 = vsel %vm4108_vm8, 0, %v903_v63  ;;  %909 = sbr.rel (%p2958_p1) target bundleno = 372 (0x174), region = 72 }
 0x16d   : > { %905 = vst [vmem:[#allocation2 + $0x44] sm:$0x1] %v904_v6 }
 0x16e   : > { %v900_v7 = vld [vmem:[#allocation2 + $0x38] sm:$0x1] }
 0x16f   : > { %v901_v8 = vsel %vm4108_vm8, 0, %v900_v7 }
 0x170   : > { %902 = vst [vmem:[#allocation2 + $0x38] sm:$0x1] %v901_v8 }
 0x171   : > { %v3785_v9 = vmov 0  }
 0x172   : > { %910 = vst.msk [vmem:[#allocation2] sm:$0xf] %vm821_vm1, %v3785_v9  ;;  %911 = vst.msk [vmem:[#allocation2 + $0x4] sm:$0xf] %vm821_vm1, %v3785_v9 }
 0x173   : > { %912 = vst.msk [vmem:[#allocation2 + $0x8] sm:$0xf] %vm821_vm1, %v3785_v9 }
 0x174 PF: > { %p2959_p3 = scmp.ne.s32.totalorder %s3763_s19, 3 }
 0x176   : > { %916 = sbr.rel (%p2959_p3) target bundleno = 382 (0x17e), region = 76 }
 0x17b   : > { %v3786_v58 = vmov 0  }
 0x17c   : > { %918 = vst.msk [vmem:[#allocation2 + $0x3c] sm:$0xf] %vm821_vm1, %v3786_v58  ;;  %919 = vst.msk [vmem:[#allocation2 + $0x40] sm:$0xf] %vm821_vm1, %v3786_v58 }
 0x17d   : > { %920 = vst.msk [vmem:[#allocation2 + $0x44] sm:$0xf] %vm821_vm1, %v3786_v58 }
 0x17e PF: > { %v3549_v48 = vld [vmem:[#allocation6 + $0x38] sm:$0xff]   ;;  %v3550_v10 = vld [vmem:[#allocation6 + $0x30] sm:$0xff]   ;;  %v3551_v11 = vld [vmem:[#allocation6 + $0x28] sm:$0xff]   ;;  %vm941_vm9 = vsmask.f32 3328  ;;  %vm1085_vm12 = vcmask 523264  }
 0x17f   : > { %3254 = vmatprep.subr.bf16.mxu1 %v3549_v48  ;;  %v4177_v12 = vld [vmem:[#allocation2] sm:$0xf]  ;;  %v4179_v13 = vld [vmem:[#allocation2 + $0x4] sm:$0xf]  ;;  %v4181_v15 = vld [vmem:[#allocation2 + $0x8] sm:$0x1] }
 0x180   : > { %3255 = vmatpush3.bf16.msra.mxu1 %v3549_v48  ;;  %vm942_vm10 = vsmask.f32 7440  ;;  %v945_v14 = vshrl.u32 %v4177_v12, 16  ;;  %v948_v17 = vshll.u32 %v4177_v12, 16  ;;  %v954_v18 = vshll.u32 %v4179_v13, 16  ;;  %v3552_v25 = vld [vmem:[#allocation6 + $0x20] sm:$0xff]  }
 0x181   : > { %3256 = vmatprep.subr.bf16.mxu1 %v3550_v10  ;;  %v958_v19 = vshrl.u32 %v4179_v13, 16  ;;  %v964_v20 = vshll.u32 %v4181_v15, 16  ;;  %v4188_v21 = vld [vmem:[#allocation2 + $0xc] sm:$0xf]  ;;  %v4190_v24 = vld [vmem:[#allocation2 + $0x10] sm:$0xf]  ;;  %vm4200_vm11 = vmor %vm941_vm9, %vm942_vm10 }
 0x182   : > { %v947_v22 = vrot.slane %v945_v14, 4  ;;  %v950_v23 = vrot.slane %v948_v17, 5  ;;  %v4192_v16 = vld [vmem:[#allocation2 + $0x14] sm:$0x1]  ;;  %v956_v26 = vrot.slane %v954_v18, 5  ;;  %v969_v28 = vshrl.u32 %v4188_v21, 16 }
 0x183   : > { %v960_v27 = vrot.slane %v958_v19, 4  ;;  %v972_v30 = vshll.u32 %v4188_v21, 16  ;;  %v978_v31 = vshll.u32 %v4190_v24, 16  ;;  %v982_v32 = vshrl.u32 %v4190_v24, 16  ;;  %v3553_v45 = vld [vmem:[#allocation6 + $0x18] sm:$0xff]   ;;  %v3554_v48 = vld [vmem:[#allocation6 + $0x10] sm:$0xff]  }
 0x184   : > { %3257 = vmatpush3.bf16.msra.mxu1 %v3550_v10  ;;  %v951_v29 = vor.u32 %v950_v23, %v947_v22  ;;  %v966_v35 = vrot.slane %v964_v20, 5  ;;  %v971_v36 = vrot.slane %v969_v28, 4  ;;  %v988_v37 = vshll.u32 %v4192_v16, 16  ;;  %v4205_v46 = vld [vmem:[#allocation2 + $0x18] sm:$0xf]  ;;  %v3560_v1 = vld [vmem:[#allocation6 + $0x78] sm:$0xff]  }
 0x185   : > { %3258 = vmatprep.subr.bf16.mxu1 %v3551_v11  ;;  %v961_v34 = vor.u32 %v960_v27, %v956_v26  ;;  %v974_v39 = vrot.slane %v972_v30, 5  ;;  %v980_v40 = vrot.slane %v978_v31, 5  ;;  %v984_v42 = vrot.slane %v982_v32, 4  ;;  %v4209_v51 = vld [vmem:[#allocation2 + $0x1c] sm:$0xf]  ;;  %3302 = vmatprep.subr.bf16.mxu0 %v3560_v1  ;;  %s4678_s25 = sld [smem:[#allocation26_spill]] }
 0x186   : > { %v952_v38 = vrot.slane %v951_v29, 4  ;;  %v990_v44 = vrot.slane %v988_v37, 5  ;;  %v4211_v52 = vld [vmem:[#allocation2 + $0x20] sm:$0x1]  ;;  %v993_v53 = vshrl.u32 %v4205_v46, 16  ;;  %v996_v55 = vshll.u32 %v4205_v46, 16  ;;  %3303 = vmatpush3.bf16.msra.mxu0 %v3560_v1 }
 0x187   : > { %v962_v43 = vrot.slane %v961_v34, 4  ;;  %v975_v49 = vor.u32 %v974_v39, %v971_v36  ;;  %v985_v50 = vor.u32 %v984_v42, %v980_v40  ;;  %v1002_v56 = vshll.u32 %v4209_v51, 16  ;;  %v4219_v59 = vld [vmem:[#allocation2 + $0x24] sm:$0xf]  ;;  %v4221_v0 = vld [vmem:[#allocation2 + $0x28] sm:$0xf] }
 0x188   : > { %3259 = vmatpush3.bf16.msra.mxu1 %v3551_v11  ;;  %v957_v47 = vsel %vm4200_vm11, %v952_v38, %v956_v26  ;;  %v1006_v57 = vshrl.u32 %v4209_v51, 16  ;;  %v995_v62 = vrot.slane %v993_v53, 4  ;;  %v998_v2 = vrot.slane %v996_v55, 5  ;;  %v4224_v63 = vld [vmem:[#allocation2 + $0x2c] sm:$0x1]  ;;  %v3562_v26 = vld [vmem:[#allocation6 + $0x70] sm:$0xff]  }
 0x189   : > { %3260 = vmatprep.subr.bf16.mxu1 %v3552_v25  ;;  %v967_v54 = vsel %vm4200_vm11, %v962_v43, %v966_v35  ;;  %v976_v61 = vrot.slane %v975_v49, 4  ;;  %v986_v41 = vrot.slane %v985_v50, 4  ;;  %v1004_v3 = vrot.slane %v1002_v56, 5  ;;  %v3555_v34 = vld [vmem:[#allocation6 + $0x8] sm:$0xff]   ;;  %3304 = vmatprep.subr.bf16.mxu0 %v3562_v26  ;;  %v3556_v42 = vld [vmem:[#allocation6] sm:$0xff]   ;;  %v3559_v53 = vld [vmem:[#allocation6 + $0x58] sm:$0xff]  }
 0x18a   : > { %v2960_v60 = vcombine.low %v957_v47, %v967_v54  ;;  %v1008_v4 = vrot.slane %v1006_v57, 4  ;;  %v1012_v5 = vshll.u32 %v4211_v52, 16  ;;  %v1017_v8 = vshrl.u32 %v4219_v59, 16  ;;  %3305 = vmatpush3.bf16.msra.mxu0 %v3562_v26  ;;  %v3566_v38 = vld [vmem:[#allocation6 + $0x68] sm:$0xff]   ;;  %v3568_v49 = vld [vmem:[#allocation6 + $0x60] sm:$0xff]   ;;  %v3561_v1 = vld [vmem:[#allocation6 + $0x50] sm:$0xff]  }
 0x18b   : > { %v981_v6 = vsel %vm4200_vm11, %v976_v61, %v980_v40  ;;  %v991_v7 = vsel %vm4200_vm11, %v986_v41, %v990_v44  ;;  %v1020_v9 = vshll.u32 %v4219_v59, 16  ;;  %v999_v10 = vor.u32 %v998_v2, %v995_v62  ;;  %3306 = vmatprep.subr.bf16.mxu0 %v3566_v38  ;;  %v1284_v54 = vld [vmem:[#allocation2] sm:$0xe]  ;;  %v1285_v55 = vld [vmem:[#allocation2 + $0xc] sm:$0xe]  ;;  %s4683_s21 = sld [smem:[#allocation24_spill]] }
 0x18c   : > { %3261 = vmatpush3.bf16.msra.mxu1 %v3552_v25  ;;  %3262 = vmatprep.mubr.msk.bf16.mxu1 %vm1085_vm12, %v2960_v60  ;;  %v2961_v58 = vcombine.low %v981_v6, %v991_v7  ;;  %v1009_v11 = vor.u32 %v1008_v4, %v1004_v3  ;;  %v1014_v14 = vrot.slane %v1012_v5, 5  ;;  %v1019_v17 = vrot.slane %v1017_v8, 4  ;;  %v3570_v57 = vld [vmem:[#allocation2 + $0xc] sm:$0xff]   ;;  %v3572_v61 = vld [vmem:[#allocation6 + $0xb8] sm:$0xff]   ;;  %s4686_s16 = sld [smem:[#allocation25_spill]]  ;;  %s2726_s28 = sadd.s32 16, %s2928_s11 }
 0x18d   : > { %3270 = vmatprep.subr.bf16.mxu1 %v3553_v45  ;;  %v1022_v18 = vrot.slane %v1020_v9, 5  ;;  %v1026_v19 = vshll.u32 %v4221_v0, 16  ;;  %v1030_v20 = vshrl.u32 %v4221_v0, 16  ;;  %v1000_v22 = vrot.slane %v999_v10, 4  ;;  %3310 = vmatprep.mubr.msk.bf16.mxu0 %vm1085_vm12, %v3570_v57  ;;  %v1287_v7 = vld [vmem:[#allocation2 + $0x24] sm:$0xe] }
 0x18e   : > { %v1010_v23 = vrot.slane %v1009_v11, 4  ;;  %v1036_v25 = vshll.u32 %v4224_v63, 16  ;;  %vm1296_vm13 = vcmask 1042432   ;;  %vm1297_vm14 = vcmask 1046532   ;;  %3307 = vmatpush3.bf16.msra.mxu0 %v3566_v38  ;;  %v3576_v9 = vld [vmem:[#allocation2 + $0x24] sm:$0xff]   ;;  %v3578_v10 = vld [vmem:[#allocation6 + $0xa8] sm:$0xff]  }
 0x18f   : > { %3263 = vmatmul.mubr.msk.bf16.vlgmr.msra.gmra.mxu1 %vm1085_vm12, %v2961_v58  ;;  %v1023_v27 = vor.u32 %v1022_v18, %v1019_v17  ;;  %v1028_v28 = vrot.slane %v1026_v19, 5  ;;  %v1032_v29 = vrot.slane %v1030_v20, 4  ;;  %v1005_v30 = vsel %vm4200_vm11, %v1000_v22, %v1004_v3  ;;  %3308 = vmatprep.subr.bf16.mxu0 %v3568_v49  ;;  %vm4260_vm15 = vmor %vm1296_vm13, %vm1297_vm14  ;;  %v1605_v26 = vld [vmem:[#allocation2 + $0x10] sm:$0xf]  ;;  %v3599_v2 = vld [vmem:[%s4678_s25 + $0x8] sm:$0xff]   ;;  %s2727_s4 = sshra.s32 %s2726_s28, 3 }
 0x190   : > { %3271 = vmatpush3.bf16.msra.mxu1 %v3553_v45  ;;  %v1015_v31 = vsel %vm4200_vm11, %v1010_v23, %v1014_v14  ;;  %v1038_v32 = vrot.slane %v1036_v25, 5  ;;  %v1304_v43 = vrot.slane %v4181_v15, 5  ;;  %v1308_v44 = vrot.slane %v4190_v24, 5  ;;  %v3571_v15 = vld [vmem:[#allocation2 + $0x18] sm:$0xff]   ;;  %v3565_v14 = vld [vmem:[#allocation6 + $0x48] sm:$0xff]   ;;  %v3580_v23 = vld [vmem:[#allocation6 + $0xa0] sm:$0xff]  }
 0x191   : > { %3272 = vmatprep.subr.bf16.mxu1 %v3554_v48  ;;  %v2962_v35 = vcombine.low %v1005_v30, %v1015_v31  ;;  %v1024_v36 = vrot.slane %v1023_v27, 4  ;;  %v1033_v37 = vor.u32 %v1032_v29, %v1028_v28  ;;  %v2972_v47 = vcombine.low %v4177_v12, %v4179_v13  ;;  %v1604_v25 = vld [vmem:[#allocation2 + $0xc] sm:$0xf]  ;;  %s3090_s10 = sshll.u32 %s2727_s4, 2  ;;  %s4689_s8 = sld [smem:[#allocation27_spill]] }
 0x192   : > { %v1301_v56 = vrot.slane %v4179_v13, 5  ;;  %3309 = vmatpush3.bf16.msra.mxu0 %v3568_v49  ;;  %v1315_v12 = vrot.slane %v4209_v51, 5  ;;  %v1311_v60 = vrot.slane %v4192_v16, 5  ;;  %v2973_v41 = vcombine.low %v4188_v21, %v4190_v24  ;;  %v3574_v16 = vld [vmem:[#allocation6 + $0xb0] sm:$0xff]   ;;  %v3567_v29 = vld [vmem:[#allocation6 + $0x40] sm:$0xff]   ;;  %v3569_v49 = vld [vmem:[#allocation6 + $0x98] sm:$0xff]   ;;  %s2730_s9 = scalar_lea.vmem %s368_s24, %s3090_s10 [#allocation3] }
 0x193   : > { %3266 = vmatprep.mubr.msk.bf16.mxu1 %vm1085_vm12, %v2962_v35  ;;  %v1029_v39 = vsel %vm4200_vm11, %v1024_v36, %v1028_v28  ;;  %v1034_v40 = vrot.slane %v1033_v37, 4  ;;  %v2984_v13 = vrot.slane %v1284_v54, 9  ;;  %v2985_v62 = vrot.slane %v1285_v55, 9  ;;  %3334 = vmatprep.subr.bf16.mxu0 %v3572_v61  ;;  %v1286_v24 = vld [vmem:[#allocation2 + $0x18] sm:$0xe]  ;;  %s4690_s12 = sld [smem:[#allocation28_spill]] }
 0x194   : > { %3273 = vmatpush3.bf16.msra.mxu1 %v3554_v48  ;;  %v1303_v3 = vrot.slane %v1301_v56, 4  ;;  %v1310_v4 = vrot.slane %v1308_v44, 4  ;;  %v1317_v5 = vrot.slane %v1315_v12, 4  ;;  %v1318_v6 = vrot.slane %v4211_v52, 5  ;;  %v1607_v35 = vld [vmem:[#allocation2 + $0x18] sm:$0xf] }
 0x195   : > { %3274 = vmatprep.subr.bf16.mxu1 %v3555_v34  ;;  %v1039_v45 = vsel %vm4200_vm11, %v1034_v40, %v1038_v32  ;;  %3311 = vmatmul.mubr.msk.bf16.vlgmr.msra.gmra.mxu0 %vm1085_vm12, %v3571_v15  ;;  %v2974_v21 = vcombine.low %v4205_v46, %v4209_v51  ;;  %v1322_v8 = vrot.slane %v4221_v0, 5  ;;  %v1302_v58 = vsel %vm4260_vm15, %v2984_v13, %v1301_v56  ;;  %v3577_v46 = vld [vmem:[#allocation2 + $0x30] sm:$0xff]   ;;  %v1608_v36 = vld [vmem:[#allocation2 + $0x1c] sm:$0xf]  ;;  %v1842_v56 = vld [vmem:[#allocation2 + $0xc] sm:$0xe] }
 0x196   : > { %v2963_v50 = vcombine.low %v1029_v39, %v1039_v45  ;;  %3335 = vmatpush3.bf16.msra.mxu0 %v3572_v61  ;;  %v1305_v48 = vsel %vm4260_vm15, %v1303_v3, %v1304_v43  ;;  %v2986_v52 = vrot.slane %v1286_v24, 9  ;;  %3314 = vmatprep.mubr.msk.bf16.mxu0 %vm1085_vm12, %v3576_v9  ;;  %v2987_v51 = vrot.slane %v1287_v7, 9  ;;  %v1843_v61 = vld [vmem:[#allocation2 + $0x18] sm:$0xe]  ;;  %s4691_s27 = sld [smem:[#allocation13_spill]]  ;;  %s2817_s28 = sshll.u32 %s4167_s20, 4  ;;  %s4552_s28 = int_to_ptr.vmem [resolvable:$true] %s2817_s28 }
 0x197   : > { %3336 = vmatprep.subr.bf16.mxu0 %v3574_v16  ;;  %v2975_v11 = vcombine.low %v4219_v59, %v4221_v0  ;;  %v1325_v17 = vrot.slane %v4224_v63, 5  ;;  %v2988_v18 = vcombine.low %v1302_v58, %v1305_v48  ;;  %v4281_v19 = vsel %vm4260_vm15, %v2985_v62, %v1308_v44  ;;  %v4288_v59 = vld [vmem:[#allocation2 + $0x14] sm:$0x1]  ;;  %s4692_s7 = sld [smem:[#allocation15_spill]]  ;;  %s4558_s26 = scalar_lea.sflag [#allocation5], %s406_s5 }
 0x198   : > { %3275 = vmatpush3.bf16.msra.mxu1 %v3555_v34  ;;  %v4285_v20 = vsel %vm4260_vm15, %v1310_v4, %v1311_v60  ;;  %v1324_v22 = vrot.slane %v1322_v8, 4  ;;  %v1617_v0 = vshrl.u32 %v1604_v25, 16  ;;  %v1620_v63 = vshll.u32 %v1604_v25, 16  ;;  %s4693_s10 = sld [smem:[#allocation29_spill]]  ;;  %s3655_s6 = scalar_lea.vmem %s4552_s28, 1024 }
 0x199   : > { %3267 = vmatmul.mubr.msk.bf16.gmra.mxu1 %vm1085_vm12, %v2963_v50  ;;  %3276 = vmatprep.subr.bf16.mxu1 %v3556_v42  ;;  %v1626_v27 = vshll.u32 %v1605_v26, 16  ;;  %v1630_v28 = vshrl.u32 %v1605_v26, 16  ;;  %v4292_v30 = vsel %vm4260_vm15, %v2986_v52, %v1315_v12  ;;  %v4296_v31 = vsel %vm4260_vm15, %v1317_v5, %v1318_v6  ;;  %v3582_v6 = vld [vmem:[#allocation6 + $0xf8] sm:$0xff]   ;;  %p3656_p11 = scmp.ne.s32.totalorder %s4552_s28, %s3655_s6 }
 0x19a   : > { %3278 = vmatprep.mubr.msk.bf16.mxu1 %vm1085_vm12, %v2972_v47  ;;  %3337 = vmatpush3.bf16.msra.mxu0 %v3574_v16  ;;  %v4300_v32 = vsel %vm4260_vm15, %v2987_v51, %v1322_v8  ;;  %v1636_v34 = vshll.u32 %v4288_v59, 16  ;;  %v1619_v37 = vrot.slane %v1617_v0, 4  ;;  %v1622_v38 = vrot.slane %v1620_v63, 5 }
 0x19b   : > { %3338 = vmatprep.subr.bf16.mxu0 %v3578_v10  ;;  %v4303_v39 = vrot.slane %v1626_v27, 5  ;;  %v1632_v40 = vrot.slane %v1630_v28, 4  ;;  %v4307_v43 = vsel %vm4260_vm15, %v1324_v22, %v1325_v17  ;;  %v1641_v44 = vshrl.u32 %v1607_v35, 16  ;;  %v1610_v17 = vld [vmem:[#allocation2 + $0x24] sm:$0xf] }
 0x19c   : > { %3277 = vmatpush3.bf16.msra.mxu1 %v3556_v42  ;;  %v1609_v42 = vld [vmem:[#allocation2 + $0x20] sm:$0x1]  ;;  %v1644_v45 = vshll.u32 %v1607_v35, 16  ;;  %v1650_v47 = vshll.u32 %v1608_v36, 16  ;;  %v1623_v50 = vor.u32 %v1622_v38, %v1619_v37  ;;  %v1654_v54 = vshrl.u32 %v1608_v36, 16  ;;  %s3094_s24 = sshll.u32 %s4691_s27, 2 }
 0x19d   : > { %3286 = vmatprep.subr.bf16.mxu1 %v3559_v53  ;;  %3315 = vmatmul.mubr.msk.bf16.gmra.mxu0 %vm1085_vm12, %v3577_v46  ;;  %v1660_v55 = vshll.u32 %v1609_v42, 16  ;;  %v1643_v57 = vrot.slane %v1641_v44, 4  ;;  %v3024_v60 = vrot.slane %v1842_v56, 9  ;;  %v1638_v62 = vrot.slane %v1636_v34, 5  ;;  %v3573_v46 = vld [vmem:[#allocation6 + $0x90] sm:$0xff]   ;;  %s2810_s11 = sadd.s32 %s3763_s19, %s3094_s24  ;;  %p4694_p2 = scmp.ne.s32.totalorder %s4692_s7, 0 }
 0x19e   : > { %3339 = vmatpush3.bf16.msra.mxu0 %v3578_v10  ;;  %v1646_v15 = vrot.slane %v1644_v45, 5  ;;  %v4312_v12 = vrot.slane %v1650_v47, 5  ;;  %v2989_v3 = vcombine.low %v4281_v19, %v4285_v20  ;;  %v1860_v4 = vrot.slane %v1605_v26, 5  ;;  %v1611_v20 = vld [vmem:[#allocation2 + $0x28] sm:$0xf]  ;;  %v3575_v26 = vld [vmem:[#allocation6 + $0x88] sm:$0xff]  }
 0x19f   : > { %3340 = vmatprep.subr.bf16.mxu0 %v3580_v23  ;;  %v1863_v16 = vrot.slane %v4288_v59, 5  ;;  %v3025_v5 = vrot.slane %v1843_v61, 9  ;;  %v2991_v24 = vcombine.low %v4300_v32, %v4307_v43  ;;  %v1867_v8 = vrot.slane %v1608_v36, 5  ;;  %v4335_v22 = vld [vmem:[#allocation2 + $0x2c] sm:$0x1]  ;;  %v3584_v34 = vld [vmem:[#allocation6 + $0xf0] sm:$0xff]   ;;  %p3657_p4 = pnand %p3656_p11, %p4694_p2 }
 0x1a0   : > { %v1647_v7 = vor.u32 %v1646_v15, %v1643_v57  ;;  %v4322_v58 = vrot.slane %v1660_v55, 5  ;;  %v1861_v48 = vsel %vm4260_vm15, %v3024_v60, %v1860_v4  ;;  %v1862_v52 = vrot.slane %v1860_v4, 4  ;;  %v1613_v28 = vld [vmem:[#allocation2 + $0x30] sm:$0xf]  ;;  %v1615_v56 = vld [vmem:[#allocation2 + $0x38] sm:$0x1] }
 0x1a1   : > { %3279 = vmatmul.mubr.msk.bf16.vlgmr.msra.gmra.mxu1 %vm1085_vm12, %v2973_v41  ;;  %v1624_v41 = vrot.slane %v1623_v50, 4  ;;  %v1868_v10 = vsel %vm4260_vm15, %v3025_v5, %v1867_v8  ;;  %v1668_v25 = vshll.u32 %v1610_v17, 16  ;;  %v1674_v27 = vshll.u32 %v1611_v20, 16  ;;  %v3579_v50 = vld [vmem:[#allocation6 + $0x80] sm:$0xff]   ;;  %v1845_v15 = vld [vmem:[#allocation2 + $0x30] sm:$0xe]  ;;  %p3658_p5 = pneg %p3657_p4 }
 0x1a2   : > { %3287 = vmatpush3.bf16.msra.mxu1 %v3559_v53  ;;  %3282 = vmatprep.mubr.msk.bf16.mxu1 %vm1085_vm12, %v2974_v21  ;;  %v1633_v53 = vor.u32 %v1632_v40, %v4303_v39  ;;  %v2990_v21 = vcombine.low %v4292_v30, %v4296_v31  ;;  %v1864_v19 = vsel %vm4260_vm15, %v1862_v52, %v1863_v16  ;;  %v4338_v59 = vrot.slane %v1647_v7, 4  ;;  %v3586_v16 = vld [vmem:[#allocation6 + $0xe8] sm:$0xff]   ;;  %v3581_v7 = vld [vmem:[#allocation6 + $0xd8] sm:$0xff]  }
 0x1a3   : > { %3288 = vmatprep.subr.bf16.mxu1 %v3561_v1  ;;  %3341 = vmatpush3.bf16.msra.mxu0 %v3580_v23  ;;  %v1629_v51 = vsel %vm4200_vm11, %v1624_v41, %v4303_v39  ;;  %v1665_v23 = vshrl.u32 %v1610_v17, 16  ;;  %v3028_v0 = vcombine.low %v1861_v48, %v1864_v19  ;;  %v1670_v36 = vrot.slane %v1668_v25, 5 }
 0x1a4   : > { %v1634_v13 = vrot.slane %v1633_v53, 4  ;;  %3366 = vmatprep.subr.bf16.mxu0 %v3582_v6  ;;  %v4348_v37 = vrot.slane %v1674_v27, 5  ;;  %v1678_v38 = vshrl.u32 %v1611_v20, 16  ;;  %v1684_v39 = vshll.u32 %v4335_v22, 16 }
 0x1a5   : > { %v1667_v35 = vrot.slane %v1665_v23, 4  ;;  %3342 = vmatprep.mubr.msk.bf16.mxu0 %vm1085_vm12, %v3028_v0  ;;  %v1689_v40 = vshrl.u32 %v1613_v28, 16  ;;  %v1692_v44 = vshll.u32 %v1613_v28, 16  ;;  %v1874_v4 = vrot.slane %v1611_v20, 5  ;;  %v2163_v23 = vld [vmem:[#allocation2 + $0x18] sm:$0xf] }
 0x1a6   : > { %3289 = vmatpush3.bf16.msra.mxu1 %v3561_v1  ;;  %v1656_v1 = vrot.slane %v1654_v54, 4  ;;  %v1653_v54 = vsel %vm4200_vm11, %v4338_v59, %v4312_v12  ;;  %v1680_v55 = vrot.slane %v1678_v38, 4  ;;  %v1686_v60 = vrot.slane %v1684_v39, 5  ;;  %v4388_v59 = vld [vmem:[#allocation2 + $0x1c] sm:$0xf] }
 0x1a7   : > { %3290 = vmatprep.subr.bf16.mxu1 %v3565_v14  ;;  %v1691_v57 = vrot.slane %v1689_v40, 4  ;;  %v1694_v61 = vrot.slane %v1692_v44, 5  ;;  %v1876_v48 = vrot.slane %v1874_v4, 4  ;;  %v3027_v52 = vrot.slane %v1845_v15, 9  ;;  %v4390_v0 = vld [vmem:[#allocation2 + $0x20] sm:$0x1] }
 0x1a8   : > { %v1657_v9 = vor.u32 %v1656_v1, %v4312_v12  ;;  %v1681_v1 = vor.u32 %v1680_v55, %v4348_v37  ;;  %v1884_v43 = vrot.slane %v1615_v56, 5  ;;  %v2179_v27 = vshll.u32 %v2163_v23, 16  ;;  %v3583_v28 = vld [vmem:[#allocation6 + $0xd0] sm:$0xff]   ;;  %v4399_v40 = vld [vmem:[#allocation2 + $0x28] sm:$0xf] }
 0x1a9   : > { %3283 = vmatmul.mubr.msk.bf16.gmra.mxu1 %vm1085_vm12, %v2975_v11  ;;  %v1869_v11 = vrot.slane %v1867_v8, 4  ;;  %v1695_v12 = vor.u32 %v1694_v61, %v1691_v57  ;;  %v2209_v55 = vshll.u32 %v4399_v40, 16 }
 0x1aa   : > { %3291 = vmatpush3.bf16.msra.mxu1 %v3565_v14  ;;  %3294 = vmatprep.mubr.msk.bf16.mxu1 %vm1085_vm12, %v2988_v18  ;;  %v1870_v14 = vrot.slane %v1609_v42, 5  ;;  %v1639_v18 = vsel %vm4200_vm11, %v1634_v13, %v1638_v62  ;;  %v4345_v30 = vrot.slane %v1657_v9, 4  ;;  %v1671_v42 = vor.u32 %v1670_v36, %v1667_v35  ;;  %v2166_v35 = vld [vmem:[#allocation2 + $0x24] sm:$0xf] }
 0x1ab   : > { %3292 = vmatprep.subr.bf16.mxu1 %v3567_v29  ;;  %v3012_v53 = vcombine.low %v1629_v51, %v1639_v18  ;;  %v1682_v8 = vrot.slane %v1681_v1, 4  ;;  %v1696_v51 = vrot.slane %v1695_v12, 4  ;;  %v2181_v39 = vrot.slane %v2179_v27, 5 }
 0x1ac   : > { %v1871_v63 = vsel %vm4260_vm15, %v1869_v11, %v1870_v14  ;;  %v1672_v62 = vrot.slane %v1671_v42, 4  ;;  %v4401_v42 = vld [vmem:[#allocation2 + $0x2c] sm:$0x1] }
 0x1ad   : > { %v3029_v31 = vcombine.low %v1868_v10, %v1871_v63  ;;  %v1687_v11 = vsel %vm4200_vm11, %v1682_v8, %v1686_v60  ;;  %v2176_v63 = vshrl.u32 %v2163_v23, 16  ;;  %v2219_v60 = vshll.u32 %v4401_v42, 16  ;;  %v4428_v23 = vld [vmem:[#allocation2 + $0x44] sm:$0x1] }
 0x1ae   : > { %3293 = vmatpush3.bf16.msra.mxu1 %v3567_v29  ;;  %v4342_v29 = vld [vmem:[#allocation2 + $0x34] sm:$0xf]  ;;  %v1677_v10 = vsel %vm4200_vm11, %v1672_v62, %v4348_v37 }
 0x1af   : > { %3318 = vmatprep.subr.bf16.mxu1 %v3569_v49  ;;  %3343 = vmatmul.mubr.msk.bf16.vlgmr.msra.gmra.mxu0 %vm1085_vm12, %v3029_v31  ;;  %v1698_v45 = vshll.u32 %v4342_v29, 16  ;;  %v1702_v47 = vshrl.u32 %v4342_v29, 16  ;;  %v1881_v32 = vrot.slane %v4342_v29, 5  ;;  %v3014_v25 = vcombine.low %v1677_v10, %v1687_v11  ;;  %v2172_v10 = vld [vmem:[#allocation2 + $0x3c] sm:$0xf] }
 0x1b0   : > { %3367 = vmatpush3.bf16.msra.mxu0 %v3582_v6  ;;  %v1708_v6 = vshll.u32 %v1615_v56, 16  ;;  %v2189_v31 = vshrl.u32 %v4388_v59, 16  ;;  %v2178_v38 = vrot.slane %v2176_v63, 4  ;;  %v2213_v56 = vshrl.u32 %v4399_v40, 16 }
 0x1b1   : > { %3295 = vmatmul.mubr.msk.bf16.vlgmr.msra.gmra.mxu1 %vm1085_vm12, %v2989_v3  ;;  %3368 = vmatprep.subr.bf16.mxu0 %v3584_v34  ;;  %v4358_v41 = vrot.slane %v1698_v45, 5  ;;  %v1704_v13 = vrot.slane %v1702_v47, 4  ;;  %v1882_v20 = vsel %vm4260_vm15, %v3027_v52, %v1881_v32  ;;  %v2221_v12 = vrot.slane %v2219_v60, 5 }
 0x1b2   : > { %3319 = vmatpush3.bf16.msra.mxu1 %v3569_v49  ;;  %3298 = vmatprep.mubr.msk.bf16.mxu1 %vm1085_vm12, %v2990_v21  ;;  %v1844_v49 = vld [vmem:[#allocation2 + $0x24] sm:$0xe]  ;;  %v1877_v21 = vrot.slane %v4335_v22, 5  ;;  %v1710_v18 = vrot.slane %v1708_v6, 5  ;;  %v1883_v22 = vrot.slane %v1881_v32, 4  ;;  %v2191_v45 = vrot.slane %v2189_v31, 4 }
 0x1b3   : > { %3320 = vmatprep.subr.bf16.mxu1 %v3573_v46  ;;  %v3026_v3 = vrot.slane %v1844_v49, 9  ;;  %v1705_v5 = vor.u32 %v1704_v13, %v4358_v41  ;;  %v2200_v49 = vshrl.u32 %v2166_v35, 16  ;;  %v2211_v13 = vrot.slane %v2209_v55, 5 }
 0x1b4   : > { %3369 = vmatpush3.bf16.msra.mxu0 %v3584_v34  ;;  %v1878_v14 = vsel %vm4260_vm15, %v1876_v48, %v1877_v21  ;;  %v1885_v29 = vsel %vm4260_vm15, %v1883_v22, %v1884_v43  ;;  %v2195_v34 = vshll.u32 %v4390_v0, 16  ;;  %v2215_v62 = vrot.slane %v2213_v56, 4  ;;  %v4415_v48 = vld [vmem:[#allocation2 + $0x38] sm:$0x1] }
 0x1b5   : > { %v1875_v9 = vsel %vm4260_vm15, %v3026_v3, %v1874_v4  ;;  %3370 = vmatprep.subr.bf16.mxu0 %v3586_v16  ;;  %v1706_v17 = vrot.slane %v1705_v5, 4  ;;  %v3031_v37 = vcombine.low %v1882_v20, %v1885_v29  ;;  %v2202_v15 = vrot.slane %v2200_v49, 4  ;;  %v3587_v3 = vld [vmem:[#allocation6 + $0xc0] sm:$0xff]   ;;  %v3589_v4 = vld [vmem:[#allocation2 + $0x18] sm:$0xff]  }
 0x1b6   : > { %3321 = vmatpush3.bf16.msra.mxu1 %v3573_v46  ;;  %v1663_v46 = vsel %vm4200_vm11, %v4345_v30, %v4322_v58  ;;  %v3030_v58 = vcombine.low %v1875_v9, %v1878_v14  ;;  %v2185_v30 = vshll.u32 %v4388_v59, 16  ;;  %v2197_v47 = vrot.slane %v2195_v34, 5  ;;  %v4413_v9 = vld [vmem:[#allocation2 + $0x34] sm:$0xf] }
 0x1b7   : > { %3322 = vmatprep.subr.bf16.mxu1 %v3575_v26  ;;  %v3013_v19 = vcombine.low %v1653_v54, %v1663_v46  ;;  %v1711_v36 = vsel %vm4200_vm11, %v1706_v17, %v1710_v18  ;;  %v2203_v54 = vshll.u32 %v2166_v35, 16  ;;  %v2216_v21 = vor.u32 %v2215_v62, %v2211_v13  ;;  %v2401_v35 = vld [vmem:[#allocation2 + $0x18] sm:$0xe]  ;;  %v3595_v62 = vld [vmem:[#allocation6 + $0x108] sm:$0xff]  }
 0x1b8   : > { %3371 = vmatpush3.bf16.msra.mxu0 %v3586_v16  ;;  %3346 = vmatprep.mubr.msk.bf16.mxu0 %vm1085_vm12, %v3030_v58  ;;  %v2187_v44 = vrot.slane %v2185_v30, 5  ;;  %v2237_v17 = vshrl.u32 %v4413_v9, 16  ;;  %v2243_v18 = vshll.u32 %v4415_v48, 16  ;;  %v4421_v58 = vld [vmem:[#allocation2 + $0x40] sm:$0xf]  ;;  %v2251_v30 = vshll.u32 %v2172_v10, 16 }
 0x1b9   : > { %3299 = vmatmul.mubr.msk.bf16.gmra.mxu1 %vm1085_vm12, %v2991_v24  ;;  %v3588_v24 = vld [vmem:[#allocation6 + $0xe0] sm:$0xff]   ;;  %3347 = vmatmul.mubr.msk.bf16.gmra.mxu0 %vm1085_vm12, %v3031_v37  ;;  %v2217_v43 = vrot.slane %v2216_v21, 4  ;;  %v2257_v31 = vshll.u32 %v4421_v58, 16  ;;  %v2261_v34 = vshrl.u32 %v4421_v58, 16  ;;  %v2403_v21 = vld [vmem:[#allocation2 + $0x30] sm:$0xe] }
 0x1ba   : > { %3323 = vmatpush3.bf16.msra.mxu1 %v3575_v26  ;;  %3326 = vmatprep.mubr.msk.bf16.mxu1 %vm1085_vm12, %v3012_v53  ;;  %v1701_v26 = vsel %vm4200_vm11, %v1696_v51, %v4358_v41  ;;  %v2182_v53 = vor.u32 %v2181_v39, %v2178_v38  ;;  %v2192_v57 = vor.u32 %v2191_v45, %v2187_v44  ;;  %v2205_v41 = vrot.slane %v2203_v54, 5  ;;  %v3593_v45 = vld [vmem:[#allocation2 + $0x30] sm:$0xff]   ;;  %v3592_v54 = vld [vmem:[#allocation6 + $0x110] sm:$0xff]  }
 0x1bb   : > { %3324 = vmatprep.subr.bf16.mxu1 %v3579_v50  ;;  %3372 = vmatprep.subr.bf16.mxu0 %v3588_v24  ;;  %v3015_v1 = vcombine.low %v1701_v26, %v1711_v36  ;;  %v2222_v20 = vsel %vm4200_vm11, %v2217_v43, %v2221_v12  ;;  %v3591_v26 = vld [vmem:[#allocation6 + $0x118] sm:$0xff]   ;;  %v2245_v39 = vrot.slane %v2243_v18, 5  ;;  %v2259_v49 = vrot.slane %v2257_v31, 5  ;;  %v2404_v18 = vld [vmem:[#allocation2 + $0x3c] sm:$0xe] }
 0x1bc   : > { %3373 = vmatpush3.bf16.msra.mxu0 %v3588_v24  ;;  %v2183_v61 = vrot.slane %v2182_v53, 4  ;;  %v2193_v16 = vrot.slane %v2192_v57, 4  ;;  %v2206_v6 = vor.u32 %v2205_v41, %v2202_v15  ;;  %v2233_v24 = vshll.u32 %v4413_v9, 16  ;;  %v3590_v36 = vld [vmem:[#allocation2 + $0x24] sm:$0xff]  }
 0x1bd   : > { %v2419_v53 = vrot.slane %v4388_v59, 5  ;;  %v3064_v57 = vrot.slane %v2401_v35, 9  ;;  %v2422_v15 = vrot.slane %v4390_v0, 5  ;;  %v2426_v59 = vrot.slane %v4399_v40, 5 }
 0x1be   : > { %3325 = vmatpush3.bf16.msra.mxu1 %v3579_v50  ;;  %v3585_v50 = vld [vmem:[#allocation6 + $0xc8] sm:$0xff]   ;;  %v2188_v5 = vsel %vm4200_vm11, %v2183_v61, %v2187_v44  ;;  %v2198_v8 = vsel %vm4200_vm11, %v2193_v16, %v2197_v47  ;;  %v2207_v32 = vrot.slane %v2206_v6, 4  ;;  %v2235_v22 = vrot.slane %v2233_v24, 5  ;;  %v3596_v24 = vld [vmem:[#allocation6 + $0x100] sm:$0xff]  }
 0x1bf   : > { %3350 = vmatprep.subr.bf16.mxu1 %v3581_v7  ;;  %v3052_v51 = vcombine.low %v2188_v5, %v2198_v8  ;;  %v2267_v44 = vshll.u32 %v4428_v23, 16  ;;  %v2253_v47 = vrot.slane %v2251_v30, 5  ;;  %v2420_v0 = vsel %vm4260_vm15, %v3064_v57, %v2419_v53  ;;  %v2402_v5 = vld [vmem:[#allocation2 + $0x24] sm:$0xe]  ;;  %v3594_v8 = vld [vmem:[#allocation2 + $0x3c] sm:$0xff]  }
 0x1c0   : > { %v2429_v43 = vrot.slane %v4401_v42, 5  ;;  %v2436_v33 = vrot.slane %v4415_v48, 5  ;;  %v2440_v42 = vrot.slane %v4421_v58, 5 }
 0x1c1   : > { %3327 = vmatmul.mubr.msk.bf16.vlgmr.msra.gmra.mxu1 %vm1085_vm12, %v3013_v19  ;;  %v2212_v19 = vsel %vm4200_vm11, %v2207_v32, %v2211_v13  ;;  %3374 = vmatprep.mubr.msk.bf16.mxu0 %vm1085_vm12, %v3052_v51  ;;  %v2269_v41 = vrot.slane %v2267_v44, 5  ;;  %v2421_v13 = vrot.slane %v2419_v53, 4  ;;  %v3065_v51 = vrot.slane %v2402_v5, 9 }
 0x1c2   : > { %3351 = vmatpush3.bf16.msra.mxu1 %v3581_v7  ;;  %3330 = vmatprep.mubr.msk.bf16.mxu1 %vm1085_vm12, %v3014_v25  ;;  %v2169_v7 = vld [vmem:[#allocation2 + $0x30] sm:$0xf]  ;;  %v2248_v25 = vshrl.u32 %v2172_v10, 16  ;;  %v3053_v63 = vcombine.low %v2212_v19, %v2222_v20  ;;  %v2428_v32 = vrot.slane %v2426_v59, 4  ;;  %v3066_v10 = vrot.slane %v2403_v21, 9 }
 0x1c3   : > { %3352 = vmatprep.subr.bf16.mxu1 %v3583_v28  ;;  %v2224_v52 = vshrl.u32 %v2169_v7, 16  ;;  %v2227_v46 = vshll.u32 %v2169_v7, 16  ;;  %v2423_v12 = vsel %vm4260_vm15, %v2421_v13, %v2422_v15  ;;  %v2433_v7 = vrot.slane %v4413_v9, 5 }
 0x1c4   : > { %v2250_v29 = vrot.slane %v2248_v25, 4  ;;  %3375 = vmatmul.mubr.msk.bf16.vlgmr.msra.gmra.mxu0 %vm1085_vm12, %v3053_v63  ;;  %v2427_v9 = vsel %vm4260_vm15, %v3065_v51, %v2426_v59  ;;  %v2442_v25 = vrot.slane %v2440_v42, 4 }
 0x1c5   : > { %v2226_v11 = vrot.slane %v2224_v52, 4  ;;  %v2229_v14 = vrot.slane %v2227_v46, 5  ;;  %v3068_v46 = vcombine.low %v2420_v0, %v2423_v12 }
 0x1c6   : > { %3353 = vmatpush3.bf16.msra.mxu1 %v3583_v28  ;;  %v2239_v28 = vrot.slane %v2237_v17, 4  ;;  %v2254_v60 = vor.u32 %v2253_v47, %v2250_v29  ;;  %v2434_v17 = vsel %vm4260_vm15, %v3066_v10, %v2433_v7  ;;  %v3600_v29 = vld [vmem:[%s4678_s25] sm:$0xff]  }
 0x1c7   : > { %3354 = vmatprep.subr.bf16.mxu1 %v3585_v50  ;;  %v2230_v27 = vor.u32 %v2229_v14, %v2226_v11  ;;  %v2435_v11 = vrot.slane %v2433_v7, 4  ;;  %v2430_v14 = vsel %vm4260_vm15, %v2428_v32, %v2429_v43 }
 0x1c8   : > { %v2240_v38 = vor.u32 %v2239_v28, %v2235_v22  ;;  %v3069_v19 = vcombine.low %v2427_v9, %v2430_v14  ;;  %v3597_v28 = vld [vmem:[%s4678_s25 + $0x18] sm:$0xff]  }
 0x1c9   : > { %3331 = vmatmul.mubr.msk.bf16.gmra.mxu1 %vm1085_vm12, %v3015_v1  ;;  %v2231_v37 = vrot.slane %v2230_v27, 4  ;;  %v2437_v48 = vsel %vm4260_vm15, %v2435_v11, %v2436_v33  ;;  %3398 = vmatprep.subr.bf16.mxu0 %v3597_v28 }
 0x1ca   : > { %3355 = vmatpush3.bf16.msra.mxu1 %v3585_v50  ;;  %3358 = vmatprep.mubr.msk.bf16.mxu1 %vm1085_vm12, %v3589_v4  ;;  %v2263_v50 = vrot.slane %v2261_v34, 4  ;;  %v2241_v56 = vrot.slane %v2240_v38, 4  ;;  %v2255_v4 = vrot.slane %v2254_v60, 4  ;;  %v3070_v20 = vcombine.low %v2434_v17, %v2437_v48 }
 0x1cb   : > { %3356 = vmatprep.subr.bf16.mxu1 %v3587_v3  ;;  %v2236_v55 = vsel %vm4200_vm11, %v2231_v37, %v2235_v22  ;;  %v3067_v22 = vrot.slane %v2404_v18, 9  ;;  %3399 = vmatpush3.bf16.msra.mxu0 %v3597_v28 }
 0x1cc   : > { %v2264_v61 = vor.u32 %v2263_v50, %v2259_v49  ;;  %v2246_v1 = vsel %vm4200_vm11, %v2241_v56, %v2245_v39  ;;  %v2260_v6 = vsel %vm4200_vm11, %v2255_v4, %v2259_v49 }
 0x1cd   : > { %v2441_v58 = vsel %vm4260_vm15, %v3067_v22, %v2440_v42 }
 0x1ce   : > { %3357 = vmatpush3.bf16.msra.mxu1 %v3587_v3  ;;  %v3054_v3 = vcombine.low %v2236_v55, %v2246_v1  ;;  %v2265_v16 = vrot.slane %v2264_v61, 4 }
 0x1cf   : > { %3382 = vmatprep.subr.bf16.mxu1 %v3591_v26 }
 0x1d0   : > { %3378 = vmatprep.mubr.msk.bf16.mxu0 %vm1085_vm12, %v3054_v3  ;;  %v2270_v40 = vsel %vm4200_vm11, %v2265_v16, %v2269_v41 }
 0x1d1   : > { %3359 = vmatmul.mubr.msk.bf16.vlgmr.msra.gmra.mxu1 %vm1085_vm12, %v3590_v36  ;;  %v3055_v52 = vcombine.low %v2260_v6, %v2270_v40 }
 0x1d2   : > { %3383 = vmatpush3.bf16.msra.mxu1 %v3591_v26  ;;  %3362 = vmatprep.mubr.msk.bf16.mxu1 %vm1085_vm12, %v3593_v45  ;;  %v2443_v26 = vrot.slane %v4428_v23, 5  ;;  %v3598_v23 = vld [vmem:[%s4678_s25 + $0x10] sm:$0xff]  }
 0x1d3   : > { %3384 = vmatprep.subr.bf16.mxu1 %v3592_v54  ;;  %3379 = vmatmul.mubr.msk.bf16.gmra.mxu0 %vm1085_vm12, %v3055_v52 }
 0x1d4   : > { %v2444_v63 = vsel %vm4260_vm15, %v2442_v25, %v2443_v26  ;;  %3400 = vmatprep.subr.bf16.mxu0 %v3598_v23 }
 0x1d5   : > { %v3071_v27 = vcombine.low %v2441_v58, %v2444_v63  ;;  %3401 = vmatpush3.bf16.msra.mxu0 %v3598_v23 }
 0x1d6   : > { %3385 = vmatpush3.bf16.msra.mxu1 %v3592_v54  ;;  %3402 = vmatprep.subr.bf16.mxu0 %v3599_v2 }
 0x1d7   : > { %3386 = vmatprep.subr.bf16.mxu1 %v3595_v62 }
 0x1d9   : > { %3363 = vmatmul.mubr.msk.bf16.gmra.mxu1 %vm1085_vm12, %v3594_v8  ;;  %3403 = vmatpush3.bf16.msra.mxu0 %v3599_v2 }
 0x1da   : > { %3387 = vmatpush3.bf16.msra.mxu1 %v3595_v62  ;;  %3390 = vmatprep.mubr.msk.bf16.mxu1 %vm1085_vm12, %v3068_v46 }
 0x1db   : > { %3388 = vmatprep.subr.bf16.mxu1 %v3596_v24  ;;  %3404 = vmatprep.subr.bf16.mxu0 %v3600_v29 }
 0x1dd   : > { %3405 = vmatpush3.bf16.msra.mxu0 %v3600_v29 }
 0x1de   : > { %3389 = vmatpush3.bf16.msra.mxu1 %v3596_v24 }
 0x1e1   : > { %3391 = vmatmul.mubr.msk.bf16.vlgmr.msra.gmra.mxu1 %vm1085_vm12, %v3069_v19 }
 0x1e2   : > { %3394 = vmatprep.mubr.msk.bf16.mxu1 %vm1085_vm12, %v3070_v20 }
 0x1e9   : > { %3395 = vmatmul.mubr.msk.bf16.gmra.mxu1 %vm1085_vm12, %v3071_v27 }
 0x24f   : > { %v3264_v30 = vpop.f32.mrf.mxu1 }
 0x251   : > { %v1132_v31 = vpop.f32.mrf.mxu1 }
 0x253   : > { %v3265_v34 = vpop.f32.mrf.mxu1 }
 0x255   : > { %v1135_v35 = vpop.f32.mrf.mxu1  ;;  %v3312_v39 = vpop.f32.mrf.mxu0 }
 0x257   : > { %v1565_v45 = vpop.f32.mrf.mxu0 }
 0x259   : > { %v3268_v36 = vpop.f32.mrf.mxu1  ;;  %v3313_v49 = vpop.f32.mrf.mxu0 }
 0x25b   : > { %v1148_v37 = vpop.f32.mrf.mxu1  ;;  %v1568_v53 = vpop.f32.mrf.mxu0 }
 0x25d   : > { %v4488_v38 = vpop.f32.mrf.mxu1  ;;  %v4492_v55 = vpop.f32.mrf.mxu0 }
 0x25f   : > { %v4490_v44 = vpop.f32.mrf.mxu1  ;;  %v4494_v57 = vpop.f32.mrf.mxu0 }
 0x261   : > { %v3280_v47 = vpop.f32.mrf.mxu1  ;;  %v4496_v61 = vpop.f32.mrf.mxu0 }
 0x262   : > { %v1262_v14 = vadd.f32 %v3280_v47, %v3264_v30 }
 0x263   : > { %v1253_v50 = vpop.f32.mrf.mxu1  ;;  %v4498_v62 = vpop.f32.mrf.mxu0 }
 0x264   : > { %v1254_v48 = vadd.f32 %v1253_v50, %v1132_v31 }
 0x265   : > { %v3281_v54 = vpop.f32.mrf.mxu1 }
 0x266   : > { %v1265_v20 = vadd.f32 %v3281_v54, %v3265_v34 }
 0x267   : > { %v1256_v56 = vpop.f32.mrf.mxu1 }
 0x268   : > { %v1257_v58 = vadd.f32 %v1256_v56, %v1135_v35 }
 0x269   : > { %v3284_v15 = vpop.f32.mrf.mxu1 }
 0x26a   : > { %v1278_v23 = vadd.f32 %v3284_v15, %v3268_v36 }
 0x26b   : > { %v1269_v60 = vpop.f32.mrf.mxu1 }
 0x26d   : > { %v3285_v41 = vpop.f32.mrf.mxu1 }
 0x26e   : > { %v1281_v35 = vadd.f32 %v3285_v41, %v4488_v38 }
 0x26f   : > { %v1272_v13 = vpop.f32.mrf.mxu1  ;;  %v3344_v3 = vpop.f32.mrf.mxu0 }
 0x271   : > { %v3296_v1 = vpop.f32.mrf.mxu1  ;;  %v1977_v0 = vpop.f32.mrf.mxu0 }
 0x272   : > { %v1451_v18 = vadd.f32 %v3296_v1, %v1262_v14 }
 0x273   : > { %v1418_v59 = vpop.f32.mrf.mxu1  ;;  %v3345_v6 = vpop.f32.mrf.mxu0 }
 0x274   : > { %v1449_v22 = vadd.f32 %v1418_v59, %v1254_v48  ;;  %v1598_v63 = vadd.f32 %v3312_v39, %v1451_v18  ;;  %v1273_v39 = vadd.f32 %v1272_v13, %v4490_v44 }
 0x275   : > { %v3297_v4 = vpop.f32.mrf.mxu1  ;;  %v1980_v7 = vpop.f32.mrf.mxu0 }
 0x276   : > { %v1452_v27 = vadd.f32 %v3297_v4, %v1265_v20  ;;  %v1596_v2 = vadd.f32 %v1565_v45, %v1449_v22 }
 0x277   : > { %v1421_v16 = vpop.f32.mrf.mxu1 }
 0x278   : > { %v1450_v29 = vadd.f32 %v1421_v16, %v1257_v58  ;;  %v1599_v47 = vadd.f32 %v3313_v49, %v1452_v27 }
 0x279   : > { %v3300_v12 = vpop.f32.mrf.mxu1  ;;  %v4500_v46 = vpop.f32.mrf.mxu0 }
 0x27a   : > { %4679 = vst [vmem:[#allocation18_spill] sm:$0xff] %v4500_v46  ;;  %v1455_v46 = vadd.f32 %v3300_v12, %v1278_v23  ;;  %v1597_v34 = vadd.f32 %v1568_v53, %v1450_v29 }
 0x27b   : > { %v1434_v5 = vpop.f32.mrf.mxu1  ;;  %v4502_v32 = vpop.f32.mrf.mxu0 }
 0x27c   : > { %4680 = vst [vmem:[#allocation19_spill] sm:$0xff] %v4502_v32  ;;  %v1270_v32 = vadd.f32 %v1269_v60, %v1148_v37  ;;  %v1602_v45 = vadd.f32 %v4492_v55, %v1455_v46 }
 0x27d   : > { %v3301_v40 = vpop.f32.mrf.mxu1  ;;  %v4504_v24 = vpop.f32.mrf.mxu0 }
 0x27e   : > { %4681 = vst [vmem:[#allocation20_spill] sm:$0xff] %v4504_v24  ;;  %v1453_v50 = vadd.f32 %v1434_v5, %v1270_v32  ;;  %v1456_v60 = vadd.f32 %v3301_v40, %v1281_v35 }
 0x27f   : > { %v1437_v21 = vpop.f32.mrf.mxu1  ;;  %v4506_v11 = vpop.f32.mrf.mxu0 }
 0x280   : > { %4682 = vst [vmem:[#allocation21_spill] sm:$0xff] %v4506_v11  ;;  %v1600_v49 = vadd.f32 %v4494_v57, %v1453_v50  ;;  %v1454_v4 = vadd.f32 %v1437_v21, %v1273_v39  ;;  %v1603_v13 = vadd.f32 %v4496_v61, %v1456_v60  ;;  %v3080_v57 = vld [vmem:[%s4683_s21] ss:$0 sm:$0xff] }
 0x281   : > { %v3328_v8 = vpop.f32.mrf.mxu1  ;;  %v4684_v40 = vld [vmem:[#allocation18_spill] sm:$0xff] }
 0x282   : > { %v1836_v11 = vadd.f32 %v3328_v8, %v1598_v63  ;;  %v1601_v55 = vadd.f32 %v4498_v62, %v1454_v4 }
 0x283   : > { %v1803_v52 = vpop.f32.mrf.mxu1 }
 0x284   : > { %v3376_v42 = vpop.f32.mrf.mxu0  ;;  %v1834_v31 = vadd.f32 %v1803_v52, %v1596_v2  ;;  %v2010_v54 = vadd.f32 %v3344_v3, %v1836_v11 }
 0x285   : > { %v3329_v51 = vpop.f32.mrf.mxu1  ;;  %v4687_v63 = vld [vmem:[#allocation20_spill] sm:$0xff] }
 0x286   : > { %v2362_v25 = vpop.f32.mrf.mxu0  ;;  %v1837_v59 = vadd.f32 %v3329_v51, %v1599_v47  ;;  %v2008_v56 = vadd.f32 %v1977_v0, %v1834_v31 }
 0x287   : > { %v1806_v43 = vpop.f32.mrf.mxu1  ;;  %v4688_v27 = vld [vmem:[#allocation21_spill] sm:$0xff] }
 0x288   : > { %v3377_v24 = vpop.f32.mrf.mxu0  ;;  %v1835_v15 = vadd.f32 %v1806_v43, %v1597_v34  ;;  %v2011_v12 = vadd.f32 %v3345_v6, %v1837_v59 }
 0x289   : > { %v3332_v10 = vpop.f32.mrf.mxu1 }
 0x28a   : > { %v2365_v14 = vpop.f32.mrf.mxu0  ;;  %v1840_v53 = vadd.f32 %v3332_v10, %v1602_v45  ;;  %v2009_v38 = vadd.f32 %v1980_v7, %v1835_v15  ;;  %v4685_v10 = vld [vmem:[#allocation19_spill] sm:$0xff] }
 0x28b   : > { %v1819_v33 = vpop.f32.mrf.mxu1 }
 0x28c   : > { %v1838_v8 = vadd.f32 %v1819_v33, %v1600_v49  ;;  %v2014_v21 = vadd.f32 %v4684_v40, %v1840_v53 }
 0x28d   : > { %v3333_v9 = vpop.f32.mrf.mxu1 }
 0x28e   : > { %v1841_v43 = vadd.f32 %v3333_v9, %v1603_v13  ;;  %v2012_v7 = vadd.f32 %v4685_v10, %v1838_v8 }
 0x28f   : > { %v1822_v17 = vpop.f32.mrf.mxu1 }
 0x290   : > { %v1839_v11 = vadd.f32 %v1822_v17, %v1601_v55  ;;  %v2015_v9 = vadd.f32 %v4687_v63, %v1841_v43  ;;  %v3091_v43 = vld [vmem:[%s4689_s8] ss:$0 sm:$0xff]  ;;  %s3787_s8 = smov [#allocation8]  }
 0x291   : > { %v3360_v19 = vpop.f32.mrf.mxu1  ;;  %s3659_s3 = sshll.u32 %s3787_s8, 4  ;;  %s3660_s3 = int_to_ptr.vmem [resolvable:$false] %s3659_s3 }
 0x292   : > { %v2157_v37 = vadd.f32 %v3360_v19, %v2010_v54  ;;  %v3081_v19 = vld [vmem:[%s4686_s16] ss:$0 sm:$0xff]  ;;  %s3112_s16 = sshll.u32 %s2810_s11, 10  ;;  %s3661_s21 = scalar_lea.vmem %s3660_s3, 2048 }
 0x293   : > { %v2124_v26 = vpop.f32.mrf.mxu1  ;;  %v3380_v5 = vpop.f32.mrf.mxu0  ;;  %p3662_p6 = scmp.lt.s32.totalorder %s4552_s28, %s3660_s3  ;;  %p3663_p8 = scmp.lt.s32.totalorder %s3661_s21, %s3655_s6 }
 0x294   : > { %v2155_v3 = vadd.f32 %v2124_v26, %v2008_v56  ;;  %v2395_v41 = vadd.f32 %v3376_v42, %v2157_v37 }
 0x295   : > { %v3361_v28 = vpop.f32.mrf.mxu1  ;;  %v2378_v51 = vpop.f32.mrf.mxu0  ;;  %p3664_p7 = por %p3663_p8, %p3662_p6 }
 0x296   : > { %v2158_v44 = vadd.f32 %v3361_v28, %v2011_v12  ;;  %v2393_v6 = vadd.f32 %v2362_v25, %v2155_v3  ;;  %v2013_v28 = vadd.f32 %v4688_v27, %v1839_v11  ;;  %v3114_v11 = vld [vmem:[%s2730_s9] sm:$0xff]  }
 0x297   : > { %v2127_v30 = vpop.f32.mrf.mxu1  ;;  %v3381_v25 = vpop.f32.mrf.mxu0  ;;  %p3665_p9 = pnand %p3664_p7, %p3658_p5 }
 0x298   : > { %v2156_v46 = vadd.f32 %v2127_v30, %v2009_v38  ;;  %v2396_v42 = vadd.f32 %v3377_v24, %v2158_v44 }
 0x299   : > { %v3364_v1 = vpop.f32.mrf.mxu1 }
 0x29a   : > { %v2161_v61 = vadd.f32 %v3364_v1, %v2014_v21  ;;  %v2394_v22 = vadd.f32 %v2365_v14, %v2156_v46  ;;  %v2381_v1 = vpop.f32.mrf.mxu0 }
 0x29b   : > { %v2140_v36 = vpop.f32.mrf.mxu1 }
 0x29c   : > { %v2159_v18 = vadd.f32 %v2140_v36, %v2012_v7  ;;  %v2399_v23 = vadd.f32 %v3380_v5, %v2161_v61  ;;  %v3092_v7 = vld [vmem:[%s4690_s12] ss:$0 sm:$0xff] }
 0x29d   : > { %v3365_v16 = vpop.f32.mrf.mxu1 }
 0x29e   : > { %v2162_v30 = vadd.f32 %v3365_v16, %v2015_v9  ;;  %v2397_v47 = vadd.f32 %v2378_v51, %v2159_v18  ;;  %v3116_v9 = vunpack.c.h.bf16 %v3114_v11 }
 0x29f   : > { %v2143_v52 = vpop.f32.mrf.mxu1 }
 0x2a0   : > { %v2160_v31 = vadd.f32 %v2143_v52, %v2013_v28  ;;  %v2400_v15 = vadd.f32 %v3381_v25, %v2162_v30 }
 0x2a1   : > { %v3392_v0 = vpop.f32.mrf.mxu1 }
 0x2a2   : > { %v2569_v32 = vadd.f32 %v3392_v0, %v2395_v41  ;;  %v2398_v37 = vadd.f32 %v2381_v1, %v2160_v31 }
 0x2a3   : > { %v2536_v33 = vpop.f32.mrf.mxu1 }
 0x2a4   : > { %v2584_v48 = vmul.f32 %v3080_v57, %v2569_v32  ;;  %v2567_v62 = vadd.f32 %v2536_v33, %v2393_v6 }
 0x2a5   : > { %v3393_v20 = vpop.f32.mrf.mxu1 }
 0x2a6   : > { %v2582_v26 = vmul.f32 %v3080_v57, %v2567_v62  ;;  %v2570_v58 = vadd.f32 %v3393_v20, %v2396_v42  ;;  %v2599_v24 = vadd.f32 %v3081_v19, %v2584_v48  ;;  %v3115_v62 = vunpack.c.l.bf16 %v3114_v11 }
 0x2a7   : > { %v2539_v17 = vpop.f32.mrf.mxu1 }
 0x2a8   : > { %v2585_v2 = vmul.f32 %v3080_v57, %v2570_v58  ;;  %v2568_v29 = vadd.f32 %v2539_v17, %v2394_v22  ;;  %v2597_v34 = vadd.f32 %v3081_v19, %v2582_v26  ;;  %v2607_v39 = vmax.f32 %v2599_v24, 0.0  ;;  %v3131_v58 = vld [vmem:[%s2730_s9 + $0x18] sm:$0xff]   ;;  %v3130_v24 = vld [vmem:[%s2730_s9 + $0x10] sm:$0xff]  }
 0x2a9   : > { %v3396_v50 = vpop.f32.mrf.mxu1 }
 0x2aa   : > { %v2600_v54 = vadd.f32 %v3081_v19, %v2585_v2  ;;  %v2583_v59 = vmul.f32 %v3080_v57, %v2568_v29  ;;  %v2573_v14 = vadd.f32 %v3396_v50, %v2399_v23  ;;  %v2605_v4 = vmax.f32 %v2597_v34, 0.0 }
 0x2ab   : > { %v2552_v35 = vpop.f32.mrf.mxu1  ;;  %v3127_v29 = vunpack.c.l.bf16 %v3131_v58  ;;  %v3123_v34 = vunpack.c.l.bf16 %v3130_v24 }
 0x2ac   : > { %v2608_v36 = vmax.f32 %v2600_v54, 0.0  ;;  %v2598_v45 = vadd.f32 %v3081_v19, %v2583_v59  ;;  %v2571_v56 = vadd.f32 %v2552_v35, %v2397_v47  ;;  %v2588_v60 = vmul.f32 %v3080_v57, %v2573_v14 }
 0x2ad   : > { %v3397_v49 = vpop.f32.mrf.mxu1 }
 0x2ae   : > { %v2614_v12 = vpack.c.bf16 %v2608_v36, %v2607_v39  ;;  %v2606_v16 = vmax.f32 %v2598_v45, 0.0  ;;  %v2586_v53 = vmul.f32 %v3080_v57, %v2571_v56  ;;  %v2574_v3 = vadd.f32 %v3397_v49, %v2400_v15 }
 0x2af   : > { %v2555_v5 = vpop.f32.mrf.mxu1  ;;  %v2603_v38 = vadd.f32 %v3081_v19, %v2588_v60  ;;  %v3128_v36 = vunpack.c.h.bf16 %v3131_v58  ;;  %v3124_v49 = vunpack.c.h.bf16 %v3130_v24 }
 0x2b0   : > { %v2613_v8 = vpack.c.bf16 %v2606_v16, %v2605_v4  ;;  %v2572_v52 = vadd.f32 %v2555_v5, %v2398_v37  ;;  %v2589_v41 = vmul.f32 %v3080_v57, %v2574_v3  ;;  %v2601_v44 = vadd.f32 %v3081_v19, %v2586_v53 }
 0x2b1   : > { %v2611_v40 = vmax.f32 %v2603_v38, 0.0 }
 0x2b2   : > { %v2587_v13 = vmul.f32 %v3080_v57, %v2572_v52  ;;  %3406 = vmatprep.mubr.msk.bf16.mxu0 %vm1085_vm12, %v2613_v8  ;;  %v2604_v55 = vadd.f32 %v3081_v19, %v2589_v41  ;;  %v2609_v6 = vmax.f32 %v2601_v44, 0.0  ;;  %v3129_v57 = vld [vmem:[%s2730_s9 + $0x8] sm:$0xff]   ;;  %s4550_s9 = scalar_lea.hbm %s4693_s10, %s3112_s16 }
 0x2b3   : > { %3407 = vmatmul.mubr.msk.bf16.vlgmr.msra.gmra.mxu0 %vm1085_vm12, %v2614_v12  ;;  %v3119_v33 = vunpack.c.l.bf16 %v3129_v57  ;;  %v3120_v25 = vunpack.c.h.bf16 %v3129_v57 }
 0x2b4   : > { %v2602_v0 = vadd.f32 %v3081_v19, %v2587_v13  ;;  %v2612_v21 = vmax.f32 %v2604_v55, 0.0 }
 0x2b6   : > { %v2610_v46 = vmax.f32 %v2602_v0, 0.0  ;;  %v2616_v51 = vpack.c.bf16 %v2612_v21, %v2611_v40 }
 0x2b8   : > { %v2615_v32 = vpack.c.bf16 %v2610_v46, %v2609_v6 }
 0x2ba   : > { %3410 = vmatprep.mubr.msk.bf16.mxu0 %vm1085_vm12, %v2615_v32 }
 0x2bb   : > { %3411 = vmatmul.mubr.msk.bf16.gmra.mxu0 %vm1085_vm12, %v2616_v51 }
 0x373   : > { %v3408_v10 = vpop.f32.mrf.mxu0 }
 0x374   : > { %v2748_v42 = vmul.f32 %v3408_v10, %v3091_v43 }
 0x375   : > { %v2695_v61 = vpop.f32.mrf.mxu0 }
 0x376   : > { %v2763_v48 = vadd.f32 %v3092_v7, %v2748_v42  ;;  %v2746_v18 = vmul.f32 %v3091_v43, %v2695_v61 }
 0x377   : > { %v3409_v19 = vpop.f32.mrf.mxu0 }
 0x378   : > { %v2779_v20 = vadd.f32 %v3119_v33, %v2763_v48  ;;  %v2761_v22 = vadd.f32 %v3092_v7, %v2746_v18  ;;  %v2749_v26 = vmul.f32 %v3409_v19, %v3091_v43 }
 0x379   : > { %v2698_v63 = vpop.f32.mrf.mxu0 }
 0x37a   : > { %v2787_v27 = vmax.f32 %v2779_v20, 0.0  ;;  %v2777_v28 = vadd.f32 %v3115_v62, %v2761_v22  ;;  %v2764_v17 = vadd.f32 %v3092_v7, %v2749_v26  ;;  %v2747_v23 = vmul.f32 %v3091_v43, %v2698_v63 }
 0x37b   : > { %v3412_v2 = vpop.f32.mrf.mxu0 }
 0x37c   : > { %2795 = vst [vmem:[%s4167_s20 + $0x10] sm:$0xff] %v2787_v27  ;;  %v2785_v30 = vmax.f32 %v2777_v28, 0.0  ;;  %v2780_v47 = vadd.f32 %v3120_v25, %v2764_v17  ;;  %v2762_v31 = vadd.f32 %v3092_v7, %v2747_v23  ;;  %v2752_v50 = vmul.f32 %v3412_v2, %v3091_v43 }
 0x37d   : > { %v2711_v1 = vpop.f32.mrf.mxu0 }
 0x37e   : > { %2793 = vst [vmem:[%s4167_s20] sm:$0xff] %v2785_v30  ;;  %v2788_v54 = vmax.f32 %v2780_v47, 0.0  ;;  %v2778_v59 = vadd.f32 %v3116_v9, %v2762_v31  ;;  %v2767_v14 = vadd.f32 %v3092_v7, %v2752_v50  ;;  %v2750_v35 = vmul.f32 %v3091_v43, %v2711_v1 }
 0x37f   : > { %v3413_v39 = vpop.f32.mrf.mxu0 }
 0x380   : > { %2796 = vst [vmem:[%s4167_s20 + $0x18] sm:$0xff] %v2788_v54  ;;  %v2786_v45 = vmax.f32 %v2778_v59, 0.0  ;;  %v2783_v56 = vadd.f32 %v3127_v29, %v2767_v14  ;;  %v2765_v15 = vadd.f32 %v3092_v7, %v2750_v35  ;;  %v2753_v37 = vmul.f32 %v3413_v39, %v3091_v43 }
 0x381   : > { %v2714_v60 = vpop.f32.mrf.mxu0 }
 0x382   : > { %2794 = vst [vmem:[%s4167_s20 + $0x8] sm:$0xff] %v2786_v45  ;;  %v2791_v4 = vmax.f32 %v2783_v56, 0.0  ;;  %v2781_v12 = vadd.f32 %v3123_v34, %v2765_v15  ;;  %v2768_v16 = vadd.f32 %v3092_v7, %v2753_v37  ;;  %v2751_v53 = vmul.f32 %v3091_v43, %v2714_v60 }
 0x384   : > { %2799 = vst [vmem:[%s4167_s20 + $0x30] sm:$0xff] %v2791_v4  ;;  %v2789_v3 = vmax.f32 %v2781_v12, 0.0  ;;  %v2784_v5 = vadd.f32 %v3128_v36, %v2768_v16  ;;  %v2766_v8 = vadd.f32 %v3092_v7, %v2751_v53 }
 0x386   : > { %2797 = vst [vmem:[%s4167_s20 + $0x20] sm:$0xff] %v2789_v3  ;;  %v2792_v52 = vmax.f32 %v2784_v5, 0.0  ;;  %v2782_v38 = vadd.f32 %v3124_v49, %v2766_v8 }
 0x388   : > { %2800 = vst [vmem:[%s4167_s20 + $0x38] sm:$0xff] %v2792_v52  ;;  %v2790_v41 = vmax.f32 %v2782_v38, 0.0 }
 0x38a   : > { %2798 = vst [vmem:[%s4167_s20 + $0x28] sm:$0xff] %v2790_v41 }
 0x38b   : > { %3668 = shalt.err (!%p3665_p9)
}
 0x38c   : > { %s3669_s5 = scalar_lea.hbm %s4550_s9, 1024  ;;  %s3673_s27 = scalar_lea.hbm %s4693_s10, 8192 }
 0x38d   : > { %p3670_p10 = scmp.ne.s32.totalorder %s4550_s9, %s3669_s5  ;;  %p3674_p0 = scmp.lt.s32.totalorder %s4550_s9, %s4693_s10 }
 0x38e   : > { %p3675_p1 = scmp.lt.s32.totalorder %s3673_s27, %s3669_s5 }
 0x38f   : > { %p3671_p12 = pnand %p3670_p10, %p4694_p2 }
 0x390   : > { %p3676_p3 = por %p3675_p1, %p3674_p0 }
 0x391   : > { %p3672_p13 = pneg %p3671_p12 }
 0x393   : > { %p3677_p11 = pnand %p3676_p3, %p3672_p13 }
 0x395   : > { %3680 = shalt.err (!%p3677_p11)
}
 0x396   : > { %s3788_s16 = smov 128   ;;  %s3789_s4 = smov 8  }
 0x397   : > { %3422 = dma.vmem_to_hbm [thread:$0]  (%p4694_p2), %s4552_s28, 1024, %s4550_s9, %s4558_s26, %s3788_s16, %s3788_s16, %s3789_s4  }
 0x398 PF: > { %s4695_s19 = sld [smem:[#allocation12_spill]]  ;;  %p3439_p4 = scmp.ge.s32.totalorder %s3779_s23, 2 }
 0x399   : > { %s4696_s6 = sld [smem:[#allocation16_spill]] }
 0x39e   : > { %s2832_s8 = sand.u32 1, %s4695_s19  }
 0x39f   : > { %p4697_p5 = scmp.ne.s32.totalorder %s4696_s6, 0  ;;  %s2833_s3 = scalar_lea.sflag [#allocation5], %s2832_s8 }
 0x3a1   : > { %p3433_p6 = pnand %p3439_p4, %p4697_p5 }
 0x3a3   : > { %p3434_p8 = pneg %p3433_p6 }
 0x3a5   : > { %3734 = dma.done.wait (%p3434_p8), %s2833_s3, 1024  }
 0x3a6   : > { %3736 = vsyncadd (%p3434_p8), %s2833_s3, 4294966272  ;;  %s27_s23 = sadd.s32 1, %s3779_s23   ;;  %s4698_s21 = smov %s3981_s13 }
 0x3a7   : > { %p24_p7 = scmp.ge.s32.totalorder %s27_s23, 10   ;;  %s4699_s19 = sld [smem:[#allocation14_spill]] }
 0x3a8   : > { %s4700_s7 = sld [smem:[#allocation17_spill]]  ;;  %s4701_s13 = smov %s3743_s14 }
 0x3a9   : > { %s4702_s14 = smov %s3747_s15  ;;  %s4703_s15 = smov %s4698_s21 }
 0x3aa   : > { %s4704_s16 = smov %s3755_s17  ;;  %s4705_s17 = smov %s3759_s18 }
 0x3ab   : > { %s4706_s18 = smov %s3965_s29  ;;  %s4707_s20 = smov %s3775_s22 }
 0x3ac   : > { %s4708_s21 = smov %s4711_s30  ;;  %26 = sbr.rel (!%p24_p7) target bundleno = 19 (0x13), region = 130 }
 0x3ae   : > { %s4709_s22 = smov %s4700_s7 }
 0x3b1   :  { %2838 = vsyncpa [#allocation4], 1 }
 0x3b2   :  { %2840 = vsyncpa [#allocation4 + $0x1], 1 }
 0x3b3   :  { %2841 = vsyncpa [#allocation7], 1 }
 0x3b4   :  { %2842 = vsyncpa [#allocation5], 1 }
 0x3b5   :  { %2844 = vsyncpa [#allocation5 + $0x1], 1 }

// kernel: tpu_custom_call.1
= control target key start
LH: loop header
LB: loop body
LE: loop exit
PB: predicated region body
PF: predicated region fallthrough
CT: control target
= control target key end

     0   :  { %s4618_s0 = inlined_call_operand.hbm [shape: bf16[576,128], index: 0, kind: input, shape index: {}]   ;;  %s4619_s1 = inlined_call_operand.vmem [shape: bf16[128,64], index: 1, kind: input, shape index: {}]   ;;  %s4620_s2 = inlined_call_operand.vmem [shape: f32[1,64], index: 2, kind: input, shape index: {}]   ;;  %s4621_s3 = inlined_call_operand.vmem [shape: f32[1,64], index: 3, kind: input, shape index: {}]   ;;  %s4622_s4 = inlined_call_operand.hbm [shape: bf16[9,64,64], index: 4, kind: input, shape index: {}]   ;;  %s4623_s5 = inlined_call_operand.vmem [shape: f32[1,64], index: 5, kind: input, shape index: {}]   ;;  %s4624_s6 = inlined_call_operand.vmem [shape: f32[1,64], index: 6, kind: input, shape index: {}]   ;;  %s4625_s7 = inlined_call_operand.vmem [shape: bf16[64,128], index: 7, kind: input, shape index: {}]   ;;  %s4626_s8 = inlined_call_operand.vmem [shape: f32[1,128], index: 8, kind: input, shape index: {}]   ;;  %s4627_s9 = inlined_call_operand.vmem [shape: f32[1,128], index: 9, kind: input, shape index: {}]   ;;  %s4628_s10 = inlined_call_operand.hbm [shape: f32[512,128], index: 10, kind: output, shape index: {}]  }
   0x1   :  { %4640 = sst [smem:[#allocation22_spill]] %s4621_s3 }
   0x2   :  { %4641 = sst [smem:[#allocation23_spill]] %s4622_s4 }
   0x3   :  { %4642 = sst [smem:[#allocation24_spill]] %s4623_s5 }
   0x4   :  { %4643 = sst [smem:[#allocation25_spill]] %s4624_s6 }
   0x5   :  { %4644 = sst [smem:[#allocation26_spill]] %s4625_s7 }
   0x6   :  { %4645 = sst [smem:[#allocation27_spill]] %s4626_s8 }
   0x7   :  { %4646 = sst [smem:[#allocation28_spill]] %s4627_s9 }
   0x8   :  { %4647 = sst [smem:[#allocation29_spill]] %s4628_s10 }
   0x9   :  { %15 = vsyncpa [#allocation4], 0 }
   0xa   :  { %17 = vsyncpa [#allocation4 + $0x1], 0 }
   0xb   :  { %18 = vsyncpa [#allocation7], 0 }
   0xc   :  { %19 = vsyncpa [#allocation5], 0 }
   0xd   :  { %21 = vsyncpa [#allocation5 + $0x1], 0  ;;  %s3845_s13 = smov 0   ;;  %s3847_s14 = smov 0  }
   0xe   :  { %s3849_s15 = smov 0   ;;  %s3851_s16 = smov 0  }
   0xf   :  { %s3853_s17 = smov 0   ;;  %s3855_s18 = smov 0  }
  0x10   :  { %s3857_s19 = smov 0   ;;  %s3859_s20 = smov 0  }
  0x11   :  { %s3861_s21 = smov 0   ;;  %s3863_s22 = smov 0  }
  0x12   :  { %s3865_s23 = smov 0  }
  0x13 LB: > { %4648 = sst [smem:[#allocation12_spill]] %s3739_s13  ;;  %s2917_s24 = sadd.s32 4294967295, %s3779_s23   ;;  %s3779_s23 = sphi %s3865_s23, %s27_s23   ;;  %s3775_s22 = sphi %s3863_s22, %s4709_s22   ;;  %s3771_s21 = sphi %s3861_s21, %s4708_s21   ;;  %s3767_s20 = sphi %s3859_s20, %s4707_s20   ;;  %s3763_s19 = sphi %s3857_s19, %s4699_s19   ;;  %s3759_s18 = sphi %s3855_s18, %s4706_s18   ;;  %s3755_s17 = sphi %s3853_s17, %s4705_s17   ;;  %s3751_s16 = sphi %s3851_s16, %s4704_s16   ;;  %s3747_s15 = sphi %s3849_s15, %s4703_s15   ;;  %s3743_s14 = sphi %s3847_s14, %s4702_s14   ;;  %s3739_s13 = sphi %s3845_s13, %s4701_s13  }
  0x14   : > { %4649 = sst [smem:[#allocation13_spill]] %s3767_s20  ;;  %s2918_s25 = sadd.s32 4294967294, %s3779_s23  }
  0x15   : > { %4650 = sst [smem:[#allocation14_spill]] %s3771_s21  ;;  %p59_p0 = scmp.ne.s32.totalorder %s3755_s17, %s3751_s16 }
  0x16   : > { %p3901_p1 = scmp.eq.s32.totalorder %s2917_s24, 0  ;;  %p275_p2 = scmp.ne.s32.totalorder %s3747_s15, %s3743_s14 }
  0x17   : > { %p276_p4 = scmp.eq.s32.totalorder %s2917_s24, 7  ;;  %p281_p5 = scmp.ne.s32.totalorder %s3743_s14, %s3739_s13 }
  0x18   : > { %p3910_p3 = por %p3901_p1, %p59_p0  ;;  %p282_p6 = scmp.eq.s32.totalorder %s2918_s25, 7 }
  0x19   : > { %p3916_p7 = por %p276_p4, %p275_p2  ;;  %p2921_p8 = scmp.ge.s32.totalorder %s3779_s23, 1 }
  0x1a   : > { %p3921_p9 = por %p282_p6, %p281_p5  ;;  %p289_p10 = scmp.lt.s32.totalorder %s3779_s23, 9 }
  0x1b   : > { %s4653_s29 = scalar_select %p3916_p7, 1, 0 }
  0x1c   : > { %s4655_s30 = scalar_select %p3921_p9, 1, 0 }
  0x1d   : > { %4654 = sst [smem:[#allocation15_spill]] %s4653_s29  ;;  %p3926_p11 = pnand %p2921_p8, %p289_p10 }
  0x1e   : > { %4656 = sst [smem:[#allocation16_spill]] %s4655_s30  ;;  %s3781_s12 = smov [#allocation6]  }
  0x1f   : > { %s310_s16 = sshll.u32 %s3781_s12, 4  ;;  %p3424_p12 = pneg %p3926_p11  ;;  %s311_s16 = int_to_ptr.vmem [resolvable:$true] %s310_s16 }
  0x20   : > { %s3612_s24 = scalar_lea.vmem %s311_s16, 4608  ;;  %p3620_p6 = scmp.lt.s32.totalorder %s311_s16, %s311_s16 }
  0x21   : > { %p3425_p13 = pnand %p3424_p12, %p3901_p1  ;;  %p3613_p2 = scmp.ne.s32.totalorder %s311_s16, %s3612_s24 }
  0x22   : > { %p3621_p9 = scmp.lt.s32.totalorder %s3612_s24, %s3612_s24 }
  0x23   : > { %p3603_p0 = pneg %p3425_p13 }
  0x24   : > { %p3622_p7 = por %p3621_p9, %p3620_p6 }
  0x25   : > { %p3615_p4 = pnand %p3613_p2, %p3603_p0 }
  0x27   : > { %p3616_p5 = pneg %p3615_p4 }
  0x29   : > { %p3623_p8 = pnand %p3622_p7, %p3616_p5 }
  0x2b   : > { %3626 = shalt.err (!%p3623_p8)
}
  0x2c   : > { %s4635_s25 = smov 64   ;;  %s4636_s12 = smov 4  }
  0x2d   : > { %s4658_s4 = sld [smem:[#allocation23_spill]]  ;;  %s36_s30 = sadd.s32 1, %s3771_s21 }
  0x2e   : > { %p37_p7 = scmp.ge.s32.totalorder %s36_s30, 4  ;;  %s39_s13 = sadd.s32 1, %s3775_s22 }
  0x2f   : > { %s46_s10 = sadd.s32 1, %s3759_s18  ;;  %p53_p9 = scmp.ne.s32.totalorder %s3759_s18, %s3755_s17 }
  0x30   : > { %s4711_s30 = smov (%p37_p7, %s36_s30), 0  ;;  %s4713_s13 = smov (!%p37_p7, %s39_s13), %s3775_s22 }
  0x31   : > { %p54_p10 = scmp.eq.s32.totalorder %s3779_s23, 0  ;;  %s2919_s29 = sshll.u32 %s3775_s22, 2 }
  0x32   : > { %p41_p12 = scmp.ge.s32.totalorder %s4713_s13, 2  ;;  %s259_s20 = sadd.s32 %s3771_s21, %s2919_s29 }
  0x33   : > { %3427 = dma.hbm_to_vmem [thread:$0]  (!%p3425_p13), %s4658_s4, 4608, %s311_s16, [#allocation7], %s4635_s25, %s4635_s25, %s4636_s12  }
  0x34   : > { %p3951_p13 = por %p54_p10, %p53_p9  ;;  %p3437_p0 = scmp.lt.s32.totalorder %s3779_s23, 8 }
  0x35   : > { %s4715_s13 = smov (%p41_p12, %s4713_s13), 0  ;;  %s339_s16 = sand.u32 1, %s3759_s18  }
  0x36   : > { %4660 = sst [smem:[#allocation17_spill]] %s4715_s13  ;;  %s3099_s24 = smul.u32 2304, %s3775_s22 }
  0x37   : > { %s43_s25 = ssub.s32 %s3775_s22, %s4715_s13  ;;  %s2920_s12 = sshll.u32 %s4715_s13, 2 }
  0x38   : > { %p44_p2 = scmp.eq.s32.totalorder %s43_s25, 0  ;;  %s261_s4 = sadd.s32 %s2920_s12, %s4711_s30 }
  0x39   : > { %s262_s9 = ssub.s32 %s259_s20, %s261_s4  ;;  %s3414_s21 = smul.u32 144, %s339_s16 }
  0x3a   : > { %s3965_s29 = scalar_select %p44_p2, %s3759_s18, %s46_s10  }
  0x3b   : > { %p263_p4 = scmp.eq.s32.totalorder %s262_s9, 0  ;;  %s349_s5 = scalar_lea.hbm %s4618_s0, %s3099_s24 }
  0x3c   : > { %p3974_p5 = pnand %p3437_p0, %p3951_p13  ;;  %s4662_s3 = sadd.s32 1, %s3747_s15 }
  0x3d   : > { %s3981_s13 = scalar_select %p263_p4, %s3747_s15, %s4662_s3  }
  0x3e   : > { %s343_s25 = scalar_lea.vmem [#allocation3], %s3414_s21  ;;  %s340_s10 = scalar_lea.sflag [#allocation4], %s339_s16 }
  0x3f   : > { %s350_s4 = sshll.u32 %s343_s25, 4  ;;  %p3629_p6 = pneg %p3974_p5  ;;  %s351_s4 = int_to_ptr.vmem [resolvable:$true] %s350_s4 }
  0x40   : > { %s3640_s9 = scalar_lea.vmem %s351_s4, 2304  ;;  %s3784_s6 = smov [#allocation3]  }
  0x41   : > { %p3641_p8 = scmp.ne.s32.totalorder %s351_s4, %s3640_s9  ;;  %s3645_s8 = sshll.u32 %s3784_s6, 4  ;;  %s3646_s8 = int_to_ptr.vmem [resolvable:$false] %s3645_s8 }
  0x42   : > { %s3647_s20 = scalar_lea.vmem %s3646_s8, 4608  ;;  %p3648_p10 = scmp.lt.s32.totalorder %s351_s4, %s3646_s8 }
  0x43   : > { %p3643_p7 = pnand %p3641_p8, %p3629_p6  ;;  %p3649_p12 = scmp.lt.s32.totalorder %s3647_s20, %s3640_s9 }
  0x45   : > { %p3644_p9 = pneg %p3643_p7  ;;  %p3650_p13 = por %p3649_p12, %p3648_p10 }
  0x47   : > { %p3651_p0 = pnand %p3650_p13, %p3644_p9 }
  0x49   : > { %3654 = shalt.err (!%p3651_p0)
}
  0x4a   : > { %s4663_s3 = smov 4   ;;  %s4664_s21 = smov 64  }
  0x4b   : > { %3431 = dma.hbm_to_vmem [thread:$0]  (!%p3974_p5), %s349_s5, 2304, %s351_s4, %s340_s10, %s4664_s21, %s4664_s21, %s4663_s3  }
  0x4c   : > { %362 = sbr.rel (%p3926_p11) target bundleno = 920 (0x398), region = 60 }
  0x51   : > { %s364_s12 = sand.u32 1, %s3755_s17  }
  0x52   : > { %s3993_s27 = smul.u32 144, %s364_s12  ;;  %s365_s16 = scalar_lea.sflag [#allocation4], %s364_s12 }
  0x54   : > { %s368_s24 = scalar_lea.vmem [#allocation3], %s3993_s27 }
  0x55   : > { %3726 = dma.done.wait (%p3910_p3), %s365_s16, 2304  }
  0x56   : > { %3728 = vsyncadd (%p3910_p3), %s365_s16, 4294964992 }
  0x57   : > { %3730 = dma.done.wait (%p3901_p1), [#allocation7], 4608  }
  0x58   : > { %3732 = vsyncadd (%p3901_p1), [#allocation7], 4294962688  ;;  %s406_s5 = sand.u32 1, %s3743_s14   ;;  %s2928_s11 = sshll.u32 %s3763_s19, 6  ;;  %v3535_v0 = vld [vmem:[%s4619_s1 + $0x38] sm:$0xff]   ;;  %v3536_v1 = vld [vmem:[%s4619_s1 + $0x30] sm:$0xff]  }
  0x59   : > { %s4007_s7 = sshll.u32 %s406_s5, 6  ;;  %s415_s25 = sshra.s32 %s2928_s11, 3  ;;  %3226 = vmatprep.subr.bf16.mxu0 %v3535_v0  ;;  %v3537_v2 = vld [vmem:[%s4619_s1 + $0x28] sm:$0xff]   ;;  %v3538_v3 = vld [vmem:[%s4619_s1 + $0x20] sm:$0xff]   ;;  %v3539_v5 = vld [vmem:[%s4619_s1 + $0x18] sm:$0xff]   ;;  %vm821_vm1 = vcmask 519168  }
  0x5a   : > { %s2929_s26 = sshll.u32 %s415_s25, 2  ;;  %3227 = vmatpush3.bf16.msra.mxu0 %v3535_v0  ;;  %v3540_v6 = vld [vmem:[%s4619_s1 + $0x10] sm:$0xff]   ;;  %v3541_v7 = vld [vmem:[%s4619_s1 + $0x8] sm:$0xff]   ;;  %v3542_v8 = vld [vmem:[%s4619_s1] sm:$0xff]   ;;  %s4665_s12 = sld [smem:[#allocation22_spill]]  ;;  %vm829_vm3 = vcmask 516096  }
  0x5b   : > { %3228 = vmatprep.subr.bf16.mxu0 %v3536_v1  ;;  %s418_s20 = scalar_lea.vmem %s368_s24, %s2929_s26 [#allocation3]  ;;  %v4041_v14 = vld [vmem:[%s4620_s2] ss:$0 sm:$0xff]  ;;  %vm698_vm0 = vsmask.f32 256  ;;  %vm822_vm2 = vsmask.f32 7938 }
  0x5c   : > { %v3543_v4 = vld [vmem:[%s418_s20] sm:$0xff]   ;;  %v3544_v9 = vld [vmem:[%s418_s20 + $0x8] sm:$0xff]   ;;  %v3545_v10 = vld [vmem:[%s418_s20 + $0x10] sm:$0xff]   ;;  %vm699_vm4 = vsmask.f32 4368  ;;  %p2958_p1 = scmp.ne.s32.totalorder %s3763_s19, 0 }
  0x5d   : > { %3242 = vmatprep.mubr.bf16.mxu0 %v3543_v4  ;;  %v3546_v11 = vld [vmem:[%s418_s20 + $0x18] sm:$0xff]   ;;  %v3547_v12 = vld [vmem:[%s418_s20 + $0x20] sm:$0xff]   ;;  %v3548_v13 = vld [vmem:[%s418_s20 + $0x28] sm:$0xff]   ;;  %s4167_s20 = scalar_lea.vmem [#allocation8], %s4007_s7 }
  0x5e   : > { %3229 = vmatpush3.bf16.msra.mxu0 %v3536_v1  ;;  %vm4059_vm5 = vmand %vm821_vm1, %vm822_vm2  ;;  %v834_v42 = vld [vmem:[#allocation2 + $0xc] sm:$0xf]  ;;  %v824_v52 = vld [vmem:[#allocation2] sm:$0xf] }
  0x5f   : > { %3230 = vmatprep.subr.bf16.mxu0 %v3537_v2  ;;  %vm4068_vm6 = vmand %vm829_vm3, %vm698_vm0  ;;  %v838_v0 = vld [vmem:[#allocation2 + $0x14] sm:$0x1] }
  0x60   : > { %v4046_v16 = vld [vmem:[%s4665_s12] ss:$0 sm:$0xff]  ;;  %vm4076_vm7 = vmor %vm698_vm0, %vm699_vm4 }
  0x61   : > { %vm4108_vm8 = vmand %vm829_vm3, %vm822_vm2 }
  0x62   : > { %3231 = vmatpush3.bf16.msra.mxu0 %v3537_v2 }
  0x63   : > { %3232 = vmatprep.subr.bf16.mxu0 %v3538_v3 }
  0x66   : > { %3233 = vmatpush3.bf16.msra.mxu0 %v3538_v3 }
  0x67   : > { %3234 = vmatprep.subr.bf16.mxu0 %v3539_v5 }
  0x6a   : > { %3235 = vmatpush3.bf16.msra.mxu0 %v3539_v5 }
  0x6b   : > { %3236 = vmatprep.subr.bf16.mxu0 %v3540_v6 }
  0x6e   : > { %3237 = vmatpush3.bf16.msra.mxu0 %v3540_v6 }
  0x6f   : > { %3238 = vmatprep.subr.bf16.mxu0 %v3541_v7 }
  0x72   : > { %3239 = vmatpush3.bf16.msra.mxu0 %v3541_v7 }
  0x73   : > { %3240 = vmatprep.subr.bf16.mxu0 %v3542_v8 }
  0x76   : > { %3241 = vmatpush3.bf16.msra.mxu0 %v3542_v8 }
  0x79   : > { %3243 = vmatmul.mubr.bf16.vlgmr.msra.gmra.mxu0 %v3544_v9 }
  0x7a   : > { %3246 = vmatprep.mubr.bf16.mxu0 %v3545_v10 }
  0x81   : > { %3247 = vmatmul.mubr.bf16.gmra.mxu0 %v3546_v11 }
  0x82   : > { %3250 = vmatprep.mubr.bf16.mxu0 %v3547_v12 }
  0x89   : > { %3251 = vmatmul.mubr.bf16.gmra.mxu0 %v3548_v13 }
 0x139   : > { %v3244_v15 = vpop.f32.mrf.mxu0 }
 0x13a   : > { %v621_v17 = vmul.f32 %v3244_v15, %v4041_v14 }
 0x13b   : > { %v565_v18 = vpop.f32.mrf.mxu0 }
 0x13c   : > { %v640_v19 = vadd.f32 %v4046_v16, %v621_v17  ;;  %v619_v20 = vmul.f32 %v4041_v14, %v565_v18 }
 0x13d   : > { %v3245_v21 = vpop.f32.mrf.mxu0 }
 0x13e   : > { %v652_v22 = vmax.f32 %v640_v19, 0.0  ;;  %v638_v23 = vadd.f32 %v4046_v16, %v619_v20  ;;  %v622_v24 = vmul.f32 %v3245_v21, %v4041_v14  ;;  %v831_v19 = vld [vmem:[#allocation2 + $0x8] sm:$0x1] }
 0x13f   : > { %v568_v25 = vpop.f32.mrf.mxu0 }
 0x140   : > { %v3102_v26 = vpack.c.bf16 %v652_v22, %v652_v22  ;;  %v650_v27 = vmax.f32 %v638_v23, 0.0  ;;  %v641_v28 = vadd.f32 %v4046_v16, %v622_v24  ;;  %v620_v29 = vmul.f32 %v4041_v14, %v568_v25 }
 0x141   : > { %v3248_v30 = vpop.f32.mrf.mxu0 }
 0x142   : > { %v719_v31 = vshrl.u32 %v3102_v26, 16  ;;  %v3100_v32 = vpack.c.bf16 %v650_v27, %v650_v27  ;;  %v653_v33 = vmax.f32 %v641_v28, 0.0  ;;  %v639_v34 = vadd.f32 %v4046_v16, %v620_v29  ;;  %v848_v27 = vld [vmem:[#allocation2 + $0x24] sm:$0xf] }
 0x143   : > { %v625_v35 = vmul.f32 %v3248_v30, %v4041_v14  ;;  %v581_v36 = vpop.f32.mrf.mxu0  ;;  %v722_v38 = vshll.u32 %v3102_v26, 16 }
 0x144   : > { %v721_v37 = vrot.slane %v719_v31, 7  ;;  %v702_v39 = vshrl.u32 %v3100_v32, 16  ;;  %v3103_v40 = vpack.c.bf16 %v653_v33, %v653_v33  ;;  %v705_v43 = vshll.u32 %v3100_v32, 16 }
 0x145   : > { %v651_v44 = vmax.f32 %v639_v34, 0.0  ;;  %v644_v45 = vadd.f32 %v4046_v16, %v625_v35  ;;  %v623_v46 = vmul.f32 %v4041_v14, %v581_v36  ;;  %v3249_v47 = vpop.f32.mrf.mxu0 }
 0x146   : > { %v724_v48 = vor.u32 %v722_v38, %v721_v37  ;;  %v725_v49 = vrot.slane %v721_v37, 4  ;;  %v704_v50 = vrot.slane %v702_v39, 7  ;;  %v727_v51 = vshrl.u32 %v3103_v40, 16 }
 0x147   : > { %v730_v53 = vshll.u32 %v3103_v40, 16  ;;  %v3101_v54 = vpack.c.bf16 %v651_v44, %v651_v44  ;;  %v656_v55 = vmax.f32 %v644_v45, 0.0  ;;  %v642_v56 = vadd.f32 %v4046_v16, %v623_v46  ;;  %v584_v57 = vpop.f32.mrf.mxu0  ;;  %v841_v44 = vld [vmem:[#allocation2 + $0x18] sm:$0xf] }
 0x148   : > { %v835_v59 = vsel %vm4059_vm5, %v724_v48, %v834_v42  ;;  %v707_v60 = vor.u32 %v705_v43, %v704_v50  ;;  %v708_v61 = vrot.slane %v704_v50, 4  ;;  %v729_v62 = vrot.slane %v727_v51, 7 }
 0x149   : > { %836 = vst [vmem:[#allocation2 + $0xc] sm:$0xf] %v835_v59  ;;  %v710_v1 = vshrl.u32 %v3101_v54, 16  ;;  %v713_v2 = vshll.u32 %v3101_v54, 16  ;;  %v3106_v3 = vpack.c.bf16 %v656_v55, %v656_v55  ;;  %v654_v4 = vmax.f32 %v642_v56, 0.0  ;;  %v3252_v5 = vpop.f32.mrf.mxu0 }
 0x14a   : > { %v825_v6 = vsel %vm4059_vm5, %v707_v60, %v824_v52  ;;  %v732_v7 = vor.u32 %v730_v53, %v729_v62  ;;  %v734_v8 = vrot.slane %v729_v62, 4  ;;  %v626_v9 = vmul.f32 %v3249_v47, %v4041_v14 }
 0x14b   : > { %826 = vst [vmem:[#allocation2] sm:$0xf] %v825_v6  ;;  %v712_v10 = vrot.slane %v710_v1, 7  ;;  %v753_v11 = vshrl.u32 %v3106_v3, 16  ;;  %v756_v12 = vshll.u32 %v3106_v3, 16  ;;  %v3104_v13 = vpack.c.bf16 %v654_v4, %v654_v4  ;;  %v597_v15 = vpop.f32.mrf.mxu0 }
 0x14c   : > { %v733_v17 = vsel %vm4076_vm7, %v725_v49, %v732_v7  ;;  %v839_v18 = vsel %vm4068_vm6, %v734_v8, %v838_v0  ;;  %v645_v20 = vadd.f32 %v4046_v16, %v626_v9  ;;  %v624_v21 = vmul.f32 %v4041_v14, %v584_v57 }
 0x14d   : > { %837 = vst.msk [vmem:[#allocation2 + $0x10] sm:$0xf] %vm821_vm1, %v733_v17  ;;  %840 = vst [vmem:[#allocation2 + $0x14] sm:$0x1] %v839_v18  ;;  %v715_v22 = vor.u32 %v713_v2, %v712_v10  ;;  %v717_v23 = vrot.slane %v712_v10, 4  ;;  %v755_v24 = vrot.slane %v753_v11, 7  ;;  %v3253_v26 = vpop.f32.mrf.mxu0  ;;  %v629_v31 = vmul.f32 %v3252_v5, %v4041_v14 }
 0x14e   : > { %v736_v25 = vshrl.u32 %v3104_v13, 16  ;;  %v739_v28 = vshll.u32 %v3104_v13, 16  ;;  %v657_v29 = vmax.f32 %v645_v20, 0.0  ;;  %v643_v30 = vadd.f32 %v4046_v16, %v624_v21  ;;  %v852_v2 = vld [vmem:[#allocation2 + $0x2c] sm:$0x1] }
 0x14f   : > { %v716_v32 = vsel %vm4076_vm7, %v708_v61, %v715_v22  ;;  %v832_v33 = vsel %vm4068_vm6, %v717_v23, %v831_v19  ;;  %v758_v34 = vor.u32 %v756_v12, %v755_v24  ;;  %v759_v35 = vrot.slane %v755_v24, 4  ;;  %v600_v47 = vpop.f32.mrf.mxu0  ;;  %v845_v19 = vld [vmem:[#allocation2 + $0x20] sm:$0x1] }
 0x150   : > { %v872_v36 = vld [vmem:[#allocation2 + $0xc] sm:$0x1]  ;;  %828 = vst.msk [vmem:[#allocation2 + $0x4] sm:$0xf] %vm821_vm1, %v716_v32  ;;  %833 = vst [vmem:[#allocation2 + $0x8] sm:$0x1] %v832_v33  ;;  %v3107_v38 = vpack.c.bf16 %v657_v29, %v657_v29  ;;  %v648_v40 = vadd.f32 %v4046_v16, %v629_v31  ;;  %v627_v45 = vmul.f32 %v4041_v14, %v597_v15 }
 0x151   : > { %v4097_v37 = vrot.slane %v736_v25, 7  ;;  %v655_v39 = vmax.f32 %v643_v30, 0.0  ;;  %v873_v42 = vsel %vm4068_vm6, 0, %v872_v36  ;;  %v849_v43 = vsel %vm4059_vm5, %v758_v34, %v848_v27 }
 0x152   : > { %v630_v46 = vmul.f32 %v3253_v26, %v4041_v14  ;;  %874 = vst [vmem:[#allocation2 + $0xc] sm:$0x1] %v873_v42  ;;  %v869_v49 = vld [vmem:[#allocation2] sm:$0x1]  ;;  %850 = vst [vmem:[#allocation2 + $0x24] sm:$0xf] %v849_v43  ;;  %v646_v57 = vadd.f32 %v4046_v16, %v627_v45  ;;  %v628_v0 = vmul.f32 %v4041_v14, %v600_v47 }
 0x153   : > { %v741_v50 = vor.u32 %v739_v28, %v4097_v37  ;;  %v742_v51 = vrot.slane %v4097_v37, 4  ;;  %v761_v52 = vshrl.u32 %v3107_v38, 16  ;;  %v764_v53 = vshll.u32 %v3107_v38, 16  ;;  %v862_v26 = vld [vmem:[#allocation2 + $0x3c] sm:$0xf] }
 0x154   : > { %v870_v54 = vsel %vm4068_vm6, 0, %v869_v49  ;;  %v3105_v55 = vpack.c.bf16 %v655_v39, %v655_v39  ;;  %v660_v56 = vmax.f32 %v648_v40, 0.0  ;;  %v891_v59 = vld [vmem:[#allocation2 + $0x14] sm:$0x1]  ;;  %v649_v62 = vadd.f32 %v4046_v16, %v630_v46  ;;  %v855_v39 = vld [vmem:[#allocation2 + $0x30] sm:$0xf] }
 0x155   : > { %871 = vst [vmem:[#allocation2] sm:$0x1] %v870_v54  ;;  %v842_v60 = vsel %vm4059_vm5, %v741_v50, %v841_v44  ;;  %v763_v61 = vrot.slane %v761_v52, 7  ;;  %v892_v1 = vsel %vm4108_vm8, 0, %v891_v59  ;;  %v658_v8 = vmax.f32 %v646_v57, 0.0 }
 0x156   : > { %843 = vst [vmem:[#allocation2 + $0x18] sm:$0xf] %v842_v60  ;;  %v744_v3 = vshrl.u32 %v3105_v55, 16  ;;  %v747_v4 = vshll.u32 %v3105_v55, 16  ;;  %v3110_v5 = vpack.c.bf16 %v660_v56, %v660_v56  ;;  %893 = vst [vmem:[#allocation2 + $0x14] sm:$0x1] %v892_v1  ;;  %v647_v15 = vadd.f32 %v4046_v16, %v628_v0 }
 0x157   : > { %v766_v6 = vor.u32 %v764_v53, %v763_v61  ;;  %v768_v7 = vrot.slane %v763_v61, 4  ;;  %v661_v9 = vmax.f32 %v649_v62, 0.0  ;;  %v888_v10 = vld [vmem:[#allocation2 + $0x8] sm:$0x1]  ;;  %v3108_v20 = vpack.c.bf16 %v658_v8, %v658_v8  ;;  %v866_v46 = vld [vmem:[#allocation2 + $0x44] sm:$0x1] }
 0x158   : > { %v746_v11 = vrot.slane %v744_v3, 7  ;;  %v787_v12 = vshrl.u32 %v3110_v5, 16  ;;  %v790_v13 = vshll.u32 %v3110_v5, 16  ;;  %v889_v14 = vsel %vm4108_vm8, 0, %v888_v10  ;;  %v859_v56 = vld [vmem:[#allocation2 + $0x38] sm:$0x1] }
 0x159   : > { %v767_v17 = vsel %vm4076_vm7, %v759_v35, %v766_v6  ;;  %v853_v18 = vsel %vm4068_vm6, %v768_v7, %v852_v2  ;;  %890 = vst [vmem:[#allocation2 + $0x8] sm:$0x1] %v889_v14  ;;  %v878_v21 = vld [vmem:[#allocation2 + $0x24] sm:$0x1]  ;;  %v3111_v16 = vpack.c.bf16 %v661_v9, %v661_v9  ;;  %v770_v27 = vshrl.u32 %v3108_v20, 16 }
 0x15a   : > { %851 = vst.msk [vmem:[#allocation2 + $0x28] sm:$0xf] %vm821_vm1, %v767_v17  ;;  %854 = vst [vmem:[#allocation2 + $0x2c] sm:$0x1] %v853_v18  ;;  %v749_v22 = vor.u32 %v747_v4, %v746_v11  ;;  %v751_v23 = vrot.slane %v746_v11, 4  ;;  %v789_v24 = vrot.slane %v787_v12, 7 }
 0x15b   : > { %v879_v25 = vsel %vm4068_vm6, 0, %v878_v21  ;;  %v659_v28 = vmax.f32 %v647_v15, 0.0  ;;  %v772_v33 = vrot.slane %v770_v27, 7  ;;  %v773_v34 = vshll.u32 %v3108_v20, 16 }
 0x15c   : > { %880 = vst [vmem:[#allocation2 + $0x24] sm:$0x1] %v879_v25  ;;  %v750_v29 = vsel %vm4076_vm7, %v742_v51, %v749_v22  ;;  %v846_v30 = vsel %vm4068_vm6, %v751_v23, %v845_v19  ;;  %v792_v31 = vor.u32 %v790_v13, %v789_v24  ;;  %v795_v35 = vshrl.u32 %v3111_v16, 16 }
 0x15d   : > { %v875_v32 = vld [vmem:[#allocation2 + $0x18] sm:$0x1]  ;;  %844 = vst.msk [vmem:[#allocation2 + $0x1c] sm:$0xf] %vm821_vm1, %v750_v29  ;;  %847 = vst [vmem:[#allocation2 + $0x20] sm:$0x1] %v846_v30  ;;  %v3109_v36 = vpack.c.bf16 %v659_v28, %v659_v28  ;;  %v775_v40 = vor.u32 %v773_v34, %v772_v33 }
 0x15e   : > { %v876_v37 = vsel %vm4068_vm6, 0, %v875_v32  ;;  %v863_v38 = vsel %vm4059_vm5, %v792_v31, %v862_v26  ;;  %v797_v42 = vrot.slane %v795_v35, 7  ;;  %v798_v43 = vshll.u32 %v3111_v16, 16 }
 0x15f   : > { %877 = vst [vmem:[#allocation2 + $0x18] sm:$0x1] %v876_v37  ;;  %864 = vst [vmem:[#allocation2 + $0x3c] sm:$0xf] %v863_v38  ;;  %v778_v44 = vshrl.u32 %v3109_v36, 16  ;;  %v793_v45 = vrot.slane %v789_v24, 4  ;;  %v856_v50 = vsel %vm4059_vm5, %v775_v40, %v855_v39 }
 0x160   : > { %v781_v47 = vshll.u32 %v3109_v36, 16  ;;  %v800_v51 = vor.u32 %v798_v43, %v797_v42  ;;  %v802_v52 = vrot.slane %v797_v42, 4  ;;  %v776_v55 = vrot.slane %v772_v33, 4  ;;  %857 = vst [vmem:[#allocation2 + $0x30] sm:$0xf] %v856_v50 }
 0x161   : > { %v897_v49 = vld [vmem:[#allocation2 + $0x2c] sm:$0x1]  ;;  %v780_v53 = vrot.slane %v778_v44, 7 }
 0x162   : > { %v898_v54 = vsel %vm4108_vm8, 0, %v897_v49  ;;  %v801_v57 = vsel %vm4076_vm7, %v793_v45, %v800_v51  ;;  %v867_v59 = vsel %vm4068_vm6, %v802_v52, %v866_v46 }
 0x163   : > { %899 = vst [vmem:[#allocation2 + $0x2c] sm:$0x1] %v898_v54  ;;  %v783_v60 = vor.u32 %v781_v47, %v780_v53  ;;  %v785_v61 = vrot.slane %v780_v53, 4  ;;  %865 = vst.msk [vmem:[#allocation2 + $0x40] sm:$0xf] %vm821_vm1, %v801_v57 }
 0x164   : > { %v894_v41 = vld [vmem:[#allocation2 + $0x20] sm:$0x1]  ;;  %868 = vst [vmem:[#allocation2 + $0x44] sm:$0x1] %v867_v59 }
 0x165   : > { %v895_v62 = vsel %vm4108_vm8, 0, %v894_v41  ;;  %v784_v0 = vsel %vm4076_vm7, %v776_v55, %v783_v60  ;;  %v860_v1 = vsel %vm4068_vm6, %v785_v61, %v859_v56 }
 0x166   : > { %896 = vst [vmem:[#allocation2 + $0x20] sm:$0x1] %v895_v62  ;;  %v884_v2 = vld [vmem:[#allocation2 + $0x3c] sm:$0x1]  ;;  %858 = vst.msk [vmem:[#allocation2 + $0x34] sm:$0xf] %vm821_vm1, %v784_v0 }
 0x167   : > { %861 = vst [vmem:[#allocation2 + $0x38] sm:$0x1] %v860_v1  ;;  %v885_v3 = vsel %vm4068_vm6, 0, %v884_v2  ;;  %v881_v4 = vld [vmem:[#allocation2 + $0x30] sm:$0x1] }
 0x168   : > { %886 = vst [vmem:[#allocation2 + $0x3c] sm:$0x1] %v885_v3  ;;  %v882_v5 = vsel %vm4068_vm6, 0, %v881_v4 }
 0x169   : > { %883 = vst [vmem:[#allocation2 + $0x30] sm:$0x1] %v882_v5 }
 0x16b   : > { %v903_v63 = vld [vmem:[#allocation2 + $0x44] sm:$0x1] }
 0x16c   : > { %v904_v6 = vsel %vm4108_vm8, 0, %v903_v63  ;;  %909 = sbr.rel (%p2958_p1) target bundleno = 372 (0x174), region = 72 }
 0x16d   : > { %905 = vst [vmem:[#allocation2 + $0x44] sm:$0x1] %v904_v6 }
 0x16e   : > { %v900_v7 = vld [vmem:[#allocation2 + $0x38] sm:$0x1] }
 0x16f   : > { %v901_v8 = vsel %vm4108_vm8, 0, %v900_v7 }
 0x170   : > { %902 = vst [vmem:[#allocation2 + $0x38] sm:$0x1] %v901_v8 }
 0x171   : > { %v3785_v9 = vmov 0  }
 0x172   : > { %910 = vst.msk [vmem:[#allocation2] sm:$0xf] %vm821_vm1, %v3785_v9  ;;  %911 = vst.msk [vmem:[#allocation2 + $0x4] sm:$0xf] %vm821_vm1, %v3785_v9 }
 0x173   : > { %912 = vst.msk [vmem:[#allocation2 + $0x8] sm:$0xf] %vm821_vm1, %v3785_v9 }
 0x174 PF: > { %p2959_p3 = scmp.ne.s32.totalorder %s3763_s19, 3 }
 0x176   : > { %916 = sbr.rel (%p2959_p3) target bundleno = 382 (0x17e), region = 76 }
 0x17b   : > { %v3786_v58 = vmov 0  }
 0x17c   : > { %918 = vst.msk [vmem:[#allocation2 + $0x3c] sm:$0xf] %vm821_vm1, %v3786_v58  ;;  %919 = vst.msk [vmem:[#allocation2 + $0x40] sm:$0xf] %vm821_vm1, %v3786_v58 }
 0x17d   : > { %920 = vst.msk [vmem:[#allocation2 + $0x44] sm:$0xf] %vm821_vm1, %v3786_v58 }
 0x17e PF: > { %v3549_v48 = vld [vmem:[#allocation6 + $0x38] sm:$0xff]   ;;  %v3550_v10 = vld [vmem:[#allocation6 + $0x30] sm:$0xff]   ;;  %v3551_v11 = vld [vmem:[#allocation6 + $0x28] sm:$0xff]   ;;  %vm941_vm9 = vsmask.f32 3328  ;;  %vm1085_vm12 = vcmask 523264  }
 0x17f   : > { %3254 = vmatprep.subr.bf16.mxu1 %v3549_v48  ;;  %v4177_v12 = vld [vmem:[#allocation2] sm:$0xf]  ;;  %v4179_v13 = vld [vmem:[#allocation2 + $0x4] sm:$0xf]  ;;  %v4181_v15 = vld [vmem:[#allocation2 + $0x8] sm:$0x1] }
 0x180   : > { %3255 = vmatpush3.bf16.msra.mxu1 %v3549_v48  ;;  %vm942_vm10 = vsmask.f32 7440  ;;  %v945_v14 = vshrl.u32 %v4177_v12, 16  ;;  %v948_v17 = vshll.u32 %v4177_v12, 16  ;;  %v954_v18 = vshll.u32 %v4179_v13, 16  ;;  %v3552_v25 = vld [vmem:[#allocation6 + $0x20] sm:$0xff]  }
 0x181   : > { %3256 = vmatprep.subr.bf16.mxu1 %v3550_v10  ;;  %v958_v19 = vshrl.u32 %v4179_v13, 16  ;;  %v964_v20 = vshll.u32 %v4181_v15, 16  ;;  %v4188_v21 = vld [vmem:[#allocation2 + $0xc] sm:$0xf]  ;;  %v4190_v24 = vld [vmem:[#allocation2 + $0x10] sm:$0xf]  ;;  %vm4200_vm11 = vmor %vm941_vm9, %vm942_vm10 }
 0x182   : > { %v947_v22 = vrot.slane %v945_v14, 4  ;;  %v950_v23 = vrot.slane %v948_v17, 5  ;;  %v4192_v16 = vld [vmem:[#allocation2 + $0x14] sm:$0x1]  ;;  %v956_v26 = vrot.slane %v954_v18, 5  ;;  %v969_v28 = vshrl.u32 %v4188_v21, 16 }
 0x183   : > { %v960_v27 = vrot.slane %v958_v19, 4  ;;  %v972_v30 = vshll.u32 %v4188_v21, 16  ;;  %v978_v31 = vshll.u32 %v4190_v24, 16  ;;  %v982_v32 = vshrl.u32 %v4190_v24, 16  ;;  %v3553_v45 = vld [vmem:[#allocation6 + $0x18] sm:$0xff]   ;;  %v3554_v48 = vld [vmem:[#allocation6 + $0x10] sm:$0xff]  }
 0x184   : > { %3257 = vmatpush3.bf16.msra.mxu1 %v3550_v10  ;;  %v951_v29 = vor.u32 %v950_v23, %v947_v22  ;;  %v966_v35 = vrot.slane %v964_v20, 5  ;;  %v971_v36 = vrot.slane %v969_v28, 4  ;;  %v988_v37 = vshll.u32 %v4192_v16, 16  ;;  %v4205_v46 = vld [vmem:[#allocation2 + $0x18] sm:$0xf]  ;;  %v3560_v1 = vld [vmem:[#allocation6 + $0x78] sm:$0xff]  }
 0x185   : > { %3258 = vmatprep.subr.bf16.mxu1 %v3551_v11  ;;  %v961_v34 = vor.u32 %v960_v27, %v956_v26  ;;  %v974_v39 = vrot.slane %v972_v30, 5  ;;  %v980_v40 = vrot.slane %v978_v31, 5  ;;  %v984_v42 = vrot.slane %v982_v32, 4  ;;  %v4209_v51 = vld [vmem:[#allocation2 + $0x1c] sm:$0xf]  ;;  %3302 = vmatprep.subr.bf16.mxu0 %v3560_v1  ;;  %s4678_s25 = sld [smem:[#allocation26_spill]] }
 0x186   : > { %v952_v38 = vrot.slane %v951_v29, 4  ;;  %v990_v44 = vrot.slane %v988_v37, 5  ;;  %v4211_v52 = vld [vmem:[#allocation2 + $0x20] sm:$0x1]  ;;  %v993_v53 = vshrl.u32 %v4205_v46, 16  ;;  %v996_v55 = vshll.u32 %v4205_v46, 16  ;;  %3303 = vmatpush3.bf16.msra.mxu0 %v3560_v1 }
 0x187   : > { %v962_v43 = vrot.slane %v961_v34, 4  ;;  %v975_v49 = vor.u32 %v974_v39, %v971_v36  ;;  %v985_v50 = vor.u32 %v984_v42, %v980_v40  ;;  %v1002_v56 = vshll.u32 %v4209_v51, 16  ;;  %v4219_v59 = vld [vmem:[#allocation2 + $0x24] sm:$0xf]  ;;  %v4221_v0 = vld [vmem:[#allocation2 + $0x28] sm:$0xf] }
 0x188   : > { %3259 = vmatpush3.bf16.msra.mxu1 %v3551_v11  ;;  %v957_v47 = vsel %vm4200_vm11, %v952_v38, %v956_v26  ;;  %v1006_v57 = vshrl.u32 %v4209_v51, 16  ;;  %v995_v62 = vrot.slane %v993_v53, 4  ;;  %v998_v2 = vrot.slane %v996_v55, 5  ;;  %v4224_v63 = vld [vmem:[#allocation2 + $0x2c] sm:$0x1]  ;;  %v3562_v26 = vld [vmem:[#allocation6 + $0x70] sm:$0xff]  }
 0x189   : > { %3260 = vmatprep.subr.bf16.mxu1 %v3552_v25  ;;  %v967_v54 = vsel %vm4200_vm11, %v962_v43, %v966_v35  ;;  %v976_v61 = vrot.slane %v975_v49, 4  ;;  %v986_v41 = vrot.slane %v985_v50, 4  ;;  %v1004_v3 = vrot.slane %v1002_v56, 5  ;;  %v3555_v34 = vld [vmem:[#allocation6 + $0x8] sm:$0xff]   ;;  %3304 = vmatprep.subr.bf16.mxu0 %v3562_v26  ;;  %v3556_v42 = vld [vmem:[#allocation6] sm:$0xff]   ;;  %v3559_v53 = vld [vmem:[#allocation6 + $0x58] sm:$0xff]  }
 0x18a   : > { %v2960_v60 = vcombine.low %v957_v47, %v967_v54  ;;  %v1008_v4 = vrot.slane %v1006_v57, 4  ;;  %v1012_v5 = vshll.u32 %v4211_v52, 16  ;;  %v1017_v8 = vshrl.u32 %v4219_v59, 16  ;;  %3305 = vmatpush3.bf16.msra.mxu0 %v3562_v26  ;;  %v3566_v38 = vld [vmem:[#allocation6 + $0x68] sm:$0xff]   ;;  %v3568_v49 = vld [vmem:[#allocation6 + $0x60] sm:$0xff]   ;;  %v3561_v1 = vld [vmem:[#allocation6 + $0x50] sm:$0xff]  }
 0x18b   : > { %v981_v6 = vsel %vm4200_vm11, %v976_v61, %v980_v40  ;;  %v991_v7 = vsel %vm4200_vm11, %v986_v41, %v990_v44  ;;  %v1020_v9 = vshll.u32 %v4219_v59, 16  ;;  %v999_v10 = vor.u32 %v998_v2, %v995_v62  ;;  %3306 = vmatprep.subr.bf16.mxu0 %v3566_v38  ;;  %v1284_v54 = vld [vmem:[#allocation2] sm:$0xe]  ;;  %v1285_v55 = vld [vmem:[#allocation2 + $0xc] sm:$0xe]  ;;  %s4683_s21 = sld [smem:[#allocation24_spill]] }
 0x18c   : > { %3261 = vmatpush3.bf16.msra.mxu1 %v3552_v25  ;;  %3262 = vmatprep.mubr.msk.bf16.mxu1 %vm1085_vm12, %v2960_v60  ;;  %v2961_v58 = vcombine.low %v981_v6, %v991_v7  ;;  %v1009_v11 = vor.u32 %v1008_v4, %v1004_v3  ;;  %v1014_v14 = vrot.slane %v1012_v5, 5  ;;  %v1019_v17 = vrot.slane %v1017_v8, 4  ;;  %v3570_v57 = vld [vmem:[#allocation2 + $0xc] sm:$0xff]   ;;  %v3572_v61 = vld [vmem:[#allocation6 + $0xb8] sm:$0xff]   ;;  %s4686_s16 = sld [smem:[#allocation25_spill]]  ;;  %s2726_s28 = sadd.s32 16, %s2928_s11 }
 0x18d   : > { %3270 = vmatprep.subr.bf16.mxu1 %v3553_v45  ;;  %v1022_v18 = vrot.slane %v1020_v9, 5  ;;  %v1026_v19 = vshll.u32 %v4221_v0, 16  ;;  %v1030_v20 = vshrl.u32 %v4221_v0, 16  ;;  %v1000_v22 = vrot.slane %v999_v10, 4  ;;  %3310 = vmatprep.mubr.msk.bf16.mxu0 %vm1085_vm12, %v3570_v57  ;;  %v1287_v7 = vld [vmem:[#allocation2 + $0x24] sm:$0xe] }
 0x18e   : > { %v1010_v23 = vrot.slane %v1009_v11, 4  ;;  %v1036_v25 = vshll.u32 %v4224_v63, 16  ;;  %vm1296_vm13 = vcmask 1042432   ;;  %vm1297_vm14 = vcmask 1046532   ;;  %3307 = vmatpush3.bf16.msra.mxu0 %v3566_v38  ;;  %v3576_v9 = vld [vmem:[#allocation2 + $0x24] sm:$0xff]   ;;  %v3578_v10 = vld [vmem:[#allocation6 + $0xa8] sm:$0xff]  }
 0x18f   : > { %3263 = vmatmul.mubr.msk.bf16.vlgmr.msra.gmra.mxu1 %vm1085_vm12, %v2961_v58  ;;  %v1023_v27 = vor.u32 %v1022_v18, %v1019_v17  ;;  %v1028_v28 = vrot.slane %v1026_v19, 5  ;;  %v1032_v29 = vrot.slane %v1030_v20, 4  ;;  %v1005_v30 = vsel %vm4200_vm11, %v1000_v22, %v1004_v3  ;;  %3308 = vmatprep.subr.bf16.mxu0 %v3568_v49  ;;  %vm4260_vm15 = vmor %vm1296_vm13, %vm1297_vm14  ;;  %v1605_v26 = vld [vmem:[#allocation2 + $0x10] sm:$0xf]  ;;  %v3599_v2 = vld [vmem:[%s4678_s25 + $0x8] sm:$0xff]   ;;  %s2727_s4 = sshra.s32 %s2726_s28, 3 }
 0x190   : > { %3271 = vmatpush3.bf16.msra.mxu1 %v3553_v45  ;;  %v1015_v31 = vsel %vm4200_vm11, %v1010_v23, %v1014_v14  ;;  %v1038_v32 = vrot.slane %v1036_v25, 5  ;;  %v1304_v43 = vrot.slane %v4181_v15, 5  ;;  %v1308_v44 = vrot.slane %v4190_v24, 5  ;;  %v3571_v15 = vld [vmem:[#allocation2 + $0x18] sm:$0xff]   ;;  %v3565_v14 = vld [vmem:[#allocation6 + $0x48] sm:$0xff]   ;;  %v3580_v23 = vld [vmem:[#allocation6 + $0xa0] sm:$0xff]  }
 0x191   : > { %3272 = vmatprep.subr.bf16.mxu1 %v3554_v48  ;;  %v2962_v35 = vcombine.low %v1005_v30, %v1015_v31  ;;  %v1024_v36 = vrot.slane %v1023_v27, 4  ;;  %v1033_v37 = vor.u32 %v1032_v29, %v1028_v28  ;;  %v2972_v47 = vcombine.low %v4177_v12, %v4179_v13  ;;  %v1604_v25 = vld [vmem:[#allocation2 + $0xc] sm:$0xf]  ;;  %s3090_s10 = sshll.u32 %s2727_s4, 2  ;;  %s4689_s8 = sld [smem:[#allocation27_spill]] }
 0x192   : > { %v1301_v56 = vrot.slane %v4179_v13, 5  ;;  %3309 = vmatpush3.bf16.msra.mxu0 %v3568_v49  ;;  %v1315_v12 = vrot.slane %v4209_v51, 5  ;;  %v1311_v60 = vrot.slane %v4192_v16, 5  ;;  %v2973_v41 = vcombine.low %v4188_v21, %v4190_v24  ;;  %v3574_v16 = vld [vmem:[#allocation6 + $0xb0] sm:$0xff]   ;;  %v3567_v29 = vld [vmem:[#allocation6 + $0x40] sm:$0xff]   ;;  %v3569_v49 = vld [vmem:[#allocation6 + $0x98] sm:$0xff]   ;;  %s2730_s9 = scalar_lea.vmem %s368_s24, %s3090_s10 [#allocation3] }
 0x193   : > { %3266 = vmatprep.mubr.msk.bf16.mxu1 %vm1085_vm12, %v2962_v35  ;;  %v1029_v39 = vsel %vm4200_vm11, %v1024_v36, %v1028_v28  ;;  %v1034_v40 = vrot.slane %v1033_v37, 4  ;;  %v2984_v13 = vrot.slane %v1284_v54, 9  ;;  %v2985_v62 = vrot.slane %v1285_v55, 9  ;;  %3334 = vmatprep.subr.bf16.mxu0 %v3572_v61  ;;  %v1286_v24 = vld [vmem:[#allocation2 + $0x18] sm:$0xe]  ;;  %s4690_s12 = sld [smem:[#allocation28_spill]] }
 0x194   : > { %3273 = vmatpush3.bf16.msra.mxu1 %v3554_v48  ;;  %v1303_v3 = vrot.slane %v1301_v56, 4  ;;  %v1310_v4 = vrot.slane %v1308_v44, 4  ;;  %v1317_v5 = vrot.slane %v1315_v12, 4  ;;  %v1318_v6 = vrot.slane %v4211_v52, 5  ;;  %v1607_v35 = vld [vmem:[#allocation2 + $0x18] sm:$0xf] }
 0x195   : > { %3274 = vmatprep.subr.bf16.mxu1 %v3555_v34  ;;  %v1039_v45 = vsel %vm4200_vm11, %v1034_v40, %v1038_v32  ;;  %3311 = vmatmul.mubr.msk.bf16.vlgmr.msra.gmra.mxu0 %vm1085_vm12, %v3571_v15  ;;  %v2974_v21 = vcombine.low %v4205_v46, %v4209_v51  ;;  %v1322_v8 = vrot.slane %v4221_v0, 5  ;;  %v1302_v58 = vsel %vm4260_vm15, %v2984_v13, %v1301_v56  ;;  %v3577_v46 = vld [vmem:[#allocation2 + $0x30] sm:$0xff]   ;;  %v1608_v36 = vld [vmem:[#allocation2 + $0x1c] sm:$0xf]  ;;  %v1842_v56 = vld [vmem:[#allocation2 + $0xc] sm:$0xe] }
 0x196   : > { %v2963_v50 = vcombine.low %v1029_v39, %v1039_v45  ;;  %3335 = vmatpush3.bf16.msra.mxu0 %v3572_v61  ;;  %v1305_v48 = vsel %vm4260_vm15, %v1303_v3, %v1304_v43  ;;  %v2986_v52 = vrot.slane %v1286_v24, 9  ;;  %3314 = vmatprep.mubr.msk.bf16.mxu0 %vm1085_vm12, %v3576_v9  ;;  %v2987_v51 = vrot.slane %v1287_v7, 9  ;;  %v1843_v61 = vld [vmem:[#allocation2 + $0x18] sm:$0xe]  ;;  %s4691_s27 = sld [smem:[#allocation13_spill]]  ;;  %s2817_s28 = sshll.u32 %s4167_s20, 4  ;;  %s4552_s28 = int_to_ptr.vmem [resolvable:$true] %s2817_s28 }
 0x197   : > { %3336 = vmatprep.subr.bf16.mxu0 %v3574_v16  ;;  %v2975_v11 = vcombine.low %v4219_v59, %v4221_v0  ;;  %v1325_v17 = vrot.slane %v4224_v63, 5  ;;  %v2988_v18 = vcombine.low %v1302_v58, %v1305_v48  ;;  %v4281_v19 = vsel %vm4260_vm15, %v2985_v62, %v1308_v44  ;;  %v4288_v59 = vld [vmem:[#allocation2 + $0x14] sm:$0x1]  ;;  %s4692_s7 = sld [smem:[#allocation15_spill]]  ;;  %s4558_s26 = scalar_lea.sflag [#allocation5], %s406_s5 }
 0x198   : > { %3275 = vmatpush3.bf16.msra.mxu1 %v3555_v34  ;;  %v4285_v20 = vsel %vm4260_vm15, %v1310_v4, %v1311_v60  ;;  %v1324_v22 = vrot.slane %v1322_v8, 4  ;;  %v1617_v0 = vshrl.u32 %v1604_v25, 16  ;;  %v1620_v63 = vshll.u32 %v1604_v25, 16  ;;  %s4693_s10 = sld [smem:[#allocation29_spill]]  ;;  %s3655_s6 = scalar_lea.vmem %s4552_s28, 1024 }
 0x199   : > { %3267 = vmatmul.mubr.msk.bf16.gmra.mxu1 %vm1085_vm12, %v2963_v50  ;;  %3276 = vmatprep.subr.bf16.mxu1 %v3556_v42  ;;  %v1626_v27 = vshll.u32 %v1605_v26, 16  ;;  %v1630_v28 = vshrl.u32 %v1605_v26, 16  ;;  %v4292_v30 = vsel %vm4260_vm15, %v2986_v52, %v1315_v12  ;;  %v4296_v31 = vsel %vm4260_vm15, %v1317_v5, %v1318_v6  ;;  %v3582_v6 = vld [vmem:[#allocation6 + $0xf8] sm:$0xff]   ;;  %p3656_p11 = scmp.ne.s32.totalorder %s4552_s28, %s3655_s6 }
 0x19a   : > { %3278 = vmatprep.mubr.msk.bf16.mxu1 %vm1085_vm12, %v2972_v47  ;;  %3337 = vmatpush3.bf16.msra.mxu0 %v3574_v16  ;;  %v4300_v32 = vsel %vm4260_vm15, %v2987_v51, %v1322_v8  ;;  %v1636_v34 = vshll.u32 %v4288_v59, 16  ;;  %v1619_v37 = vrot.slane %v1617_v0, 4  ;;  %v1622_v38 = vrot.slane %v1620_v63, 5 }
 0x19b   : > { %3338 = vmatprep.subr.bf16.mxu0 %v3578_v10  ;;  %v4303_v39 = vrot.slane %v1626_v27, 5  ;;  %v1632_v40 = vrot.slane %v1630_v28, 4  ;;  %v4307_v43 = vsel %vm4260_vm15, %v1324_v22, %v1325_v17  ;;  %v1641_v44 = vshrl.u32 %v1607_v35, 16  ;;  %v1610_v17 = vld [vmem:[#allocation2 + $0x24] sm:$0xf] }
 0x19c   : > { %3277 = vmatpush3.bf16.msra.mxu1 %v3556_v42  ;;  %v1609_v42 = vld [vmem:[#allocation2 + $0x20] sm:$0x1]  ;;  %v1644_v45 = vshll.u32 %v1607_v35, 16  ;;  %v1650_v47 = vshll.u32 %v1608_v36, 16  ;;  %v1623_v50 = vor.u32 %v1622_v38, %v1619_v37  ;;  %v1654_v54 = vshrl.u32 %v1608_v36, 16  ;;  %s3094_s24 = sshll.u32 %s4691_s27, 2 }
 0x19d   : > { %3286 = vmatprep.subr.bf16.mxu1 %v3559_v53  ;;  %3315 = vmatmul.mubr.msk.bf16.gmra.mxu0 %vm1085_vm12, %v3577_v46  ;;  %v1660_v55 = vshll.u32 %v1609_v42, 16  ;;  %v1643_v57 = vrot.slane %v1641_v44, 4  ;;  %v3024_v60 = vrot.slane %v1842_v56, 9  ;;  %v1638_v62 = vrot.slane %v1636_v34, 5  ;;  %v3573_v46 = vld [vmem:[#allocation6 + $0x90] sm:$0xff]   ;;  %s2810_s11 = sadd.s32 %s3763_s19, %s3094_s24  ;;  %p4694_p2 = scmp.ne.s32.totalorder %s4692_s7, 0 }
 0x19e   : > { %3339 = vmatpush3.bf16.msra.mxu0 %v3578_v10  ;;  %v1646_v15 = vrot.slane %v1644_v45, 5  ;;  %v4312_v12 = vrot.slane %v1650_v47, 5  ;;  %v2989_v3 = vcombine.low %v4281_v19, %v4285_v20  ;;  %v1860_v4 = vrot.slane %v1605_v26, 5  ;;  %v1611_v20 = vld [vmem:[#allocation2 + $0x28] sm:$0xf]  ;;  %v3575_v26 = vld [vmem:[#allocation6 + $0x88] sm:$0xff]  }
 0x19f   : > { %3340 = vmatprep.subr.bf16.mxu0 %v3580_v23  ;;  %v1863_v16 = vrot.slane %v4288_v59, 5  ;;  %v3025_v5 = vrot.slane %v1843_v61, 9  ;;  %v2991_v24 = vcombine.low %v4300_v32, %v4307_v43  ;;  %v1867_v8 = vrot.slane %v1608_v36, 5  ;;  %v4335_v22 = vld [vmem:[#allocation2 + $0x2c] sm:$0x1]  ;;  %v3584_v34 = vld [vmem:[#allocation6 + $0xf0] sm:$0xff]   ;;  %p3657_p4 = pnand %p3656_p11, %p4694_p2 }
 0x1a0   : > { %v1647_v7 = vor.u32 %v1646_v15, %v1643_v57  ;;  %v4322_v58 = vrot.slane %v1660_v55, 5  ;;  %v1861_v48 = vsel %vm4260_vm15, %v3024_v60, %v1860_v4  ;;  %v1862_v52 = vrot.slane %v1860_v4, 4  ;;  %v1613_v28 = vld [vmem:[#allocation2 + $0x30] sm:$0xf]  ;;  %v1615_v56 = vld [vmem:[#allocation2 + $0x38] sm:$0x1] }
 0x1a1   : > { %3279 = vmatmul.mubr.msk.bf16.vlgmr.msra.gmra.mxu1 %vm1085_vm12, %v2973_v41  ;;  %v1624_v41 = vrot.slane %v1623_v50, 4  ;;  %v1868_v10 = vsel %vm4260_vm15, %v3025_v5, %v1867_v8  ;;  %v1668_v25 = vshll.u32 %v1610_v17, 16  ;;  %v1674_v27 = vshll.u32 %v1611_v20, 16  ;;  %v3579_v50 = vld [vmem:[#allocation6 + $0x80] sm:$0xff]   ;;  %v1845_v15 = vld [vmem:[#allocation2 + $0x30] sm:$0xe]  ;;  %p3658_p5 = pneg %p3657_p4 }
 0x1a2   : > { %3287 = vmatpush3.bf16.msra.mxu1 %v3559_v53  ;;  %3282 = vmatprep.mubr.msk.bf16.mxu1 %vm1085_vm12, %v2974_v21  ;;  %v1633_v53 = vor.u32 %v1632_v40, %v4303_v39  ;;  %v2990_v21 = vcombine.low %v4292_v30, %v4296_v31  ;;  %v1864_v19 = vsel %vm4260_vm15, %v1862_v52, %v1863_v16  ;;  %v4338_v59 = vrot.slane %v1647_v7, 4  ;;  %v3586_v16 = vld [vmem:[#allocation6 + $0xe8] sm:$0xff]   ;;  %v3581_v7 = vld [vmem:[#allocation6 + $0xd8] sm:$0xff]  }
 0x1a3   : > { %3288 = vmatprep.subr.bf16.mxu1 %v3561_v1  ;;  %3341 = vmatpush3.bf16.msra.mxu0 %v3580_v23  ;;  %v1629_v51 = vsel %vm4200_vm11, %v1624_v41, %v4303_v39  ;;  %v1665_v23 = vshrl.u32 %v1610_v17, 16  ;;  %v3028_v0 = vcombine.low %v1861_v48, %v1864_v19  ;;  %v1670_v36 = vrot.slane %v1668_v25, 5 }
 0x1a4   : > { %v1634_v13 = vrot.slane %v1633_v53, 4  ;;  %3366 = vmatprep.subr.bf16.mxu0 %v3582_v6  ;;  %v4348_v37 = vrot.slane %v1674_v27, 5  ;;  %v1678_v38 = vshrl.u32 %v1611_v20, 16  ;;  %v1684_v39 = vshll.u32 %v4335_v22, 16 }
 0x1a5   : > { %v1667_v35 = vrot.slane %v1665_v23, 4  ;;  %3342 = vmatprep.mubr.msk.bf16.mxu0 %vm1085_vm12, %v3028_v0  ;;  %v1689_v40 = vshrl.u32 %v1613_v28, 16  ;;  %v1692_v44 = vshll.u32 %v1613_v28, 16  ;;  %v1874_v4 = vrot.slane %v1611_v20, 5  ;;  %v2163_v23 = vld [vmem:[#allocation2 + $0x18] sm:$0xf] }
 0x1a6   : > { %3289 = vmatpush3.bf16.msra.mxu1 %v3561_v1  ;;  %v1656_v1 = vrot.slane %v1654_v54, 4  ;;  %v1653_v54 = vsel %vm4200_vm11, %v4338_v59, %v4312_v12  ;;  %v1680_v55 = vrot.slane %v1678_v38, 4  ;;  %v1686_v60 = vrot.slane %v1684_v39, 5  ;;  %v4388_v59 = vld [vmem:[#allocation2 + $0x1c] sm:$0xf] }
 0x1a7   : > { %3290 = vmatprep.subr.bf16.mxu1 %v3565_v14  ;;  %v1691_v57 = vrot.slane %v1689_v40, 4  ;;  %v1694_v61 = vrot.slane %v1692_v44, 5  ;;  %v1876_v48 = vrot.slane %v1874_v4, 4  ;;  %v3027_v52 = vrot.slane %v1845_v15, 9  ;;  %v4390_v0 = vld [vmem:[#allocation2 + $0x20] sm:$0x1] }
 0x1a8   : > { %v1657_v9 = vor.u32 %v1656_v1, %v4312_v12  ;;  %v1681_v1 = vor.u32 %v1680_v55, %v4348_v37  ;;  %v1884_v43 = vrot.slane %v1615_v56, 5  ;;  %v2179_v27 = vshll.u32 %v2163_v23, 16  ;;  %v3583_v28 = vld [vmem:[#allocation6 + $0xd0] sm:$0xff]   ;;  %v4399_v40 = vld [vmem:[#allocation2 + $0x28] sm:$0xf] }
 0x1a9   : > { %3283 = vmatmul.mubr.msk.bf16.gmra.mxu1 %vm1085_vm12, %v2975_v11  ;;  %v1869_v11 = vrot.slane %v1867_v8, 4  ;;  %v1695_v12 = vor.u32 %v1694_v61, %v1691_v57  ;;  %v2209_v55 = vshll.u32 %v4399_v40, 16 }
 0x1aa   : > { %3291 = vmatpush3.bf16.msra.mxu1 %v3565_v14  ;;  %3294 = vmatprep.mubr.msk.bf16.mxu1 %vm1085_vm12, %v2988_v18  ;;  %v1870_v14 = vrot.slane %v1609_v42, 5  ;;  %v1639_v18 = vsel %vm4200_vm11, %v1634_v13, %v1638_v62  ;;  %v4345_v30 = vrot.slane %v1657_v9, 4  ;;  %v1671_v42 = vor.u32 %v1670_v36, %v1667_v35  ;;  %v2166_v35 = vld [vmem:[#allocation2 + $0x24] sm:$0xf] }
 0x1ab   : > { %3292 = vmatprep.subr.bf16.mxu1 %v3567_v29  ;;  %v3012_v53 = vcombine.low %v1629_v51, %v1639_v18  ;;  %v1682_v8 = vrot.slane %v1681_v1, 4  ;;  %v1696_v51 = vrot.slane %v1695_v12, 4  ;;  %v2181_v39 = vrot.slane %v2179_v27, 5 }
 0x1ac   : > { %v1871_v63 = vsel %vm4260_vm15, %v1869_v11, %v1870_v14  ;;  %v1672_v62 = vrot.slane %v1671_v42, 4  ;;  %v4401_v42 = vld [vmem:[#allocation2 + $0x2c] sm:$0x1] }
 0x1ad   : > { %v3029_v31 = vcombine.low %v1868_v10, %v1871_v63  ;;  %v1687_v11 = vsel %vm4200_vm11, %v1682_v8, %v1686_v60  ;;  %v2176_v63 = vshrl.u32 %v2163_v23, 16  ;;  %v2219_v60 = vshll.u32 %v4401_v42, 16  ;;  %v4428_v23 = vld [vmem:[#allocation2 + $0x44] sm:$0x1] }
 0x1ae   : > { %3293 = vmatpush3.bf16.msra.mxu1 %v3567_v29  ;;  %v4342_v29 = vld [vmem:[#allocation2 + $0x34] sm:$0xf]  ;;  %v1677_v10 = vsel %vm4200_vm11, %v1672_v62, %v4348_v37 }
 0x1af   : > { %3318 = vmatprep.subr.bf16.mxu1 %v3569_v49  ;;  %3343 = vmatmul.mubr.msk.bf16.vlgmr.msra.gmra.mxu0 %vm1085_vm12, %v3029_v31  ;;  %v1698_v45 = vshll.u32 %v4342_v29, 16  ;;  %v1702_v47 = vshrl.u32 %v4342_v29, 16  ;;  %v1881_v32 = vrot.slane %v4342_v29, 5  ;;  %v3014_v25 = vcombine.low %v1677_v10, %v1687_v11  ;;  %v2172_v10 = vld [vmem:[#allocation2 + $0x3c] sm:$0xf] }
 0x1b0   : > { %3367 = vmatpush3.bf16.msra.mxu0 %v3582_v6  ;;  %v1708_v6 = vshll.u32 %v1615_v56, 16  ;;  %v2189_v31 = vshrl.u32 %v4388_v59, 16  ;;  %v2178_v38 = vrot.slane %v2176_v63, 4  ;;  %v2213_v56 = vshrl.u32 %v4399_v40, 16 }
 0x1b1   : > { %3295 = vmatmul.mubr.msk.bf16.vlgmr.msra.gmra.mxu1 %vm1085_vm12, %v2989_v3  ;;  %3368 = vmatprep.subr.bf16.mxu0 %v3584_v34  ;;  %v4358_v41 = vrot.slane %v1698_v45, 5  ;;  %v1704_v13 = vrot.slane %v1702_v47, 4  ;;  %v1882_v20 = vsel %vm4260_vm15, %v3027_v52, %v1881_v32  ;;  %v2221_v12 = vrot.slane %v2219_v60, 5 }
 0x1b2   : > { %3319 = vmatpush3.bf16.msra.mxu1 %v3569_v49  ;;  %3298 = vmatprep.mubr.msk.bf16.mxu1 %vm1085_vm12, %v2990_v21  ;;  %v1844_v49 = vld [vmem:[#allocation2 + $0x24] sm:$0xe]  ;;  %v1877_v21 = vrot.slane %v4335_v22, 5  ;;  %v1710_v18 = vrot.slane %v1708_v6, 5  ;;  %v1883_v22 = vrot.slane %v1881_v32, 4  ;;  %v2191_v45 = vrot.slane %v2189_v31, 4 }
 0x1b3   : > { %3320 = vmatprep.subr.bf16.mxu1 %v3573_v46  ;;  %v3026_v3 = vrot.slane %v1844_v49, 9  ;;  %v1705_v5 = vor.u32 %v1704_v13, %v4358_v41  ;;  %v2200_v49 = vshrl.u32 %v2166_v35, 16  ;;  %v2211_v13 = vrot.slane %v2209_v55, 5 }
 0x1b4   : > { %3369 = vmatpush3.bf16.msra.mxu0 %v3584_v34  ;;  %v1878_v14 = vsel %vm4260_vm15, %v1876_v48, %v1877_v21  ;;  %v1885_v29 = vsel %vm4260_vm15, %v1883_v22, %v1884_v43  ;;  %v2195_v34 = vshll.u32 %v4390_v0, 16  ;;  %v2215_v62 = vrot.slane %v2213_v56, 4  ;;  %v4415_v48 = vld [vmem:[#allocation2 + $0x38] sm:$0x1] }
 0x1b5   : > { %v1875_v9 = vsel %vm4260_vm15, %v3026_v3, %v1874_v4  ;;  %3370 = vmatprep.subr.bf16.mxu0 %v3586_v16  ;;  %v1706_v17 = vrot.slane %v1705_v5, 4  ;;  %v3031_v37 = vcombine.low %v1882_v20, %v1885_v29  ;;  %v2202_v15 = vrot.slane %v2200_v49, 4  ;;  %v3587_v3 = vld [vmem:[#allocation6 + $0xc0] sm:$0xff]   ;;  %v3589_v4 = vld [vmem:[#allocation2 + $0x18] sm:$0xff]  }
 0x1b6   : > { %3321 = vmatpush3.bf16.msra.mxu1 %v3573_v46  ;;  %v1663_v46 = vsel %vm4200_vm11, %v4345_v30, %v4322_v58  ;;  %v3030_v58 = vcombine.low %v1875_v9, %v1878_v14  ;;  %v2185_v30 = vshll.u32 %v4388_v59, 16  ;;  %v2197_v47 = vrot.slane %v2195_v34, 5  ;;  %v4413_v9 = vld [vmem:[#allocation2 + $0x34] sm:$0xf] }
 0x1b7   : > { %3322 = vmatprep.subr.bf16.mxu1 %v3575_v26  ;;  %v3013_v19 = vcombine.low %v1653_v54, %v1663_v46  ;;  %v1711_v36 = vsel %vm4200_vm11, %v1706_v17, %v1710_v18  ;;  %v2203_v54 = vshll.u32 %v2166_v35, 16  ;;  %v2216_v21 = vor.u32 %v2215_v62, %v2211_v13  ;;  %v2401_v35 = vld [vmem:[#allocation2 + $0x18] sm:$0xe]  ;;  %v3595_v62 = vld [vmem:[#allocation6 + $0x108] sm:$0xff]  }
 0x1b8   : > { %3371 = vmatpush3.bf16.msra.mxu0 %v3586_v16  ;;  %3346 = vmatprep.mubr.msk.bf16.mxu0 %vm1085_vm12, %v3030_v58  ;;  %v2187_v44 = vrot.slane %v2185_v30, 5  ;;  %v2237_v17 = vshrl.u32 %v4413_v9, 16  ;;  %v2243_v18 = vshll.u32 %v4415_v48, 16  ;;  %v4421_v58 = vld [vmem:[#allocation2 + $0x40] sm:$0xf]  ;;  %v2251_v30 = vshll.u32 %v2172_v10, 16 }
 0x1b9   : > { %3299 = vmatmul.mubr.msk.bf16.gmra.mxu1 %vm1085_vm12, %v2991_v24  ;;  %v3588_v24 = vld [vmem:[#allocation6 + $0xe0] sm:$0xff]   ;;  %3347 = vmatmul.mubr.msk.bf16.gmra.mxu0 %vm1085_vm12, %v3031_v37  ;;  %v2217_v43 = vrot.slane %v2216_v21, 4  ;;  %v2257_v31 = vshll.u32 %v4421_v58, 16  ;;  %v2261_v34 = vshrl.u32 %v4421_v58, 16  ;;  %v2403_v21 = vld [vmem:[#allocation2 + $0x30] sm:$0xe] }
 0x1ba   : > { %3323 = vmatpush3.bf16.msra.mxu1 %v3575_v26  ;;  %3326 = vmatprep.mubr.msk.bf16.mxu1 %vm1085_vm12, %v3012_v53  ;;  %v1701_v26 = vsel %vm4200_vm11, %v1696_v51, %v4358_v41  ;;  %v2182_v53 = vor.u32 %v2181_v39, %v2178_v38  ;;  %v2192_v57 = vor.u32 %v2191_v45, %v2187_v44  ;;  %v2205_v41 = vrot.slane %v2203_v54, 5  ;;  %v3593_v45 = vld [vmem:[#allocation2 + $0x30] sm:$0xff]   ;;  %v3592_v54 = vld [vmem:[#allocation6 + $0x110] sm:$0xff]  }
 0x1bb   : > { %3324 = vmatprep.subr.bf16.mxu1 %v3579_v50  ;;  %3372 = vmatprep.subr.bf16.mxu0 %v3588_v24  ;;  %v3015_v1 = vcombine.low %v1701_v26, %v1711_v36  ;;  %v2222_v20 = vsel %vm4200_vm11, %v2217_v43, %v2221_v12  ;;  %v3591_v26 = vld [vmem:[#allocation6 + $0x118] sm:$0xff]   ;;  %v2245_v39 = vrot.slane %v2243_v18, 5  ;;  %v2259_v49 = vrot.slane %v2257_v31, 5  ;;  %v2404_v18 = vld [vmem:[#allocation2 + $0x3c] sm:$0xe] }
 0x1bc   : > { %3373 = vmatpush3.bf16.msra.mxu0 %v3588_v24  ;;  %v2183_v61 = vrot.slane %v2182_v53, 4  ;;  %v2193_v16 = vrot.slane %v2192_v57, 4  ;;  %v2206_v6 = vor.u32 %v2205_v41, %v2202_v15  ;;  %v2233_v24 = vshll.u32 %v4413_v9, 16  ;;  %v3590_v36 = vld [vmem:[#allocation2 + $0x24] sm:$0xff]  }
 0x1bd   : > { %v2419_v53 = vrot.slane %v4388_v59, 5  ;;  %v3064_v57 = vrot.slane %v2401_v35, 9  ;;  %v2422_v15 = vrot.slane %v4390_v0, 5  ;;  %v2426_v59 = vrot.slane %v4399_v40, 5 }
 0x1be   : > { %3325 = vmatpush3.bf16.msra.mxu1 %v3579_v50  ;;  %v3585_v50 = vld [vmem:[#allocation6 + $0xc8] sm:$0xff]   ;;  %v2188_v5 = vsel %vm4200_vm11, %v2183_v61, %v2187_v44  ;;  %v2198_v8 = vsel %vm4200_vm11, %v2193_v16, %v2197_v47  ;;  %v2207_v32 = vrot.slane %v2206_v6, 4  ;;  %v2235_v22 = vrot.slane %v2233_v24, 5  ;;  %v3596_v24 = vld [vmem:[#allocation6 + $0x100] sm:$0xff]  }
 0x1bf   : > { %3350 = vmatprep.subr.bf16.mxu1 %v3581_v7  ;;  %v3052_v51 = vcombine.low %v2188_v5, %v2198_v8  ;;  %v2267_v44 = vshll.u32 %v4428_v23, 16  ;;  %v2253_v47 = vrot.slane %v2251_v30, 5  ;;  %v2420_v0 = vsel %vm4260_vm15, %v3064_v57, %v2419_v53  ;;  %v2402_v5 = vld [vmem:[#allocation2 + $0x24] sm:$0xe]  ;;  %v3594_v8 = vld [vmem:[#allocation2 + $0x3c] sm:$0xff]  }
 0x1c0   : > { %v2429_v43 = vrot.slane %v4401_v42, 5  ;;  %v2436_v33 = vrot.slane %v4415_v48, 5  ;;  %v2440_v42 = vrot.slane %v4421_v58, 5 }
 0x1c1   : > { %3327 = vmatmul.mubr.msk.bf16.vlgmr.msra.gmra.mxu1 %vm1085_vm12, %v3013_v19  ;;  %v2212_v19 = vsel %vm4200_vm11, %v2207_v32, %v2211_v13  ;;  %3374 = vmatprep.mubr.msk.bf16.mxu0 %vm1085_vm12, %v3052_v51  ;;  %v2269_v41 = vrot.slane %v2267_v44, 5  ;;  %v2421_v13 = vrot.slane %v2419_v53, 4  ;;  %v3065_v51 = vrot.slane %v2402_v5, 9 }
 0x1c2   : > { %3351 = vmatpush3.bf16.msra.mxu1 %v3581_v7  ;;  %3330 = vmatprep.mubr.msk.bf16.mxu1 %vm1085_vm12, %v3014_v25  ;;  %v2169_v7 = vld [vmem:[#allocation2 + $0x30] sm:$0xf]  ;;  %v2248_v25 = vshrl.u32 %v2172_v10, 16  ;;  %v3053_v63 = vcombine.low %v2212_v19, %v2222_v20  ;;  %v2428_v32 = vrot.slane %v2426_v59, 4  ;;  %v3066_v10 = vrot.slane %v2403_v21, 9 }
 0x1c3   : > { %3352 = vmatprep.subr.bf16.mxu1 %v3583_v28  ;;  %v2224_v52 = vshrl.u32 %v2169_v7, 16  ;;  %v2227_v46 = vshll.u32 %v2169_v7, 16  ;;  %v2423_v12 = vsel %vm4260_vm15, %v2421_v13, %v2422_v15  ;;  %v2433_v7 = vrot.slane %v4413_v9, 5 }
 0x1c4   : > { %v2250_v29 = vrot.slane %v2248_v25, 4  ;;  %3375 = vmatmul.mubr.msk.bf16.vlgmr.msra.gmra.mxu0 %vm1085_vm12, %v3053_v63  ;;  %v2427_v9 = vsel %vm4260_vm15, %v3065_v51, %v2426_v59  ;;  %v2442_v25 = vrot.slane %v2440_v42, 4 }
 0x1c5   : > { %v2226_v11 = vrot.slane %v2224_v52, 4  ;;  %v2229_v14 = vrot.slane %v2227_v46, 5  ;;  %v3068_v46 = vcombine.low %v2420_v0, %v2423_v12 }
 0x1c6   : > { %3353 = vmatpush3.bf16.msra.mxu1 %v3583_v28  ;;  %v2239_v28 = vrot.slane %v2237_v17, 4  ;;  %v2254_v60 = vor.u32 %v2253_v47, %v2250_v29  ;;  %v2434_v17 = vsel %vm4260_vm15, %v3066_v10, %v2433_v7  ;;  %v3600_v29 = vld [vmem:[%s4678_s25] sm:$0xff]  }
 0x1c7   : > { %3354 = vmatprep.subr.bf16.mxu1 %v3585_v50  ;;  %v2230_v27 = vor.u32 %v2229_v14, %v2226_v11  ;;  %v2435_v11 = vrot.slane %v2433_v7, 4  ;;  %v2430_v14 = vsel %vm4260_vm15, %v2428_v32, %v2429_v43 }
 0x1c8   : > { %v2240_v38 = vor.u32 %v2239_v28, %v2235_v22  ;;  %v3069_v19 = vcombine.low %v2427_v9, %v2430_v14  ;;  %v3597_v28 = vld [vmem:[%s4678_s25 + $0x18] sm:$0xff]  }
 0x1c9   : > { %3331 = vmatmul.mubr.msk.bf16.gmra.mxu1 %vm1085_vm12, %v3015_v1  ;;  %v2231_v37 = vrot.slane %v2230_v27, 4  ;;  %v2437_v48 = vsel %vm4260_vm15, %v2435_v11, %v2436_v33  ;;  %3398 = vmatprep.subr.bf16.mxu0 %v3597_v28 }
 0x1ca   : > { %3355 = vmatpush3.bf16.msra.mxu1 %v3585_v50  ;;  %3358 = vmatprep.mubr.msk.bf16.mxu1 %vm1085_vm12, %v3589_v4  ;;  %v2263_v50 = vrot.slane %v2261_v34, 4  ;;  %v2241_v56 = vrot.slane %v2240_v38, 4  ;;  %v2255_v4 = vrot.slane %v2254_v60, 4  ;;  %v3070_v20 = vcombine.low %v2434_v17, %v2437_v48 }
 0x1cb   : > { %3356 = vmatprep.subr.bf16.mxu1 %v3587_v3  ;;  %v2236_v55 = vsel %vm4200_vm11, %v2231_v37, %v2235_v22  ;;  %v3067_v22 = vrot.slane %v2404_v18, 9  ;;  %3399 = vmatpush3.bf16.msra.mxu0 %v3597_v28 }
 0x1cc   : > { %v2264_v61 = vor.u32 %v2263_v50, %v2259_v49  ;;  %v2246_v1 = vsel %vm4200_vm11, %v2241_v56, %v2245_v39  ;;  %v2260_v6 = vsel %vm4200_vm11, %v2255_v4, %v2259_v49 }
 0x1cd   : > { %v2441_v58 = vsel %vm4260_vm15, %v3067_v22, %v2440_v42 }
 0x1ce   : > { %3357 = vmatpush3.bf16.msra.mxu1 %v3587_v3  ;;  %v3054_v3 = vcombine.low %v2236_v55, %v2246_v1  ;;  %v2265_v16 = vrot.slane %v2264_v61, 4 }
 0x1cf   : > { %3382 = vmatprep.subr.bf16.mxu1 %v3591_v26 }
 0x1d0   : > { %3378 = vmatprep.mubr.msk.bf16.mxu0 %vm1085_vm12, %v3054_v3  ;;  %v2270_v40 = vsel %vm4200_vm11, %v2265_v16, %v2269_v41 }
 0x1d1   : > { %3359 = vmatmul.mubr.msk.bf16.vlgmr.msra.gmra.mxu1 %vm1085_vm12, %v3590_v36  ;;  %v3055_v52 = vcombine.low %v2260_v6, %v2270_v40 }
 0x1d2   : > { %3383 = vmatpush3.bf16.msra.mxu1 %v3591_v26  ;;  %3362 = vmatprep.mubr.msk.bf16.mxu1 %vm1085_vm12, %v3593_v45  ;;  %v2443_v26 = vrot.slane %v4428_v23, 5  ;;  %v3598_v23 = vld [vmem:[%s4678_s25 + $0x10] sm:$0xff]  }
 0x1d3   : > { %3384 = vmatprep.subr.bf16.mxu1 %v3592_v54  ;;  %3379 = vmatmul.mubr.msk.bf16.gmra.mxu0 %vm1085_vm12, %v3055_v52 }
 0x1d4   : > { %v2444_v63 = vsel %vm4260_vm15, %v2442_v25, %v2443_v26  ;;  %3400 = vmatprep.subr.bf16.mxu0 %v3598_v23 }
 0x1d5   : > { %v3071_v27 = vcombine.low %v2441_v58, %v2444_v63  ;;  %3401 = vmatpush3.bf16.msra.mxu0 %v3598_v23 }
 0x1d6   : > { %3385 = vmatpush3.bf16.msra.mxu1 %v3592_v54  ;;  %3402 = vmatprep.subr.bf16.mxu0 %v3599_v2 }
 0x1d7   : > { %3386 = vmatprep.subr.bf16.mxu1 %v3595_v62 }
 0x1d9   : > { %3363 = vmatmul.mubr.msk.bf16.gmra.mxu1 %vm1085_vm12, %v3594_v8  ;;  %3403 = vmatpush3.bf16.msra.mxu0 %v3599_v2 }
 0x1da   : > { %3387 = vmatpush3.bf16.msra.mxu1 %v3595_v62  ;;  %3390 = vmatprep.mubr.msk.bf16.mxu1 %vm1085_vm12, %v3068_v46 }
 0x1db   : > { %3388 = vmatprep.subr.bf16.mxu1 %v3596_v24  ;;  %3404 = vmatprep.subr.bf16.mxu0 %v3600_v29 }
 0x1dd   : > { %3405 = vmatpush3.bf16.msra.mxu0 %v3600_v29 }
 0x1de   : > { %3389 = vmatpush3.bf16.msra.mxu1 %v3596_v24 }
 0x1e1   : > { %3391 = vmatmul.mubr.msk.bf16.vlgmr.msra.gmra.mxu1 %vm1085_vm12, %v3069_v19 }
 0x1e2   : > { %3394 = vmatprep.mubr.msk.bf16.mxu1 %vm1085_vm12, %v3070_v20 }
 0x1e9   : > { %3395 = vmatmul.mubr.msk.bf16.gmra.mxu1 %vm1085_vm12, %v3071_v27 }
 0x24f   : > { %v3264_v30 = vpop.f32.mrf.mxu1 }
 0x251   : > { %v1132_v31 = vpop.f32.mrf.mxu1 }
 0x253   : > { %v3265_v34 = vpop.f32.mrf.mxu1 }
 0x255   : > { %v1135_v35 = vpop.f32.mrf.mxu1  ;;  %v3312_v39 = vpop.f32.mrf.mxu0 }
 0x257   : > { %v1565_v45 = vpop.f32.mrf.mxu0 }
 0x259   : > { %v3268_v36 = vpop.f32.mrf.mxu1  ;;  %v3313_v49 = vpop.f32.mrf.mxu0 }
 0x25b   : > { %v1148_v37 = vpop.f32.mrf.mxu1  ;;  %v1568_v53 = vpop.f32.mrf.mxu0 }
 0x25d   : > { %v4488_v38 = vpop.f32.mrf.mxu1  ;;  %v4492_v55 = vpop.f32.mrf.mxu0 }
 0x25f   : > { %v4490_v44 = vpop.f32.mrf.mxu1  ;;  %v4494_v57 = vpop.f32.mrf.mxu0 }
 0x261   : > { %v3280_v47 = vpop.f32.mrf.mxu1  ;;  %v4496_v61 = vpop.f32.mrf.mxu0 }
 0x262   : > { %v1262_v14 = vadd.f32 %v3280_v47, %v3264_v30 }
 0x263   : > { %v1253_v50 = vpop.f32.mrf.mxu1  ;;  %v4498_v62 = vpop.f32.mrf.mxu0 }
 0x264   : > { %v1254_v48 = vadd.f32 %v1253_v50, %v1132_v31 }
 0x265   : > { %v3281_v54 = vpop.f32.mrf.mxu1 }
 0x266   : > { %v1265_v20 = vadd.f32 %v3281_v54, %v3265_v34 }
 0x267   : > { %v1256_v56 = vpop.f32.mrf.mxu1 }
 0x268   : > { %v1257_v58 = vadd.f32 %v1256_v56, %v1135_v35 }
 0x269   : > { %v3284_v15 = vpop.f32.mrf.mxu1 }
 0x26a   : > { %v1278_v23 = vadd.f32 %v3284_v15, %v3268_v36 }
 0x26b   : > { %v1269_v60 = vpop.f32.mrf.mxu1 }
 0x26d   : > { %v3285_v41 = vpop.f32.mrf.mxu1 }
 0x26e   : > { %v1281_v35 = vadd.f32 %v3285_v41, %v4488_v38 }
 0x26f   : > { %v1272_v13 = vpop.f32.mrf.mxu1  ;;  %v3344_v3 = vpop.f32.mrf.mxu0 }
 0x271   : > { %v3296_v1 = vpop.f32.mrf.mxu1  ;;  %v1977_v0 = vpop.f32.mrf.mxu0 }
 0x272   : > { %v1451_v18 = vadd.f32 %v3296_v1, %v1262_v14 }
 0x273   : > { %v1418_v59 = vpop.f32.mrf.mxu1  ;;  %v3345_v6 = vpop.f32.mrf.mxu0 }
 0x274   : > { %v1449_v22 = vadd.f32 %v1418_v59, %v1254_v48  ;;  %v1598_v63 = vadd.f32 %v3312_v39, %v1451_v18  ;;  %v1273_v39 = vadd.f32 %v1272_v13, %v4490_v44 }
 0x275   : > { %v3297_v4 = vpop.f32.mrf.mxu1  ;;  %v1980_v7 = vpop.f32.mrf.mxu0 }
 0x276   : > { %v1452_v27 = vadd.f32 %v3297_v4, %v1265_v20  ;;  %v1596_v2 = vadd.f32 %v1565_v45, %v1449_v22 }
 0x277   : > { %v1421_v16 = vpop.f32.mrf.mxu1 }
 0x278   : > { %v1450_v29 = vadd.f32 %v1421_v16, %v1257_v58  ;;  %v1599_v47 = vadd.f32 %v3313_v49, %v1452_v27 }
 0x279   : > { %v3300_v12 = vpop.f32.mrf.mxu1  ;;  %v4500_v46 = vpop.f32.mrf.mxu0 }
 0x27a   : > { %4679 = vst [vmem:[#allocation18_spill] sm:$0xff] %v4500_v46  ;;  %v1455_v46 = vadd.f32 %v3300_v12, %v1278_v23  ;;  %v1597_v34 = vadd.f32 %v1568_v53, %v1450_v29 }
 0x27b   : > { %v1434_v5 = vpop.f32.mrf.mxu1  ;;  %v4502_v32 = vpop.f32.mrf.mxu0 }
 0x27c   : > { %4680 = vst [vmem:[#allocation19_spill] sm:$0xff] %v4502_v32  ;;  %v1270_v32 = vadd.f32 %v1269_v60, %v1148_v37  ;;  %v1602_v45 = vadd.f32 %v4492_v55, %v1455_v46 }
 0x27d   : > { %v3301_v40 = vpop.f32.mrf.mxu1  ;;  %v4504_v24 = vpop.f32.mrf.mxu0 }
 0x27e   : > { %4681 = vst [vmem:[#allocation20_spill] sm:$0xff] %v4504_v24  ;;  %v1453_v50 = vadd.f32 %v1434_v5, %v1270_v32  ;;  %v1456_v60 = vadd.f32 %v3301_v40, %v1281_v35 }
 0x27f   : > { %v1437_v21 = vpop.f32.mrf.mxu1  ;;  %v4506_v11 = vpop.f32.mrf.mxu0 }
 0x280   : > { %4682 = vst [vmem:[#allocation21_spill] sm:$0xff] %v4506_v11  ;;  %v1600_v49 = vadd.f32 %v4494_v57, %v1453_v50  ;;  %v1454_v4 = vadd.f32 %v1437_v21, %v1273_v39  ;;  %v1603_v13 = vadd.f32 %v4496_v61, %v1456_v60  ;;  %v3080_v57 = vld [vmem:[%s4683_s21] ss:$0 sm:$0xff] }
 0x281   : > { %v3328_v8 = vpop.f32.mrf.mxu1  ;;  %v4684_v40 = vld [vmem:[#allocation18_spill] sm:$0xff] }
 0x282   : > { %v1836_v11 = vadd.f32 %v3328_v8, %v1598_v63  ;;  %v1601_v55 = vadd.f32 %v4498_v62, %v1454_v4 }
 0x283   : > { %v1803_v52 = vpop.f32.mrf.mxu1 }
 0x284   : > { %v3376_v42 = vpop.f32.mrf.mxu0  ;;  %v1834_v31 = vadd.f32 %v1803_v52, %v1596_v2  ;;  %v2010_v54 = vadd.f32 %v3344_v3, %v1836_v11 }
 0x285   : > { %v3329_v51 = vpop.f32.mrf.mxu1  ;;  %v4687_v63 = vld [vmem:[#allocation20_spill] sm:$0xff] }
 0x286   : > { %v2362_v25 = vpop.f32.mrf.mxu0  ;;  %v1837_v59 = vadd.f32 %v3329_v51, %v1599_v47  ;;  %v2008_v56 = vadd.f32 %v1977_v0, %v1834_v31 }
 0x287   : > { %v1806_v43 = vpop.f32.mrf.mxu1  ;;  %v4688_v27 = vld [vmem:[#allocation21_spill] sm:$0xff] }
 0x288   : > { %v3377_v24 = vpop.f32.mrf.mxu0  ;;  %v1835_v15 = vadd.f32 %v1806_v43, %v1597_v34  ;;  %v2011_v12 = vadd.f32 %v3345_v6, %v1837_v59 }
 0x289   : > { %v3332_v10 = vpop.f32.mrf.mxu1 }
 0x28a   : > { %v2365_v14 = vpop.f32.mrf.mxu0  ;;  %v1840_v53 = vadd.f32 %v3332_v10, %v1602_v45  ;;  %v2009_v38 = vadd.f32 %v1980_v7, %v1835_v15  ;;  %v4685_v10 = vld [vmem:[#allocation19_spill] sm:$0xff] }
 0x28b   : > { %v1819_v33 = vpop.f32.mrf.mxu1 }
 0x28c   : > { %v1838_v8 = vadd.f32 %v1819_v33, %v1600_v49  ;;  %v2014_v21 = vadd.f32 %v4684_v40, %v1840_v53 }
 0x28d   : > { %v3333_v9 = vpop.f32.mrf.mxu1 }
 0x28e   : > { %v1841_v43 = vadd.f32 %v3333_v9, %v1603_v13  ;;  %v2012_v7 = vadd.f32 %v4685_v10, %v1838_v8 }
 0x28f   : > { %v1822_v17 = vpop.f32.mrf.mxu1 }
 0x290   : > { %v1839_v11 = vadd.f32 %v1822_v17, %v1601_v55  ;;  %v2015_v9 = vadd.f32 %v4687_v63, %v1841_v43  ;;  %v3091_v43 = vld [vmem:[%s4689_s8] ss:$0 sm:$0xff]  ;;  %s3787_s8 = smov [#allocation8]  }
 0x291   : > { %v3360_v19 = vpop.f32.mrf.mxu1  ;;  %s3659_s3 = sshll.u32 %s3787_s8, 4  ;;  %s3660_s3 = int_to_ptr.vmem [resolvable:$false] %s3659_s3 }
 0x292   : > { %v2157_v37 = vadd.f32 %v3360_v19, %v2010_v54  ;;  %v3081_v19 = vld [vmem:[%s4686_s16] ss:$0 sm:$0xff]  ;;  %s3112_s16 = sshll.u32 %s2810_s11, 10  ;;  %s3661_s21 = scalar_lea.vmem %s3660_s3, 2048 }
 0x293   : > { %v2124_v26 = vpop.f32.mrf.mxu1  ;;  %v3380_v5 = vpop.f32.mrf.mxu0  ;;  %p3662_p6 = scmp.lt.s32.totalorder %s4552_s28, %s3660_s3  ;;  %p3663_p8 = scmp.lt.s32.totalorder %s3661_s21, %s3655_s6 }
 0x294   : > { %v2155_v3 = vadd.f32 %v2124_v26, %v2008_v56  ;;  %v2395_v41 = vadd.f32 %v3376_v42, %v2157_v37 }
 0x295   : > { %v3361_v28 = vpop.f32.mrf.mxu1  ;;  %v2378_v51 = vpop.f32.mrf.mxu0  ;;  %p3664_p7 = por %p3663_p8, %p3662_p6 }
 0x296   : > { %v2158_v44 = vadd.f32 %v3361_v28, %v2011_v12  ;;  %v2393_v6 = vadd.f32 %v2362_v25, %v2155_v3  ;;  %v2013_v28 = vadd.f32 %v4688_v27, %v1839_v11  ;;  %v3114_v11 = vld [vmem:[%s2730_s9] sm:$0xff]  }
 0x297   : > { %v2127_v30 = vpop.f32.mrf.mxu1  ;;  %v3381_v25 = vpop.f32.mrf.mxu0  ;;  %p3665_p9 = pnand %p3664_p7, %p3658_p5 }
 0x298   : > { %v2156_v46 = vadd.f32 %v2127_v30, %v2009_v38  ;;  %v2396_v42 = vadd.f32 %v3377_v24, %v2158_v44 }
 0x299   : > { %v3364_v1 = vpop.f32.mrf.mxu1 }
 0x29a   : > { %v2161_v61 = vadd.f32 %v3364_v1, %v2014_v21  ;;  %v2394_v22 = vadd.f32 %v2365_v14, %v2156_v46  ;;  %v2381_v1 = vpop.f32.mrf.mxu0 }
 0x29b   : > { %v2140_v36 = vpop.f32.mrf.mxu1 }
 0x29c   : > { %v2159_v18 = vadd.f32 %v2140_v36, %v2012_v7  ;;  %v2399_v23 = vadd.f32 %v3380_v5, %v2161_v61  ;;  %v3092_v7 = vld [vmem:[%s4690_s12] ss:$0 sm:$0xff] }
 0x29d   : > { %v3365_v16 = vpop.f32.mrf.mxu1 }
 0x29e   : > { %v2162_v30 = vadd.f32 %v3365_v16, %v2015_v9  ;;  %v2397_v47 = vadd.f32 %v2378_v51, %v2159_v18  ;;  %v3116_v9 = vunpack.c.h.bf16 %v3114_v11 }
 0x29f   : > { %v2143_v52 = vpop.f32.mrf.mxu1 }
 0x2a0   : > { %v2160_v31 = vadd.f32 %v2143_v52, %v2013_v28  ;;  %v2400_v15 = vadd.f32 %v3381_v25, %v2162_v30 }
 0x2a1   : > { %v3392_v0 = vpop.f32.mrf.mxu1 }
 0x2a2   : > { %v2569_v32 = vadd.f32 %v3392_v0, %v2395_v41  ;;  %v2398_v37 = vadd.f32 %v2381_v1, %v2160_v31 }
 0x2a3   : > { %v2536_v33 = vpop.f32.mrf.mxu1 }
 0x2a4   : > { %v2584_v48 = vmul.f32 %v3080_v57, %v2569_v32  ;;  %v2567_v62 = vadd.f32 %v2536_v33, %v2393_v6 }
 0x2a5   : > { %v3393_v20 = vpop.f32.mrf.mxu1 }
 0x2a6   : > { %v2582_v26 = vmul.f32 %v3080_v57, %v2567_v62  ;;  %v2570_v58 = vadd.f32 %v3393_v20, %v2396_v42  ;;  %v2599_v24 = vadd.f32 %v3081_v19, %v2584_v48  ;;  %v3115_v62 = vunpack.c.l.bf16 %v3114_v11 }
 0x2a7   : > { %v2539_v17 = vpop.f32.mrf.mxu1 }
 0x2a8   : > { %v2585_v2 = vmul.f32 %v3080_v57, %v2570_v58  ;;  %v2568_v29 = vadd.f32 %v2539_v17, %v2394_v22  ;;  %v2597_v34 = vadd.f32 %v3081_v19, %v2582_v26  ;;  %v2607_v39 = vmax.f32 %v2599_v24, 0.0  ;;  %v3131_v58 = vld [vmem:[%s2730_s9 + $0x18] sm:$0xff]   ;;  %v3130_v24 = vld [vmem:[%s2730_s9 + $0x10] sm:$0xff]  }
 0x2a9   : > { %v3396_v50 = vpop.f32.mrf.mxu1 }
 0x2aa   : > { %v2600_v54 = vadd.f32 %v3081_v19, %v2585_v2  ;;  %v2583_v59 = vmul.f32 %v3080_v57, %v2568_v29  ;;  %v2573_v14 = vadd.f32 %v3396_v50, %v2399_v23  ;;  %v2605_v4 = vmax.f32 %v2597_v34, 0.0 }
 0x2ab   : > { %v2552_v35 = vpop.f32.mrf.mxu1  ;;  %v3127_v29 = vunpack.c.l.bf16 %v3131_v58  ;;  %v3123_v34 = vunpack.c.l.bf16 %v3130_v24 }
 0x2ac   : > { %v2608_v36 = vmax.f32 %v2600_v54, 0.0  ;;  %v2598_v45 = vadd.f32 %v3081_v19, %v2583_v59  ;;  %v2571_v56 = vadd.f32 %v2552_v35, %v2397_v47  ;;  %v2588_v60 = vmul.f32 %v3080_v57, %v2573_v14 }
 0x2ad   : > { %v3397_v49 = vpop.f32.mrf.mxu1 }
 0x2ae   : > { %v2614_v12 = vpack.c.bf16 %v2608_v36, %v2607_v39  ;;  %v2606_v16 = vmax.f32 %v2598_v45, 0.0  ;;  %v2586_v53 = vmul.f32 %v3080_v57, %v2571_v56  ;;  %v2574_v3 = vadd.f32 %v3397_v49, %v2400_v15 }
 0x2af   : > { %v2555_v5 = vpop.f32.mrf.mxu1  ;;  %v2603_v38 = vadd.f32 %v3081_v19, %v2588_v60  ;;  %v3128_v36 = vunpack.c.h.bf16 %v3131_v58  ;;  %v3124_v49 = vunpack.c.h.bf16 %v3130_v24 }
 0x2b0   : > { %v2613_v8 = vpack.c.bf16 %v2606_v16, %v2605_v4  ;;  %v2572_v52 = vadd.f32 %v2555_v5, %v2398_v37  ;;  %v2589_v41 = vmul.f32 %v3080_v57, %v2574_v3  ;;  %v2601_v44 = vadd.f32 %v3081_v19, %v2586_v53 }
 0x2b1   : > { %v2611_v40 = vmax.f32 %v2603_v38, 0.0 }
 0x2b2   : > { %v2587_v13 = vmul.f32 %v3080_v57, %v2572_v52  ;;  %3406 = vmatprep.mubr.msk.bf16.mxu0 %vm1085_vm12, %v2613_v8  ;;  %v2604_v55 = vadd.f32 %v3081_v19, %v2589_v41  ;;  %v2609_v6 = vmax.f32 %v2601_v44, 0.0  ;;  %v3129_v57 = vld [vmem:[%s2730_s9 + $0x8] sm:$0xff]   ;;  %s4550_s9 = scalar_lea.hbm %s4693_s10, %s3112_s16 }
 0x2b3   : > { %3407 = vmatmul.mubr.msk.bf16.vlgmr.msra.gmra.mxu0 %vm1085_vm12, %v2614_v12  ;;  %v3119_v33 = vunpack.c.l.bf16 %v3129_v57  ;;  %v3120_v25 = vunpack.c.h.bf16 %v3129_v57 }
 0x2b4   : > { %v2602_v0 = vadd.f32 %v3081_v19, %v2587_v13  ;;  %v2612_v21 = vmax.f32 %v2604_v55, 0.0 }
 0x2b6   : > { %v2610_v46 = vmax.f32 %v2602_v0, 0.0  ;;  %v2616_v51 = vpack.c.bf16 %v2612_v21, %v2611_v40 }
 0x2b8   : > { %v2615_v32 = vpack.c.bf16 %v2610_v46, %v2609_v6 }
 0x2ba   : > { %3410 = vmatprep.mubr.msk.bf16.mxu0 %vm1085_vm12, %v2615_v32 }
 0x2bb   : > { %3411 = vmatmul.mubr.msk.bf16.gmra.mxu0 %vm1085_vm12, %v2616_v51 }
 0x373   : > { %v3408_v10 = vpop.f32.mrf.mxu0 }
 0x374   : > { %v2748_v42 = vmul.f32 %v3408_v10, %v3091_v43 }
 0x375   : > { %v2695_v61 = vpop.f32.mrf.mxu0 }
 0x376   : > { %v2763_v48 = vadd.f32 %v3092_v7, %v2748_v42  ;;  %v2746_v18 = vmul.f32 %v3091_v43, %v2695_v61 }
 0x377   : > { %v3409_v19 = vpop.f32.mrf.mxu0 }
 0x378   : > { %v2779_v20 = vadd.f32 %v3119_v33, %v2763_v48  ;;  %v2761_v22 = vadd.f32 %v3092_v7, %v2746_v18  ;;  %v2749_v26 = vmul.f32 %v3409_v19, %v3091_v43 }
 0x379   : > { %v2698_v63 = vpop.f32.mrf.mxu0 }
 0x37a   : > { %v2787_v27 = vmax.f32 %v2779_v20, 0.0  ;;  %v2777_v28 = vadd.f32 %v3115_v62, %v2761_v22  ;;  %v2764_v17 = vadd.f32 %v3092_v7, %v2749_v26  ;;  %v2747_v23 = vmul.f32 %v3091_v43, %v2698_v63 }
 0x37b   : > { %v3412_v2 = vpop.f32.mrf.mxu0 }
 0x37c   : > { %2795 = vst [vmem:[%s4167_s20 + $0x10] sm:$0xff] %v2787_v27  ;;  %v2785_v30 = vmax.f32 %v2777_v28, 0.0  ;;  %v2780_v47 = vadd.f32 %v3120_v25, %v2764_v17  ;;  %v2762_v31 = vadd.f32 %v3092_v7, %v2747_v23  ;;  %v2752_v50 = vmul.f32 %v3412_v2, %v3091_v43 }
 0x37d   : > { %v2711_v1 = vpop.f32.mrf.mxu0 }
 0x37e   : > { %2793 = vst [vmem:[%s4167_s20] sm:$0xff] %v2785_v30  ;;  %v2788_v54 = vmax.f32 %v2780_v47, 0.0  ;;  %v2778_v59 = vadd.f32 %v3116_v9, %v2762_v31  ;;  %v2767_v14 = vadd.f32 %v3092_v7, %v2752_v50  ;;  %v2750_v35 = vmul.f32 %v3091_v43, %v2711_v1 }
 0x37f   : > { %v3413_v39 = vpop.f32.mrf.mxu0 }
 0x380   : > { %2796 = vst [vmem:[%s4167_s20 + $0x18] sm:$0xff] %v2788_v54  ;;  %v2786_v45 = vmax.f32 %v2778_v59, 0.0  ;;  %v2783_v56 = vadd.f32 %v3127_v29, %v2767_v14  ;;  %v2765_v15 = vadd.f32 %v3092_v7, %v2750_v35  ;;  %v2753_v37 = vmul.f32 %v3413_v39, %v3091_v43 }
 0x381   : > { %v2714_v60 = vpop.f32.mrf.mxu0 }
 0x382   : > { %2794 = vst [vmem:[%s4167_s20 + $0x8] sm:$0xff] %v2786_v45  ;;  %v2791_v4 = vmax.f32 %v2783_v56, 0.0  ;;  %v2781_v12 = vadd.f32 %v3123_v34, %v2765_v15  ;;  %v2768_v16 = vadd.f32 %v3092_v7, %v2753_v37  ;;  %v2751_v53 = vmul.f32 %v3091_v43, %v2714_v60 }
 0x384   : > { %2799 = vst [vmem:[%s4167_s20 + $0x30] sm:$0xff] %v2791_v4  ;;  %v2789_v3 = vmax.f32 %v2781_v12, 0.0  ;;  %v2784_v5 = vadd.f32 %v3128_v36, %v2768_v16  ;;  %v2766_v8 = vadd.f32 %v3092_v7, %v2751_v53 }
 0x386   : > { %2797 = vst [vmem:[%s4167_s20 + $0x20] sm:$0xff] %v2789_v3  ;;  %v2792_v52 = vmax.f32 %v2784_v5, 0.0  ;;  %v2782_v38 = vadd.f32 %v3124_v49, %v2766_v8 }
 0x388   : > { %2800 = vst [vmem:[%s4167_s20 + $0x38] sm:$0xff] %v2792_v52  ;;  %v2790_v41 = vmax.f32 %v2782_v38, 0.0 }
 0x38a   : > { %2798 = vst [vmem:[%s4167_s20 + $0x28] sm:$0xff] %v2790_v41 }
 0x38b   : > { %3668 = shalt.err (!%p3665_p9)
}
 0x38c   : > { %s3669_s5 = scalar_lea.hbm %s4550_s9, 1024  ;;  %s3673_s27 = scalar_lea.hbm %s4693_s10, 8192 }
 0x38d   : > { %p3670_p10 = scmp.ne.s32.totalorder %s4550_s9, %s3669_s5  ;;  %p3674_p0 = scmp.lt.s32.totalorder %s4550_s9, %s4693_s10 }
 0x38e   : > { %p3675_p1 = scmp.lt.s32.totalorder %s3673_s27, %s3669_s5 }
 0x38f   : > { %p3671_p12 = pnand %p3670_p10, %p4694_p2 }
 0x390   : > { %p3676_p3 = por %p3675_p1, %p3674_p0 }
 0x391   : > { %p3672_p13 = pneg %p3671_p12 }
 0x393   : > { %p3677_p11 = pnand %p3676_p3, %p3672_p13 }
 0x395   : > { %3680 = shalt.err (!%p3677_p11)
}
 0x396   : > { %s3788_s16 = smov 128   ;;  %s3789_s4 = smov 8  }
 0x397   : > { %3422 = dma.vmem_to_hbm [thread:$0]  (%p4694_p2), %s4552_s28, 1024, %s4550_s9, %s4558_s26, %s3788_s16, %s3788_s16, %s3789_s4  }
 0x398 PF: > { %s4695_s19 = sld [smem:[#allocation12_spill]]  ;;  %p3439_p4 = scmp.ge.s32.totalorder %s3779_s23, 2 }
 0x399   : > { %s4696_s6 = sld [smem:[#allocation16_spill]] }
 0x39e   : > { %s2832_s8 = sand.u32 1, %s4695_s19  }
 0x39f   : > { %p4697_p5 = scmp.ne.s32.totalorder %s4696_s6, 0  ;;  %s2833_s3 = scalar_lea.sflag [#allocation5], %s2832_s8 }
 0x3a1   : > { %p3433_p6 = pnand %p3439_p4, %p4697_p5 }
 0x3a3   : > { %p3434_p8 = pneg %p3433_p6 }
 0x3a5   : > { %3734 = dma.done.wait (%p3434_p8), %s2833_s3, 1024  }
 0x3a6   : > { %3736 = vsyncadd (%p3434_p8), %s2833_s3, 4294966272  ;;  %s27_s23 = sadd.s32 1, %s3779_s23   ;;  %s4698_s21 = smov %s3981_s13 }
 0x3a7   : > { %p24_p7 = scmp.ge.s32.totalorder %s27_s23, 10   ;;  %s4699_s19 = sld [smem:[#allocation14_spill]] }
 0x3a8   : > { %s4700_s7 = sld [smem:[#allocation17_spill]]  ;;  %s4701_s13 = smov %s3743_s14 }
 0x3a9   : > { %s4702_s14 = smov %s3747_s15  ;;  %s4703_s15 = smov %s4698_s21 }
 0x3aa   : > { %s4704_s16 = smov %s3755_s17  ;;  %s4705_s17 = smov %s3759_s18 }
 0x3ab   : > { %s4706_s18 = smov %s3965_s29  ;;  %s4707_s20 = smov %s3775_s22 }
 0x3ac   : > { %s4708_s21 = smov %s4711_s30  ;;  %26 = sbr.rel (!%p24_p7) target bundleno = 19 (0x13), region = 130 }
 0x3ae   : > { %s4709_s22 = smov %s4700_s7 }
 0x3b1   :  { %2838 = vsyncpa [#allocation4], 1 }
 0x3b2   :  { %2840 = vsyncpa [#allocation4 + $0x1], 1 }
 0x3b3   :  { %2841 = vsyncpa [#allocation7], 1 }
 0x3b4   :  { %2842 = vsyncpa [#allocation5], 1 }
 0x3b5   :  { %2844 = vsyncpa [#allocation5 + $0x1], 1 }

</bundles_post_ra>
